<compile_context>
chip_gen: v7x
topology: tpu7x:2x2x1
jax: 0.10.0
libtpu: 0.0.40
codegen_flags: <defaults>
</compile_context>

<pallas_src>
import numpy as np
import jax
import jax.numpy as jnp
from jax.experimental import pallas as pl
from jax.experimental.pallas import tpu as pltpu

EPS = 1e-5
_S = 36      # per-sample row stride of the working frame (28 image rows + 8 zero-pad rows)
_K = 5       # conv kernel size


# --------------------------------- kernel -----------------------------------

def _lenet5_kernel(x_ref, m1_ref, m2_ref, gamma1_ref, beta1_ref, gamma2_ref,
                   beta2_ref, g1_ref, g1t_ref, g2_ref, g2t_ref, wf_ref, sel_ref,
                   fb0_ref, w1t_ref, fb1_ref, w2t_ref, fb2_ref, o_ref):
    f32 = jnp.float32
    bf16 = jnp.bfloat16
    N = o_ref.shape[0]
    R = x_ref.shape[0]              # N * 36 rows (28 image rows + 8 zero rows per sample)
    Lz1 = R - 4                     # conv1 frame rows  (valid rows: r % 36 < 24)
    Lz2 = R - 13                    # conv2 frame rows  (valid rows: r % 36 even and < 16)
    Lp2 = R - 15                    # pool2 frame rows  (valid rows: r % 36 in {0,4,8,12})

    x = x_ref[...]                  # (N*36, 28) f32

    # ---- conv1: 5 height-tap matmuls against width-banded weight matrices ----
    z1 = jnp.dot(x[0:Lz1, :].astype(bf16), m1_ref[0], preferred_element_type=f32)
    for di in range(1, _K):
        z1 = z1 + jnp.dot(x[di:di + Lz1, :].astype(bf16), m1_ref[di],
                          preferred_element_type=f32)            # (Lz1, 6*24)

    # ---- BatchNorm1 (training-mode batch stats, two-pass) + ReLU ----
    rows1 = jax.lax.broadcasted_iota(jnp.int32, (Lz1, 144), 0)
    valid1 = (rows1 % _S) < 24
    cnt1 = float(N * 24 * 24)
    g1 = g1_ref[...]
    g1t = g1t_ref[...]
    mean1 = jnp.dot(jnp.sum(jnp.where(valid1, z1, 0.0), axis=0, keepdims=True),
                    g1, preferred_element_type=f32) / cnt1        # (1, 6)
    z1 = z1 - jnp.dot(mean1, g1t, preferred_element_type=f32)
    var1 = jnp.dot(jnp.sum(jnp.where(valid1, z1 * z1, 0.0), axis=0, keepdims=True),
                   g1, preferred_element_type=f32) / cnt1         # (1, 6)
    scale1 = gamma1_ref[...] * jax.lax.rsqrt(var1 + EPS)
    y1 = jnp.maximum(z1 * jnp.dot(scale1, g1t, preferred_element_type=f32)
                     + jnp.dot(beta1_ref[...], g1t, preferred_element_type=f32), 0.0)
    # TODO(synk): nn.BatchNorm2d running_mean/running_var momentum updates (training side
    # effect that does not change the forward output) are not reproduced.

    # ---- 2x2 max-pool #1 (adjacent-lane max, then adjacent-row max) ----
    p1 = jnp.maximum(y1[:, 0:143], y1[:, 1:144])                  # (Lz1,   143)
    p1 = jnp.maximum(p1[0:Lz1 - 1, :], p1[1:Lz1, :])              # (Lz1-1, 143)

    # ---- conv2 over the packed (c1, w) lanes of the pooled layer-1 activation ----
    z2 = jnp.dot(p1[0:Lz2, :].astype(bf16), m2_ref[0], preferred_element_type=f32)
    for di in range(1, _K):
        z2 = z2 + jnp.dot(p1[2 * di:2 * di + Lz2, :].astype(bf16), m2_ref[di],
                          preferred_element_type=f32)             # (Lz2, 16*8)

    # ---- BatchNorm2 + ReLU ----
    rows2 = jax.lax.broadcasted_iota(jnp.int32, (Lz2, 128), 0)
    valid2 = ((rows2 % _S) < 16) & ((rows2 % 2) == 0)
    cnt2 = float(N * 8 * 8)
    g2 = g2_ref[...]
    g2t = g2t_ref[...]
    mean2 = jnp.dot(jnp.sum(jnp.where(valid2, z2, 0.0), axis=0, keepdims=True),
                    g2, preferred_element_type=f32) / cnt2        # (1, 16)
    z2 = z2 - jnp.dot(mean2, g2t, preferred_element_type=f32)
    var2 = jnp.dot(jnp.sum(jnp.where(valid2, z2 * z2, 0.0), axis=0, keepdims=True),
                   g2, preferred_element_type=f32) / cnt2         # (1, 16)
    scale2 = gamma2_ref[...] * jax.lax.rsqrt(var2 + EPS)
    y2 = jnp.maximum(z2 * jnp.dot(scale2, g2t, preferred_element_type=f32)
                     + jnp.dot(beta2_ref[...], g2t, preferred_element_type=f32), 0.0)

    # ---- 2x2 max-pool #2 ----
    p2 = jnp.maximum(y2[:, 0:127], y2[:, 1:128])                  # (Lz2, 127)
    p2 = jnp.maximum(p2[0:Lz2 - 2, :], p2[2:Lz2, :])              # (Lp2, 127)

    # ---- FC head: the pooled-row gather and PyTorch's NCHW flatten are baked into
    #      the precomputed sel / wf matrices ----
    h = jnp.zeros((N, 120), f32) + fb0_ref[...]
    for ph in range(4):
        rows_ph = jnp.dot(sel_ref[ph], p2, preferred_element_type=f32)      # (N, 127)
        h = h + jnp.dot(rows_ph.astype(bf16), wf_ref[ph],
                        preferred_element_type=f32)
    h = jnp.maximum(h, 0.0)
    h = jnp.maximum(jnp.dot(h.astype(bf16), w1t_ref[...],
                            preferred_element_type=f32) + fb1_ref[...], 0.0)
    o_ref[...] = jnp.dot(h.astype(bf16), w2t_ref[...],
                         preferred_element_type=f32) + fb2_ref[...]


# ----------------------------- parameter folding -----------------------------

def prepare_params(params, batch_size):
    """One-time folding of weights into matmul-ready matrices (kept out of the
    per-step forward path)."""
    f32, bf16 = jnp.float32, jnp.bfloat16
    N = batch_size

    w1 = params["w1"].astype(f32)        # (6, 1, 5, 5)
    w2 = params["w2"].astype(f32)        # (16, 6, 5, 5)
    fcw0 = params["fcw0"].astype(f32)    # (120, 256)

    # conv1: M1[di, w_in, c1*24 + ow] = w1[c1, 0, di, w_in - ow]
    t1 = np.zeros((_K, 28, 24), np.float32)
    for dj in range(_K):
        for ow in range(24):
            t1[dj, ow + dj, ow] = 1.0
    m1 = jnp.einsum("cde,ewo->dwco", w1[:, 0], jnp.asarray(t1))
    m1 = m1.reshape(_K, 28, 6 * 24).astype(bf16)

    # conv2 over packed (c1, w) lanes of the pooled layer-1 activation; the valid pooled
    # value for (c1, pw1) lives at lane c1*24 + 2*pw1, so pool #1's even-lane selection
    # is folded in here.
    s2 = np.zeros((6, _K, 143, 8), np.float32)
    for c1 in range(6):
        for dj in range(_K):
            for ow in range(8):
                s2[c1, dj, c1 * 24 + 2 * (ow + dj), ow] = 1.0
    m2 = jnp.einsum("acde,celo->dlao", w2, jnp.asarray(s2))
    m2 = m2.reshape(_K, 143, 16 * 8).astype(bf16)

    # fc folded over the packed (c2, w) lanes of the pooled layer-2 activation, one matrix
    # per pooled row ph2; reproduces PyTorch's out.view(N, -1) NCHW flatten order.
    s3 = np.zeros((4, 127, 256), np.float32)
    for ph in range(4):
        for c2 in range(16):
            for pw in range(4):
                s3[ph, c2 * 8 + 2 * pw, c2 * 16 + ph * 4 + pw] = 1.0
    wf = jnp.einsum("plj,oj->plo", jnp.asarray(s3), fcw0).astype(bf16)   # (4, 127, 120)

    # 0/1 row-selection matrices (pick working-frame row n*36 + 4*ph2 for every sample).
    sel = np.zeros((4, N, N * _S - 15), np.float32)
    for ph in range(4):
        for n in range(N):
            sel[ph, n, n * _S + 4 * ph] = 1.0

    # per-channel lane-group indicators for the BatchNorm reductions
    g1 = np.zeros((144, 6), np.float32)
    for c in range(6):
        g1[c * 24:(c + 1) * 24, c] = 1.0
    g2 = np.zeros((128, 16), np.float32)
    for c in range(16):
        g2[c * 8:(c + 1) * 8, c] = 1.0

    # NOTE: conv biases params["b1"]/params["b2"] are intentionally not used: they cancel
    # exactly under the training-mode BatchNorm mean subtraction (no forward effect).
    return dict(
        m1=m1, m2=m2, wf=wf, sel=jnp.asarray(sel),
        G1=jnp.asarray(g1), G1T=jnp.asarray(g1.T),
        G2=jnp.asarray(g2), G2T=jnp.asarray(g2.T),
        gamma1=params["g1"].reshape(1, 6).astype(f32),
        beta1=params["be1"].reshape(1, 6).astype(f32),
        gamma2=params["g2"].reshape(1, 16).astype(f32),
        beta2=params["be2"].reshape(1, 16).astype(f32),
        fb0=params["fcb0"].reshape(1, -1).astype(f32),
        w1t=params["fcw1"].T.astype(bf16),
        fb1=params["fcb1"].reshape(1, -1).astype(f32),
        w2t=params["fcw2"].T.astype(bf16),
        fb2=params["fcb2"].reshape(1, -1).astype(f32),
    )


# --------------------------------- wrapper -----------------------------------

def lenet5_forward(x, prep):
    # x: (N, 1, 28, 28) float32, NCHW (PyTorch convention)
    N = x.shape[0]
    num_classes = prep["fb2"].shape[1]
    # Working frame: 36 rows per sample = 28 image rows + 8 zero rows, so every in-kernel
    # slice keeps a fixed length; invalid rows are masked out of the BN statistics and
    # never selected by the pooling / FC fold matrices.
    xf = jnp.pad(x.reshape(N, 28, 28), ((0, 0), (0, _S - 28), (0, 0)))
    xf = xf.reshape(N * _S, 28)

    args = (xf, prep["m1"], prep["m2"], prep["gamma1"], prep["beta1"],
            prep["gamma2"], prep["beta2"], prep["G1"], prep["G1T"],
            prep["G2"], prep["G2T"], prep["wf"], prep["sel"],
            prep["fb0"], prep["w1t"], prep["fb1"], prep["w2t"], prep["fb2"])

    # TODO(synk): for large batches this grid-less kernel should get a row-blocked grid
    # ("parallel" row axis for v7x's two TensorCores) with two-pass BN accumulation; at
    # small batch a single invocation with everything VMEM-resident is latency-optimal.
    return pl.pallas_call(
        _lenet5_kernel,
        out_shape=jax.ShapeDtypeStruct((N, num_classes), jnp.float32),
        in_specs=[pl.BlockSpec(memory_space=pltpu.MemorySpace.VMEM)] * len(args),
        out_specs=pl.BlockSpec(memory_space=pltpu.MemorySpace.VMEM),
    )(*args)


def init_params(key, num_classes=10):
    ks = jax.random.split(key, 14)
    rn = lambda k, s, sc: sc * jax.random.normal(k, s, jnp.float32)
    p = {}
    p["w1"] = rn(ks[0], (6, 1, 5, 5), 0.2)
    p["b1"] = rn(ks[1], (6,), 0.1)       # conv bias: cancels under training-mode BN
    p["g1"] = 1.0 + 0.1 * jax.random.normal(ks[2], (6,), jnp.float32)
    p["be1"] = rn(ks[3], (6,), 0.1)
    p["w2"] = rn(ks[4], (16, 6, 5, 5), 0.1)
    p["b2"] = rn(ks[5], (16,), 0.1)      # conv bias: cancels under training-mode BN
    p["g2"] = 1.0 + 0.1 * jax.random.normal(ks[6], (16,), jnp.float32)
    p["be2"] = rn(ks[7], (16,), 0.1)
    p["fcw0"] = rn(ks[8], (120, 256), 0.05)
    p["fcb0"] = rn(ks[9], (120,), 0.05)
    p["fcw1"] = rn(ks[10], (84, 120), 0.05)
    p["fcb1"] = rn(ks[11], (84,), 0.05)
    p["fcw2"] = rn(ks[12], (num_classes, 84), 0.05)
    p["fcb2"] = rn(ks[13], (num_classes,), 0.05)
    return p


if __name__ == "__main__":
    key = jax.random.PRNGKey(0)
    k_x, k_p = jax.random.split(key)
    # LeNet5 with fc(256, 120) implies 28x28 single-channel input (MNIST-like).
    x = jax.random.normal(k_x, (2, 1, 28, 28), jnp.float32)
    params = init_params(k_p, num_classes=10)
    prep = prepare_params(params, batch_size=x.shape[0])   # one-time weight folding

    logits = jax.jit(lenet5_forward)(x, prep)
    jax.block_until_ready(logits)
    assert logits.shape == (2, 10) and logits.dtype == jnp.float32
    assert bool(jnp.all(jnp.isfinite(logits)))
    print("KERNEL_OK")
</pallas_src>

<mosaic_0001>
module attributes {stable_mosaic.version = 11 : i64} {
  func.func @_lenet5_kernel(%arg0: memref<72x28xf32, #tpu.memory_space<vmem>>, %arg1: memref<5x28x144xbf16, #tpu.memory_space<vmem>>, %arg2: memref<5x143x128xbf16, #tpu.memory_space<vmem>>, %arg3: memref<1x6xf32, #tpu.memory_space<vmem>>, %arg4: memref<1x6xf32, #tpu.memory_space<vmem>>, %arg5: memref<1x16xf32, #tpu.memory_space<vmem>>, %arg6: memref<1x16xf32, #tpu.memory_space<vmem>>, %arg7: memref<144x6xf32, #tpu.memory_space<vmem>>, %arg8: memref<6x144xf32, #tpu.memory_space<vmem>>, %arg9: memref<128x16xf32, #tpu.memory_space<vmem>>, %arg10: memref<16x128xf32, #tpu.memory_space<vmem>>, %arg11: memref<4x127x120xbf16, #tpu.memory_space<vmem>>, %arg12: memref<4x2x57xf32, #tpu.memory_space<vmem>>, %arg13: memref<1x120xf32, #tpu.memory_space<vmem>>, %arg14: memref<120x84xbf16, #tpu.memory_space<vmem>>, %arg15: memref<1x84xf32, #tpu.memory_space<vmem>>, %arg16: memref<84x10xbf16, #tpu.memory_space<vmem>>, %arg17: memref<1x10xf32, #tpu.memory_space<vmem>>, %arg18: memref<2x10xf32, #tpu.memory_space<vmem>>) attributes {dimension_semantics = [], scalar_prefetch = 0 : i64, scratch_operands = 0 : i64, tpu.core_type = #tpu.core_type<tc>} {
    %c0 = arith.constant 0 : index
    %c0_0 = arith.constant 0 : index
    %0 = vector.load %arg0[%c0, %c0_0] : memref<72x28xf32, #tpu.memory_space<vmem>>, vector<72x28xf32>
    %1 = vector.extract_strided_slice %0 {offsets = [0, 0], sizes = [68, 28], strides = [1, 1]} : vector<72x28xf32> to vector<68x28xf32>
    %2 = arith.truncf %1 : vector<68x28xf32> to vector<68x28xbf16>
    %c0_1 = arith.constant 0 : index
    %c0_2 = arith.constant 0 : index
    %c0_3 = arith.constant 0 : index
    %3 = vector.load %arg1[%c0_1, %c0_2, %c0_3] : memref<5x28x144xbf16, #tpu.memory_space<vmem>>, vector<1x28x144xbf16>
    %4 = vector.shape_cast %3 : vector<1x28x144xbf16> to vector<28x144xbf16>
    %cst = arith.constant dense<0.000000e+00> : vector<68x144xf32>
    %5 = tpu.matmul %2, %4, %cst {dimension_numbers = #tpu.dot_dimension_numbers<[1], [0], [0], [1], [0, 0, 1, 1], [], []>} : vector<68x28xbf16>, vector<28x144xbf16>, vector<68x144xf32> -> vector<68x144xf32>
    %6 = vector.extract_strided_slice %0 {offsets = [1, 0], sizes = [68, 28], strides = [1, 1]} : vector<72x28xf32> to vector<68x28xf32>
    %7 = arith.truncf %6 : vector<68x28xf32> to vector<68x28xbf16>
    %c1 = arith.constant 1 : index
    %c0_4 = arith.constant 0 : index
    %c0_5 = arith.constant 0 : index
    %8 = vector.load %arg1[%c1, %c0_4, %c0_5] : memref<5x28x144xbf16, #tpu.memory_space<vmem>>, vector<1x28x144xbf16>
    %9 = vector.shape_cast %8 : vector<1x28x144xbf16> to vector<28x144xbf16>
    %cst_6 = arith.constant dense<0.000000e+00> : vector<68x144xf32>
    %10 = tpu.matmul %7, %9, %cst_6 {dimension_numbers = #tpu.dot_dimension_numbers<[1], [0], [0], [1], [0, 0, 1, 1], [], []>} : vector<68x28xbf16>, vector<28x144xbf16>, vector<68x144xf32> -> vector<68x144xf32>
    %11 = arith.addf %5, %10 : vector<68x144xf32>
    %12 = vector.extract_strided_slice %0 {offsets = [2, 0], sizes = [68, 28], strides = [1, 1]} : vector<72x28xf32> to vector<68x28xf32>
    %13 = arith.truncf %12 : vector<68x28xf32> to vector<68x28xbf16>
    %c2 = arith.constant 2 : index
    %c0_7 = arith.constant 0 : index
    %c0_8 = arith.constant 0 : index
    %14 = vector.load %arg1[%c2, %c0_7, %c0_8] : memref<5x28x144xbf16, #tpu.memory_space<vmem>>, vector<1x28x144xbf16>
    %15 = vector.shape_cast %14 : vector<1x28x144xbf16> to vector<28x144xbf16>
    %cst_9 = arith.constant dense<0.000000e+00> : vector<68x144xf32>
    %16 = tpu.matmul %13, %15, %cst_9 {dimension_numbers = #tpu.dot_dimension_numbers<[1], [0], [0], [1], [0, 0, 1, 1], [], []>} : vector<68x28xbf16>, vector<28x144xbf16>, vector<68x144xf32> -> vector<68x144xf32>
    %17 = arith.addf %11, %16 : vector<68x144xf32>
    %18 = vector.extract_strided_slice %0 {offsets = [3, 0], sizes = [68, 28], strides = [1, 1]} : vector<72x28xf32> to vector<68x28xf32>
    %19 = arith.truncf %18 : vector<68x28xf32> to vector<68x28xbf16>
    %c3 = arith.constant 3 : index
    %c0_10 = arith.constant 0 : index
    %c0_11 = arith.constant 0 : index
    %20 = vector.load %arg1[%c3, %c0_10, %c0_11] : memref<5x28x144xbf16, #tpu.memory_space<vmem>>, vector<1x28x144xbf16>
    %21 = vector.shape_cast %20 : vector<1x28x144xbf16> to vector<28x144xbf16>
    %cst_12 = arith.constant dense<0.000000e+00> : vector<68x144xf32>
    %22 = tpu.matmul %19, %21, %cst_12 {dimension_numbers = #tpu.dot_dimension_numbers<[1], [0], [0], [1], [0, 0, 1, 1], [], []>} : vector<68x28xbf16>, vector<28x144xbf16>, vector<68x144xf32> -> vector<68x144xf32>
    %23 = arith.addf %17, %22 : vector<68x144xf32>
    %24 = vector.extract_strided_slice %0 {offsets = [4, 0], sizes = [68, 28], strides = [1, 1]} : vector<72x28xf32> to vector<68x28xf32>
    %25 = arith.truncf %24 : vector<68x28xf32> to vector<68x28xbf16>
    %c4 = arith.constant 4 : index
    %c0_13 = arith.constant 0 : index
    %c0_14 = arith.constant 0 : index
    %26 = vector.load %arg1[%c4, %c0_13, %c0_14] : memref<5x28x144xbf16, #tpu.memory_space<vmem>>, vector<1x28x144xbf16>
    %27 = vector.shape_cast %26 : vector<1x28x144xbf16> to vector<28x144xbf16>
    %cst_15 = arith.constant dense<0.000000e+00> : vector<68x144xf32>
    %28 = tpu.matmul %25, %27, %cst_15 {dimension_numbers = #tpu.dot_dimension_numbers<[1], [0], [0], [1], [0, 0, 1, 1], [], []>} : vector<68x28xbf16>, vector<28x144xbf16>, vector<68x144xf32> -> vector<68x144xf32>
    %29 = arith.addf %23, %28 : vector<68x144xf32>
    %30 = tpu.iota {dimensions = array<i32: 0>} : vector<68x144xi32>
    %c36_i32 = arith.constant 36 : i32
    %c0_i32 = arith.constant 0 : i32
    %31 = arith.cmpi eq, %c36_i32, %c0_i32 : i32
    %c1_i32 = arith.constant 1 : i32
    %32 = arith.select %31, %c1_i32, %c36_i32 : i32
    %33 = vector.broadcast %32 : i32 to vector<68x144xi32>
    %34 = arith.remsi %30, %33 : vector<68x144xi32>
    %c0_i32_16 = arith.constant 0 : i32
    %35 = vector.broadcast %c0_i32_16 : i32 to vector<68x144xi32>
    %36 = arith.cmpi ne, %34, %35 : vector<68x144xi32>
    %c0_i32_17 = arith.constant 0 : i32
    %37 = vector.broadcast %c0_i32_17 : i32 to vector<68x144xi32>
    %38 = arith.cmpi slt, %34, %37 : vector<68x144xi32>
    %c0_i32_18 = arith.constant 0 : i32
    %39 = arith.cmpi slt, %32, %c0_i32_18 : i32
    %40 = vector.broadcast %39 : i1 to vector<68x144xi1>
    %41 = vector.broadcast %40 : vector<68x144xi1> to vector<68x144xi1>
    %42 = arith.xori %38, %41 : vector<68x144xi1>
    %43 = arith.andi %42, %36 : vector<68x144xi1>
    %44 = vector.broadcast %32 : i32 to vector<68x144xi32>
    %45 = arith.addi %34, %44 : vector<68x144xi32>
    %46 = arith.select %43, %45, %34 : vector<68x144xi1>, vector<68x144xi32>
    %c24_i32 = arith.constant 24 : i32
    %47 = vector.broadcast %c24_i32 : i32 to vector<68x144xi32>
    %48 = arith.cmpi slt, %46, %47 : vector<68x144xi32>
    %c0_19 = arith.constant 0 : index
    %c0_20 = arith.constant 0 : index
    %49 = vector.load %arg7[%c0_19, %c0_20] : memref<144x6xf32, #tpu.memory_space<vmem>>, vector<144x6xf32>
    %c0_21 = arith.constant 0 : index
    %c0_22 = arith.constant 0 : index
    %50 = vector.load %arg8[%c0_21, %c0_22] : memref<6x144xf32, #tpu.memory_space<vmem>>, vector<6x144xf32>
    %cst_23 = arith.constant 0.000000e+00 : f32
    %51 = vector.broadcast %cst_23 : f32 to vector<68x144xf32>
    %52 = arith.select %48, %29, %51 : vector<68x144xi1>, vector<68x144xf32>
    %cst_24 = arith.constant dense<0.000000e+00> : vector<144xf32>
    %53 = vector.multi_reduction <add>, %52, %cst_24 [0] : vector<68x144xf32> to vector<144xf32>
    %54 = vector.shape_cast %53 : vector<144xf32> to vector<1x144xf32>
    %cst_25 = arith.constant dense<0.000000e+00> : vector<1x6xf32>
    %55 = tpu.matmul %54, %49, %cst_25 {dimension_numbers = #tpu.dot_dimension_numbers<[1], [0], [0], [1], [0, 0, 1, 1], [], []>} : vector<1x144xf32>, vector<144x6xf32>, vector<1x6xf32> -> vector<1x6xf32>
    %cst_26 = arith.constant 1.152000e+03 : f32
    %56 = vector.broadcast %cst_26 : f32 to vector<1x6xf32>
    %57 = arith.divf %55, %56 : vector<1x6xf32>
    %cst_27 = arith.constant dense<0.000000e+00> : vector<1x144xf32>
    %58 = tpu.matmul %57, %50, %cst_27 {dimension_numbers = #tpu.dot_dimension_numbers<[1], [0], [0], [1], [0, 0, 1, 1], [], []>} : vector<1x6xf32>, vector<6x144xf32>, vector<1x144xf32> -> vector<1x144xf32>
    %59 = vector.broadcast %58 : vector<1x144xf32> to vector<68x144xf32>
    %60 = arith.subf %29, %59 : vector<68x144xf32>
    %61 = arith.mulf %60, %60 : vector<68x144xf32>
    %cst_28 = arith.constant 0.000000e+00 : f32
    %62 = vector.broadcast %cst_28 : f32 to vector<68x144xf32>
    %63 = arith.select %48, %61, %62 : vector<68x144xi1>, vector<68x144xf32>
    %cst_29 = arith.constant dense<0.000000e+00> : vector<144xf32>
    %64 = vector.multi_reduction <add>, %63, %cst_29 [0] : vector<68x144xf32> to vector<144xf32>
    %65 = vector.shape_cast %64 : vector<144xf32> to vector<1x144xf32>
    %cst_30 = arith.constant dense<0.000000e+00> : vector<1x6xf32>
    %66 = tpu.matmul %65, %49, %cst_30 {dimension_numbers = #tpu.dot_dimension_numbers<[1], [0], [0], [1], [0, 0, 1, 1], [], []>} : vector<1x144xf32>, vector<144x6xf32>, vector<1x6xf32> -> vector<1x6xf32>
    %cst_31 = arith.constant 1.152000e+03 : f32
    %67 = vector.broadcast %cst_31 : f32 to vector<1x6xf32>
    %68 = arith.divf %66, %67 : vector<1x6xf32>
    %c0_32 = arith.constant 0 : index
    %c0_33 = arith.constant 0 : index
    %69 = vector.load %arg3[%c0_32, %c0_33] : memref<1x6xf32, #tpu.memory_space<vmem>>, vector<1x6xf32>
    %cst_34 = arith.constant 9.99999974E-6 : f32
    %70 = vector.broadcast %cst_34 : f32 to vector<1x6xf32>
    %71 = arith.addf %68, %70 : vector<1x6xf32>
    %72 = math.rsqrt %71 : vector<1x6xf32>
    %73 = arith.mulf %69, %72 : vector<1x6xf32>
    %cst_35 = arith.constant dense<0.000000e+00> : vector<1x144xf32>
    %74 = tpu.matmul %73, %50, %cst_35 {dimension_numbers = #tpu.dot_dimension_numbers<[1], [0], [0], [1], [0, 0, 1, 1], [], []>} : vector<1x6xf32>, vector<6x144xf32>, vector<1x144xf32> -> vector<1x144xf32>
    %75 = vector.broadcast %74 : vector<1x144xf32> to vector<68x144xf32>
    %76 = arith.mulf %60, %75 : vector<68x144xf32>
    %c0_36 = arith.constant 0 : index
    %c0_37 = arith.constant 0 : index
    %77 = vector.load %arg4[%c0_36, %c0_37] : memref<1x6xf32, #tpu.memory_space<vmem>>, vector<1x6xf32>
    %cst_38 = arith.constant dense<0.000000e+00> : vector<1x144xf32>
    %78 = tpu.matmul %77, %50, %cst_38 {dimension_numbers = #tpu.dot_dimension_numbers<[1], [0], [0], [1], [0, 0, 1, 1], [], []>} : vector<1x6xf32>, vector<6x144xf32>, vector<1x144xf32> -> vector<1x144xf32>
    %79 = vector.broadcast %78 : vector<1x144xf32> to vector<68x144xf32>
    %80 = arith.addf %76, %79 : vector<68x144xf32>
    %cst_39 = arith.constant 0.000000e+00 : f32
    %81 = vector.broadcast %cst_39 : f32 to vector<68x144xf32>
    %82 = arith.maximumf %80, %81 : vector<68x144xf32>
    %83 = vector.extract_strided_slice %82 {offsets = [0, 0], sizes = [68, 143], strides = [1, 1]} : vector<68x144xf32> to vector<68x143xf32>
    %84 = vector.extract_strided_slice %82 {offsets = [0, 1], sizes = [68, 143], strides = [1, 1]} : vector<68x144xf32> to vector<68x143xf32>
    %85 = arith.maximumf %83, %84 : vector<68x143xf32>
    %86 = vector.extract_strided_slice %85 {offsets = [0, 0], sizes = [67, 143], strides = [1, 1]} : vector<68x143xf32> to vector<67x143xf32>
    %87 = vector.extract_strided_slice %85 {offsets = [1, 0], sizes = [67, 143], strides = [1, 1]} : vector<68x143xf32> to vector<67x143xf32>
    %88 = arith.maximumf %86, %87 : vector<67x143xf32>
    %89 = vector.extract_strided_slice %88 {offsets = [0, 0], sizes = [59, 143], strides = [1, 1]} : vector<67x143xf32> to vector<59x143xf32>
    %90 = arith.truncf %89 : vector<59x143xf32> to vector<59x143xbf16>
    %c0_40 = arith.constant 0 : index
    %c0_41 = arith.constant 0 : index
    %c0_42 = arith.constant 0 : index
    %91 = vector.load %arg2[%c0_40, %c0_41, %c0_42] : memref<5x143x128xbf16, #tpu.memory_space<vmem>>, vector<1x143x128xbf16>
    %92 = vector.shape_cast %91 : vector<1x143x128xbf16> to vector<143x128xbf16>
    %cst_43 = arith.constant dense<0.000000e+00> : vector<59x128xf32>
    %93 = tpu.matmul %90, %92, %cst_43 {dimension_numbers = #tpu.dot_dimension_numbers<[1], [0], [0], [1], [0, 0, 1, 1], [], []>} : vector<59x143xbf16>, vector<143x128xbf16>, vector<59x128xf32> -> vector<59x128xf32>
    %94 = vector.extract_strided_slice %88 {offsets = [2, 0], sizes = [59, 143], strides = [1, 1]} : vector<67x143xf32> to vector<59x143xf32>
    %95 = arith.truncf %94 : vector<59x143xf32> to vector<59x143xbf16>
    %c1_44 = arith.constant 1 : index
    %c0_45 = arith.constant 0 : index
    %c0_46 = arith.constant 0 : index
    %96 = vector.load %arg2[%c1_44, %c0_45, %c0_46] : memref<5x143x128xbf16, #tpu.memory_space<vmem>>, vector<1x143x128xbf16>
    %97 = vector.shape_cast %96 : vector<1x143x128xbf16> to vector<143x128xbf16>
    %cst_47 = arith.constant dense<0.000000e+00> : vector<59x128xf32>
    %98 = tpu.matmul %95, %97, %cst_47 {dimension_numbers = #tpu.dot_dimension_numbers<[1], [0], [0], [1], [0, 0, 1, 1], [], []>} : vector<59x143xbf16>, vector<143x128xbf16>, vector<59x128xf32> -> vector<59x128xf32>
    %99 = arith.addf %93, %98 : vector<59x128xf32>
    %100 = vector.extract_strided_slice %88 {offsets = [4, 0], sizes = [59, 143], strides = [1, 1]} : vector<67x143xf32> to vector<59x143xf32>
    %101 = arith.truncf %100 : vector<59x143xf32> to vector<59x143xbf16>
    %c2_48 = arith.constant 2 : index
    %c0_49 = arith.constant 0 : index
    %c0_50 = arith.constant 0 : index
    %102 = vector.load %arg2[%c2_48, %c0_49, %c0_50] : memref<5x143x128xbf16, #tpu.memory_space<vmem>>, vector<1x143x128xbf16>
    %103 = vector.shape_cast %102 : vector<1x143x128xbf16> to vector<143x128xbf16>
    %cst_51 = arith.constant dense<0.000000e+00> : vector<59x128xf32>
    %104 = tpu.matmul %101, %103, %cst_51 {dimension_numbers = #tpu.dot_dimension_numbers<[1], [0], [0], [1], [0, 0, 1, 1], [], []>} : vector<59x143xbf16>, vector<143x128xbf16>, vector<59x128xf32> -> vector<59x128xf32>
    %105 = arith.addf %99, %104 : vector<59x128xf32>
    %106 = vector.extract_strided_slice %88 {offsets = [6, 0], sizes = [59, 143], strides = [1, 1]} : vector<67x143xf32> to vector<59x143xf32>
    %107 = arith.truncf %106 : vector<59x143xf32> to vector<59x143xbf16>
    %c3_52 = arith.constant 3 : index
    %c0_53 = arith.constant 0 : index
    %c0_54 = arith.constant 0 : index
    %108 = vector.load %arg2[%c3_52, %c0_53, %c0_54] : memref<5x143x128xbf16, #tpu.memory_space<vmem>>, vector<1x143x128xbf16>
    %109 = vector.shape_cast %108 : vector<1x143x128xbf16> to vector<143x128xbf16>
    %cst_55 = arith.constant dense<0.000000e+00> : vector<59x128xf32>
    %110 = tpu.matmul %107, %109, %cst_55 {dimension_numbers = #tpu.dot_dimension_numbers<[1], [0], [0], [1], [0, 0, 1, 1], [], []>} : vector<59x143xbf16>, vector<143x128xbf16>, vector<59x128xf32> -> vector<59x128xf32>
    %111 = arith.addf %105, %110 : vector<59x128xf32>
    %112 = vector.extract_strided_slice %88 {offsets = [8, 0], sizes = [59, 143], strides = [1, 1]} : vector<67x143xf32> to vector<59x143xf32>
    %113 = arith.truncf %112 : vector<59x143xf32> to vector<59x143xbf16>
    %c4_56 = arith.constant 4 : index
    %c0_57 = arith.constant 0 : index
    %c0_58 = arith.constant 0 : index
    %114 = vector.load %arg2[%c4_56, %c0_57, %c0_58] : memref<5x143x128xbf16, #tpu.memory_space<vmem>>, vector<1x143x128xbf16>
    %115 = vector.shape_cast %114 : vector<1x143x128xbf16> to vector<143x128xbf16>
    %cst_59 = arith.constant dense<0.000000e+00> : vector<59x128xf32>
    %116 = tpu.matmul %113, %115, %cst_59 {dimension_numbers = #tpu.dot_dimension_numbers<[1], [0], [0], [1], [0, 0, 1, 1], [], []>} : vector<59x143xbf16>, vector<143x128xbf16>, vector<59x128xf32> -> vector<59x128xf32>
    %117 = arith.addf %111, %116 : vector<59x128xf32>
    %118 = tpu.iota {dimensions = array<i32: 0>} : vector<59x128xi32>
    %c36_i32_60 = arith.constant 36 : i32
    %c0_i32_61 = arith.constant 0 : i32
    %119 = arith.cmpi eq, %c36_i32_60, %c0_i32_61 : i32
    %c1_i32_62 = arith.constant 1 : i32
    %120 = arith.select %119, %c1_i32_62, %c36_i32_60 : i32
    %121 = vector.broadcast %120 : i32 to vector<59x128xi32>
    %122 = arith.remsi %118, %121 : vector<59x128xi32>
    %c0_i32_63 = arith.constant 0 : i32
    %123 = vector.broadcast %c0_i32_63 : i32 to vector<59x128xi32>
    %124 = arith.cmpi ne, %122, %123 : vector<59x128xi32>
    %c0_i32_64 = arith.constant 0 : i32
    %125 = vector.broadcast %c0_i32_64 : i32 to vector<59x128xi32>
    %126 = arith.cmpi slt, %122, %125 : vector<59x128xi32>
    %c0_i32_65 = arith.constant 0 : i32
    %127 = arith.cmpi slt, %120, %c0_i32_65 : i32
    %128 = vector.broadcast %127 : i1 to vector<59x128xi1>
    %129 = vector.broadcast %128 : vector<59x128xi1> to vector<59x128xi1>
    %130 = arith.xori %126, %129 : vector<59x128xi1>
    %131 = arith.andi %130, %124 : vector<59x128xi1>
    %132 = vector.broadcast %120 : i32 to vector<59x128xi32>
    %133 = arith.addi %122, %132 : vector<59x128xi32>
    %134 = arith.select %131, %133, %122 : vector<59x128xi1>, vector<59x128xi32>
    %c16_i32 = arith.constant 16 : i32
    %135 = vector.broadcast %c16_i32 : i32 to vector<59x128xi32>
    %136 = arith.cmpi slt, %134, %135 : vector<59x128xi32>
    %c2_i32 = arith.constant 2 : i32
    %c0_i32_66 = arith.constant 0 : i32
    %137 = arith.cmpi eq, %c2_i32, %c0_i32_66 : i32
    %c1_i32_67 = arith.constant 1 : i32
    %138 = arith.select %137, %c1_i32_67, %c2_i32 : i32
    %139 = vector.broadcast %138 : i32 to vector<59x128xi32>
    %140 = arith.remsi %118, %139 : vector<59x128xi32>
    %c0_i32_68 = arith.constant 0 : i32
    %141 = vector.broadcast %c0_i32_68 : i32 to vector<59x128xi32>
    %142 = arith.cmpi ne, %140, %141 : vector<59x128xi32>
    %c0_i32_69 = arith.constant 0 : i32
    %143 = vector.broadcast %c0_i32_69 : i32 to vector<59x128xi32>
    %144 = arith.cmpi slt, %140, %143 : vector<59x128xi32>
    %c0_i32_70 = arith.constant 0 : i32
    %145 = arith.cmpi slt, %138, %c0_i32_70 : i32
    %146 = vector.broadcast %145 : i1 to vector<59x128xi1>
    %147 = vector.broadcast %146 : vector<59x128xi1> to vector<59x128xi1>
    %148 = arith.xori %144, %147 : vector<59x128xi1>
    %149 = arith.andi %148, %142 : vector<59x128xi1>
    %150 = vector.broadcast %138 : i32 to vector<59x128xi32>
    %151 = arith.addi %140, %150 : vector<59x128xi32>
    %152 = arith.select %149, %151, %140 : vector<59x128xi1>, vector<59x128xi32>
    %c0_i32_71 = arith.constant 0 : i32
    %153 = vector.broadcast %c0_i32_71 : i32 to vector<59x128xi32>
    %154 = arith.cmpi eq, %152, %153 : vector<59x128xi32>
    %155 = arith.andi %136, %154 : vector<59x128xi1>
    %c0_72 = arith.constant 0 : index
    %c0_73 = arith.constant 0 : index
    %156 = vector.load %arg9[%c0_72, %c0_73] : memref<128x16xf32, #tpu.memory_space<vmem>>, vector<128x16xf32>
    %c0_74 = arith.constant 0 : index
    %c0_75 = arith.constant 0 : index
    %157 = vector.load %arg10[%c0_74, %c0_75] : memref<16x128xf32, #tpu.memory_space<vmem>>, vector<16x128xf32>
    %cst_76 = arith.constant 0.000000e+00 : f32
    %158 = vector.broadcast %cst_76 : f32 to vector<59x128xf32>
    %159 = arith.select %155, %117, %158 : vector<59x128xi1>, vector<59x128xf32>
    %cst_77 = arith.constant dense<0.000000e+00> : vector<128xf32>
    %160 = vector.multi_reduction <add>, %159, %cst_77 [0] : vector<59x128xf32> to vector<128xf32>
    %161 = vector.shape_cast %160 : vector<128xf32> to vector<1x128xf32>
    %cst_78 = arith.constant dense<0.000000e+00> : vector<1x16xf32>
    %162 = tpu.matmul %161, %156, %cst_78 {dimension_numbers = #tpu.dot_dimension_numbers<[1], [0], [0], [1], [0, 0, 1, 1], [], []>} : vector<1x128xf32>, vector<128x16xf32>, vector<1x16xf32> -> vector<1x16xf32>
    %cst_79 = arith.constant 1.280000e+02 : f32
    %163 = vector.broadcast %cst_79 : f32 to vector<1x16xf32>
    %164 = arith.divf %162, %163 : vector<1x16xf32>
    %cst_80 = arith.constant dense<0.000000e+00> : vector<1x128xf32>
    %165 = tpu.matmul %164, %157, %cst_80 {dimension_numbers = #tpu.dot_dimension_numbers<[1], [0], [0], [1], [0, 0, 1, 1], [], []>} : vector<1x16xf32>, vector<16x128xf32>, vector<1x128xf32> -> vector<1x128xf32>
    %166 = vector.broadcast %165 : vector<1x128xf32> to vector<59x128xf32>
    %167 = arith.subf %117, %166 : vector<59x128xf32>
    %168 = arith.mulf %167, %167 : vector<59x128xf32>
    %cst_81 = arith.constant 0.000000e+00 : f32
    %169 = vector.broadcast %cst_81 : f32 to vector<59x128xf32>
    %170 = arith.select %155, %168, %169 : vector<59x128xi1>, vector<59x128xf32>
    %cst_82 = arith.constant dense<0.000000e+00> : vector<128xf32>
    %171 = vector.multi_reduction <add>, %170, %cst_82 [0] : vector<59x128xf32> to vector<128xf32>
    %172 = vector.shape_cast %171 : vector<128xf32> to vector<1x128xf32>
    %cst_83 = arith.constant dense<0.000000e+00> : vector<1x16xf32>
    %173 = tpu.matmul %172, %156, %cst_83 {dimension_numbers = #tpu.dot_dimension_numbers<[1], [0], [0], [1], [0, 0, 1, 1], [], []>} : vector<1x128xf32>, vector<128x16xf32>, vector<1x16xf32> -> vector<1x16xf32>
    %cst_84 = arith.constant 1.280000e+02 : f32
    %174 = vector.broadcast %cst_84 : f32 to vector<1x16xf32>
    %175 = arith.divf %173, %174 : vector<1x16xf32>
    %c0_85 = arith.constant 0 : index
    %c0_86 = arith.constant 0 : index
    %176 = vector.load %arg5[%c0_85, %c0_86] : memref<1x16xf32, #tpu.memory_space<vmem>>, vector<1x16xf32>
    %cst_87 = arith.constant 9.99999974E-6 : f32
    %177 = vector.broadcast %cst_87 : f32 to vector<1x16xf32>
    %178 = arith.addf %175, %177 : vector<1x16xf32>
    %179 = math.rsqrt %178 : vector<1x16xf32>
    %180 = arith.mulf %176, %179 : vector<1x16xf32>
    %cst_88 = arith.constant dense<0.000000e+00> : vector<1x128xf32>
    %181 = tpu.matmul %180, %157, %cst_88 {dimension_numbers = #tpu.dot_dimension_numbers<[1], [0], [0], [1], [0, 0, 1, 1], [], []>} : vector<1x16xf32>, vector<16x128xf32>, vector<1x128xf32> -> vector<1x128xf32>
    %182 = vector.broadcast %181 : vector<1x128xf32> to vector<59x128xf32>
    %183 = arith.mulf %167, %182 : vector<59x128xf32>
    %c0_89 = arith.constant 0 : index
    %c0_90 = arith.constant 0 : index
    %184 = vector.load %arg6[%c0_89, %c0_90] : memref<1x16xf32, #tpu.memory_space<vmem>>, vector<1x16xf32>
    %cst_91 = arith.constant dense<0.000000e+00> : vector<1x128xf32>
    %185 = tpu.matmul %184, %157, %cst_91 {dimension_numbers = #tpu.dot_dimension_numbers<[1], [0], [0], [1], [0, 0, 1, 1], [], []>} : vector<1x16xf32>, vector<16x128xf32>, vector<1x128xf32> -> vector<1x128xf32>
    %186 = vector.broadcast %185 : vector<1x128xf32> to vector<59x128xf32>
    %187 = arith.addf %183, %186 : vector<59x128xf32>
    %cst_92 = arith.constant 0.000000e+00 : f32
    %188 = vector.broadcast %cst_92 : f32 to vector<59x128xf32>
    %189 = arith.maximumf %187, %188 : vector<59x128xf32>
    %190 = vector.extract_strided_slice %189 {offsets = [0, 0], sizes = [59, 127], strides = [1, 1]} : vector<59x128xf32> to vector<59x127xf32>
    %191 = vector.extract_strided_slice %189 {offsets = [0, 1], sizes = [59, 127], strides = [1, 1]} : vector<59x128xf32> to vector<59x127xf32>
    %192 = arith.maximumf %190, %191 : vector<59x127xf32>
    %193 = vector.extract_strided_slice %192 {offsets = [0, 0], sizes = [57, 127], strides = [1, 1]} : vector<59x127xf32> to vector<57x127xf32>
    %194 = vector.extract_strided_slice %192 {offsets = [2, 0], sizes = [57, 127], strides = [1, 1]} : vector<59x127xf32> to vector<57x127xf32>
    %195 = arith.maximumf %193, %194 : vector<57x127xf32>
    %cst_93 = arith.constant 0.000000e+00 : f32
    %196 = vector.broadcast %cst_93 : f32 to vector<2x120xf32>
    %c0_94 = arith.constant 0 : index
    %c0_95 = arith.constant 0 : index
    %197 = vector.load %arg13[%c0_94, %c0_95] : memref<1x120xf32, #tpu.memory_space<vmem>>, vector<1x120xf32>
    %198 = vector.broadcast %197 : vector<1x120xf32> to vector<2x120xf32>
    %199 = arith.addf %196, %198 : vector<2x120xf32>
    %c0_96 = arith.constant 0 : index
    %c0_97 = arith.constant 0 : index
    %c0_98 = arith.constant 0 : index
    %200 = vector.load %arg12[%c0_96, %c0_97, %c0_98] : memref<4x2x57xf32, #tpu.memory_space<vmem>>, vector<1x2x57xf32>
    %201 = vector.shape_cast %200 : vector<1x2x57xf32> to vector<2x57xf32>
    %cst_99 = arith.constant dense<0.000000e+00> : vector<2x127xf32>
    %202 = tpu.matmul %201, %195, %cst_99 {dimension_numbers = #tpu.dot_dimension_numbers<[1], [0], [0], [1], [0, 0, 1, 1], [], []>} : vector<2x57xf32>, vector<57x127xf32>, vector<2x127xf32> -> vector<2x127xf32>
    %203 = arith.truncf %202 : vector<2x127xf32> to vector<2x127xbf16>
    %c0_100 = arith.constant 0 : index
    %c0_101 = arith.constant 0 : index
    %c0_102 = arith.constant 0 : index
    %204 = vector.load %arg11[%c0_100, %c0_101, %c0_102] : memref<4x127x120xbf16, #tpu.memory_space<vmem>>, vector<1x127x120xbf16>
    %205 = vector.shape_cast %204 : vector<1x127x120xbf16> to vector<127x120xbf16>
    %cst_103 = arith.constant dense<0.000000e+00> : vector<2x120xf32>
    %206 = tpu.matmul %203, %205, %cst_103 {dimension_numbers = #tpu.dot_dimension_numbers<[1], [0], [0], [1], [0, 0, 1, 1], [], []>} : vector<2x127xbf16>, vector<127x120xbf16>, vector<2x120xf32> -> vector<2x120xf32>
    %207 = arith.addf %199, %206 : vector<2x120xf32>
    %c1_104 = arith.constant 1 : index
    %c0_105 = arith.constant 0 : index
    %c0_106 = arith.constant 0 : index
    %208 = vector.load %arg12[%c1_104, %c0_105, %c0_106] : memref<4x2x57xf32, #tpu.memory_space<vmem>>, vector<1x2x57xf32>
    %209 = vector.shape_cast %208 : vector<1x2x57xf32> to vector<2x57xf32>
    %cst_107 = arith.constant dense<0.000000e+00> : vector<2x127xf32>
    %210 = tpu.matmul %209, %195, %cst_107 {dimension_numbers = #tpu.dot_dimension_numbers<[1], [0], [0], [1], [0, 0, 1, 1], [], []>} : vector<2x57xf32>, vector<57x127xf32>, vector<2x127xf32> -> vector<2x127xf32>
    %211 = arith.truncf %210 : vector<2x127xf32> to vector<2x127xbf16>
    %c1_108 = arith.constant 1 : index
    %c0_109 = arith.constant 0 : index
    %c0_110 = arith.constant 0 : index
    %212 = vector.load %arg11[%c1_108, %c0_109, %c0_110] : memref<4x127x120xbf16, #tpu.memory_space<vmem>>, vector<1x127x120xbf16>
    %213 = vector.shape_cast %212 : vector<1x127x120xbf16> to vector<127x120xbf16>
    %cst_111 = arith.constant dense<0.000000e+00> : vector<2x120xf32>
    %214 = tpu.matmul %211, %213, %cst_111 {dimension_numbers = #tpu.dot_dimension_numbers<[1], [0], [0], [1], [0, 0, 1, 1], [], []>} : vector<2x127xbf16>, vector<127x120xbf16>, vector<2x120xf32> -> vector<2x120xf32>
    %215 = arith.addf %207, %214 : vector<2x120xf32>
    %c2_112 = arith.constant 2 : index
    %c0_113 = arith.constant 0 : index
    %c0_114 = arith.constant 0 : index
    %216 = vector.load %arg12[%c2_112, %c0_113, %c0_114] : memref<4x2x57xf32, #tpu.memory_space<vmem>>, vector<1x2x57xf32>
    %217 = vector.shape_cast %216 : vector<1x2x57xf32> to vector<2x57xf32>
    %cst_115 = arith.constant dense<0.000000e+00> : vector<2x127xf32>
    %218 = tpu.matmul %217, %195, %cst_115 {dimension_numbers = #tpu.dot_dimension_numbers<[1], [0], [0], [1], [0, 0, 1, 1], [], []>} : vector<2x57xf32>, vector<57x127xf32>, vector<2x127xf32> -> vector<2x127xf32>
    %219 = arith.truncf %218 : vector<2x127xf32> to vector<2x127xbf16>
    %c2_116 = arith.constant 2 : index
    %c0_117 = arith.constant 0 : index
    %c0_118 = arith.constant 0 : index
    %220 = vector.load %arg11[%c2_116, %c0_117, %c0_118] : memref<4x127x120xbf16, #tpu.memory_space<vmem>>, vector<1x127x120xbf16>
    %221 = vector.shape_cast %220 : vector<1x127x120xbf16> to vector<127x120xbf16>
    %cst_119 = arith.constant dense<0.000000e+00> : vector<2x120xf32>
    %222 = tpu.matmul %219, %221, %cst_119 {dimension_numbers = #tpu.dot_dimension_numbers<[1], [0], [0], [1], [0, 0, 1, 1], [], []>} : vector<2x127xbf16>, vector<127x120xbf16>, vector<2x120xf32> -> vector<2x120xf32>
    %223 = arith.addf %215, %222 : vector<2x120xf32>
    %c3_120 = arith.constant 3 : index
    %c0_121 = arith.constant 0 : index
    %c0_122 = arith.constant 0 : index
    %224 = vector.load %arg12[%c3_120, %c0_121, %c0_122] : memref<4x2x57xf32, #tpu.memory_space<vmem>>, vector<1x2x57xf32>
    %225 = vector.shape_cast %224 : vector<1x2x57xf32> to vector<2x57xf32>
    %cst_123 = arith.constant dense<0.000000e+00> : vector<2x127xf32>
    %226 = tpu.matmul %225, %195, %cst_123 {dimension_numbers = #tpu.dot_dimension_numbers<[1], [0], [0], [1], [0, 0, 1, 1], [], []>} : vector<2x57xf32>, vector<57x127xf32>, vector<2x127xf32> -> vector<2x127xf32>
    %227 = arith.truncf %226 : vector<2x127xf32> to vector<2x127xbf16>
    %c3_124 = arith.constant 3 : index
    %c0_125 = arith.constant 0 : index
    %c0_126 = arith.constant 0 : index
    %228 = vector.load %arg11[%c3_124, %c0_125, %c0_126] : memref<4x127x120xbf16, #tpu.memory_space<vmem>>, vector<1x127x120xbf16>
    %229 = vector.shape_cast %228 : vector<1x127x120xbf16> to vector<127x120xbf16>
    %cst_127 = arith.constant dense<0.000000e+00> : vector<2x120xf32>
    %230 = tpu.matmul %227, %229, %cst_127 {dimension_numbers = #tpu.dot_dimension_numbers<[1], [0], [0], [1], [0, 0, 1, 1], [], []>} : vector<2x127xbf16>, vector<127x120xbf16>, vector<2x120xf32> -> vector<2x120xf32>
    %231 = arith.addf %223, %230 : vector<2x120xf32>
    %cst_128 = arith.constant 0.000000e+00 : f32
    %232 = vector.broadcast %cst_128 : f32 to vector<2x120xf32>
    %233 = arith.maximumf %231, %232 : vector<2x120xf32>
    %234 = arith.truncf %233 : vector<2x120xf32> to vector<2x120xbf16>
    %c0_129 = arith.constant 0 : index
    %c0_130 = arith.constant 0 : index
    %235 = vector.load %arg14[%c0_129, %c0_130] : memref<120x84xbf16, #tpu.memory_space<vmem>>, vector<120x84xbf16>
    %cst_131 = arith.constant dense<0.000000e+00> : vector<2x84xf32>
    %236 = tpu.matmul %234, %235, %cst_131 {dimension_numbers = #tpu.dot_dimension_numbers<[1], [0], [0], [1], [0, 0, 1, 1], [], []>} : vector<2x120xbf16>, vector<120x84xbf16>, vector<2x84xf32> -> vector<2x84xf32>
    %c0_132 = arith.constant 0 : index
    %c0_133 = arith.constant 0 : index
    %237 = vector.load %arg15[%c0_132, %c0_133] : memref<1x84xf32, #tpu.memory_space<vmem>>, vector<1x84xf32>
    %238 = vector.broadcast %237 : vector<1x84xf32> to vector<2x84xf32>
    %239 = arith.addf %236, %238 : vector<2x84xf32>
    %cst_134 = arith.constant 0.000000e+00 : f32
    %240 = vector.broadcast %cst_134 : f32 to vector<2x84xf32>
    %241 = arith.maximumf %239, %240 : vector<2x84xf32>
    %242 = arith.truncf %241 : vector<2x84xf32> to vector<2x84xbf16>
    %c0_135 = arith.constant 0 : index
    %c0_136 = arith.constant 0 : index
    %243 = vector.load %arg16[%c0_135, %c0_136] : memref<84x10xbf16, #tpu.memory_space<vmem>>, vector<84x10xbf16>
    %cst_137 = arith.constant dense<0.000000e+00> : vector<2x10xf32>
    %244 = tpu.matmul %242, %243, %cst_137 {dimension_numbers = #tpu.dot_dimension_numbers<[1], [0], [0], [1], [0, 0, 1, 1], [], []>} : vector<2x84xbf16>, vector<84x10xbf16>, vector<2x10xf32> -> vector<2x10xf32>
    %c0_138 = arith.constant 0 : index
    %c0_139 = arith.constant 0 : index
    %245 = vector.load %arg17[%c0_138, %c0_139] : memref<1x10xf32, #tpu.memory_space<vmem>>, vector<1x10xf32>
    %246 = vector.broadcast %245 : vector<1x10xf32> to vector<2x10xf32>
    %247 = arith.addf %244, %246 : vector<2x10xf32>
    %c0_140 = arith.constant 0 : index
    %c0_141 = arith.constant 0 : index
    %248 = vector.load %arg18[%c0_140, %c0_141] : memref<2x10xf32, #tpu.memory_space<vmem>>, vector<2x10xf32>
    tpu.vector_store %arg18[%c0_140, %c0_141], %247 {strides = array<i32>} : memref<2x10xf32, #tpu.memory_space<vmem>>, vector<2x10xf32>,
    return
  }
}

</mosaic_0001>

<bundles_post_ra>
// kernel: lenet5_forward.1
= control target key start
LH: loop header
LB: loop body
LE: loop exit
PB: predicated region body
PF: predicated region fallthrough
CT: control target
= control target key end

     0   :  { %s7667_s0 = inlined_call_operand.vmem [shape: f32[72,28], index: 0, kind: input, shape index: {}]   ;;  %s7668_s1 = inlined_call_operand.vmem [shape: bf16[5,28,144], index: 1, kind: input, shape index: {}]   ;;  %s7669_s2 = inlined_call_operand.vmem [shape: bf16[5,143,128], index: 2, kind: input, shape index: {}]   ;;  %s7670_s3 = inlined_call_operand.vmem [shape: f32[1,6], index: 3, kind: input, shape index: {}]   ;;  %s7671_s4 = inlined_call_operand.vmem [shape: f32[1,6], index: 4, kind: input, shape index: {}]   ;;  %s7672_s5 = inlined_call_operand.vmem [shape: f32[1,16], index: 5, kind: input, shape index: {}]   ;;  %s7673_s6 = inlined_call_operand.vmem [shape: f32[1,16], index: 6, kind: input, shape index: {}]   ;;  %s7674_s7 = inlined_call_operand.vmem [shape: f32[144,6], index: 7, kind: input, shape index: {}]   ;;  %s7675_s8 = inlined_call_operand.vmem [shape: f32[6,144], index: 8, kind: input, shape index: {}]   ;;  %s7676_s9 = inlined_call_operand.vmem [shape: f32[128,16], index: 9, kind: input, shape index: {}]   ;;  %s7677_s10 = inlined_call_operand.vmem [shape: f32[16,128], index: 10, kind: input, shape index: {}]   ;;  %s7678_s11 = inlined_call_operand.vmem [shape: bf16[4,127,120], index: 11, kind: input, shape index: {}]   ;;  %s7679_s12 = inlined_call_operand.vmem [shape: f32[4,2,57], index: 12, kind: input, shape index: {}]   ;;  %s7680_s13 = inlined_call_operand.vmem [shape: f32[1,120], index: 13, kind: input, shape index: {}]   ;;  %s7681_s14 = inlined_call_operand.vmem [shape: bf16[120,84], index: 14, kind: input, shape index: {}]   ;;  %s7682_s15 = inlined_call_operand.vmem [shape: f32[1,84], index: 15, kind: input, shape index: {}]   ;;  %s7683_s16 = inlined_call_operand.vmem [shape: bf16[84,10], index: 16, kind: input, shape index: {}]   ;;  %s7684_s17 = inlined_call_operand.vmem [shape: f32[1,10], index: 17, kind: input, shape index: {}]   ;;  %s7685_s18 = inlined_call_operand.hbm [shape: f32[2,10], index: 18, kind: output, shape index: {}]  }
   0x1   :  { %7715 = sst [smem:[#allocation12_spill]] %s7667_s0 }
   0x2   :  { %7716 = sst [smem:[#allocation13_spill]] %s7668_s1 }
   0x3   :  { %7717 = sst [smem:[#allocation14_spill]] %s7669_s2 }
   0x4   :  { %s7718_s29 = sld [smem:[#allocation13_spill]]  ;;  %vm158_vm0 = vcmask 1045504   ;;  %v7689_v2 = vmov 0   ;;  %s7719_s23 = sld [smem:[#allocation12_spill]]  ;;  %vm142_vm1 = vcmask 228352   ;;  %vm371_vm3 = vcmask 1046528  }
   0x5   :  { %197 = vmatprep.mubr.bf16.mxu0 %v7689_v2  ;;  %vm84_vm2 = vsmask.f32 7424  ;;  %vm524_vm4 = vsmask.f32 6400 }
   0xa   :  { %v5517_v0 = vld [vmem:[%s7718_s29 + $0x24] ss:$8 sps:$4 sm:$0xff]   ;;  %v5519_v1 = vld [vmem:[%s7718_s29 + $0x20] ss:$8 sps:$4 sm:$0xff]   ;;  %v63_v7 = vld [vmem:[%s7719_s23 + $0x10] sm:$0xff] }
   0xb   :  { %165 = vmatprep.subr.bf16.mxu0 %v5517_v0  ;;  %v5520_v3 = vld [vmem:[%s7718_s29 + $0x34] ss:$8 sps:$4 sm:$0x3f]   ;;  %v5522_v4 = vld [vmem:[%s7718_s29 + $0x30] ss:$8 sps:$4 sm:$0x3f]  }
   0xc   :  { %166 = vmatpush1.bf16.msra.mxu0 %v5519_v1  ;;  %v61_v5 = vld [vmem:[%s7719_s23] sm:$0xff]  ;;  %v62_v6 = vld [vmem:[%s7719_s23 + $0x8] sm:$0xff]  ;;  %v160_v8 = vsel %vm158_vm0, %v5522_v4, 0  ;;  %v64_v9 = vld [vmem:[%s7719_s23 + $0x18] sm:$0xff] }
   0xd   :  { %4374 = vmatprep.subr.msk.bf16.mxu0 %vm158_vm0, %v5520_v3  ;;  %v5796_v10 = vpack.c.bf16 %v62_v6, %v61_v5  ;;  %v5798_v11 = vpack.c.bf16 %v64_v9, %v63_v7  ;;  %v5525_v12 = vld [vmem:[%s7718_s29 + $0x4] ss:$8 sps:$4 sm:$0xff]   ;;  %v5523_v22 = vld [vmem:[%s7718_s29] ss:$8 sps:$4 sm:$0xff]   ;;  %v67_v24 = vld [vmem:[%s7719_s23 + $0x30] sm:$0xff] }
   0xe   :  { %v65_v13 = vld [vmem:[%s7719_s23 + $0x20] sm:$0xff]  ;;  %v66_v16 = vld [vmem:[%s7719_s23 + $0x28] sm:$0xff]  ;;  %v68_v26 = vld [vmem:[%s7719_s23 + $0x38] sm:$0xff] }
   0xf   :  { %v86_v14 = vshrl.u32 %v5796_v10, 16  ;;  %v88_v15 = vshll.u32 %v5796_v10, 16  ;;  %v93_v17 = vshll.u32 %v5798_v11, 16  ;;  %v5812_v18 = vpack.c.bf16 %v66_v16, %v65_v13  ;;  %v5528_v31 = vld [vmem:[%s7718_s29 + $0x10] ss:$8 sps:$4 sm:$0x3f]  }
  0x10   :  { %168 = vmatpush1.bf16.msra.mxu0 %v160_v8  ;;  %v97_v23 = vshrl.u32 %v5798_v11, 16  ;;  %v5526_v32 = vld [vmem:[%s7718_s29 + $0x14] ss:$8 sps:$4 sm:$0x3f]   ;;  %v372_v33 = vrot.slane %v5796_v10, 1  ;;  %v69_v35 = vld [vmem:[%s7719_s23 + $0x40] sm:$0xff]  ;;  %v5837_v37 = vpack.c.bf16 %v68_v26, %v67_v24 }
  0x11   :  { %v90_v19 = vrot.slane %v88_v15, 1  ;;  %v525_v20 = vrot.slane %v86_v14, 1  ;;  %v526_v21 = vrot.slane %v88_v15, 2  ;;  %280 = vmatprep.subr.bf16.mxu0 %v5525_v12  ;;  %v95_v25 = vrot.slane %v93_v17, 1  ;;  %v5531_v45 = vld [vmem:[%s7718_s29 + $0x44] ss:$8 sps:$4 sm:$0xff]  }
  0x12   :  { %v529_v28 = vrot.slane %v93_v17, 2  ;;  %v101_v29 = vshll.u32 %v5812_v18, 16  ;;  %v528_v30 = vrot.slane %v97_v23, 1  ;;  %v105_v38 = vshrl.u32 %v5812_v18, 16  ;;  %v5529_v17 = vld [vmem:[%s7718_s29 + $0x40] ss:$8 sps:$4 sm:$0xff]  }
  0x13   :  { %v91_v27 = vor.u32 %v90_v19, %v86_v14  ;;  %v527_v36 = vor.u32 %v526_v21, %v525_v20  ;;  %v373_v39 = vrot.slane %v5798_v11, 1  ;;  %v99_v40 = vor.u32 %v97_v23, %v95_v25  ;;  %v5534_v19 = vld [vmem:[%s7718_s29 + $0x50] ss:$8 sps:$4 sm:$0x3f]  }
  0x14   :  { %v103_v41 = vrot.slane %v101_v29, 1  ;;  %v275_v42 = vsel %vm158_vm0, %v5528_v31, 0  ;;  %v530_v43 = vor.u32 %v529_v28, %v528_v30  ;;  %v5844_v44 = vpack.c.bf16 %v69_v35, %v69_v35  ;;  %v5532_v21 = vld [vmem:[%s7718_s29 + $0x54] ss:$8 sps:$4 sm:$0x3f]  }
  0x15   :  { %v96_v34 = vsel %vm84_vm2, %v91_v27, %v95_v25  ;;  %v5850_v46 = vsel %vm371_vm3, %v372_v33, %v373_v39  ;;  %v375_v47 = vrot.slane %v5812_v18, 1  ;;  %v113_v48 = vshrl.u32 %v5837_v37, 16 }
  0x16   :  { %4375 = vmatmul.mubr.msk.bf16.vlgmr.msra.gmra.mrb[0].mxu0 %vm142_vm1, %v96_v34  ;;  %v109_v49 = vshll.u32 %v5837_v37, 16  ;;  %v5861_v51 = vsel %vm524_vm4, %v527_v36, %v530_v43  ;;  %v532_v52 = vrot.slane %v105_v38, 1  ;;  %v104_v53 = vsel %vm84_vm2, %v99_v40, %v103_v41 }
  0x17   :  { %281 = vmatpush1.bf16.msra.mxu0 %v5523_v22  ;;  %207 = vmatprep.mubr.bf16.mxu0 %v7689_v2  ;;  %v5858_v50 = vsel %vm371_vm3, %v373_v39, %v375_v47  ;;  %v533_v54 = vrot.slane %v101_v29, 2  ;;  %v536_v55 = vrot.slane %v113_v48, 1  ;;  %v117_v56 = vshll.u32 %v5844_v44, 16  ;;  %v5537_v22 = vld [vmem:[%s7718_s29 + $0x64] ss:$8 sps:$4 sm:$0xff]  }
  0x18   :  { %4384 = vmatprep.subr.msk.bf16.mxu0 %vm158_vm0, %v5526_v32  ;;  %v121_v57 = vshrl.u32 %v5844_v44, 16  ;;  %v537_v58 = vrot.slane %v109_v49, 2  ;;  %v111_v60 = vrot.slane %v109_v49, 1  ;;  %v107_v62 = vor.u32 %v105_v38, %v103_v41 }
  0x19   :  { %v534_v59 = vor.u32 %v533_v54, %v532_v52  ;;  %v541_v1 = vrot.slane %v117_v56, 2  ;;  %v119_v3 = vrot.slane %v117_v56, 1  ;;  %v688_v12 = vrot.slane %v5796_v10, 2 }
  0x1a   :  { %v538_v61 = vor.u32 %v537_v58, %v536_v55  ;;  %v540_v0 = vrot.slane %v121_v57, 1  ;;  %v112_v6 = vsel %vm84_vm2, %v107_v62, %v111_v60  ;;  %v115_v8 = vor.u32 %v113_v48, %v111_v60 }
  0x1b   :  { %283 = vmatpush1.bf16.msra.mxu0 %v275_v42  ;;  %v5869_v63 = vsel %vm524_vm4, %v530_v43, %v534_v59  ;;  %v689_v13 = vrot.slane %v5798_v11, 2  ;;  %v123_v15 = vor.u32 %v121_v57, %v119_v3  ;;  %v691_v16 = vrot.slane %v5812_v18, 2 }
  0x1c   :  { %420 = vmatprep.subr.bf16.mxu0 %v5531_v45  ;;  %v5872_v4 = vsel %vm524_vm4, %v534_v59, %v538_v61  ;;  %v5874_v5 = vor.u32 %v541_v1, %v540_v0  ;;  %v120_v9 = vsel %vm84_vm2, %v115_v8, %v119_v3  ;;  %v415_v23 = vsel %vm158_vm0, %v5534_v19, 0 }
  0x1d   :  { %v5889_v14 = vsel %vm158_vm0, %v688_v12, %v689_v13  ;;  %v692_v20 = vsel %vm158_vm0, %v689_v13, %v691_v16 }
  0x1e   :  { %4376 = vmatmul.mubr.msk.bf16.gmra.mrb[4].mxu0 %vm142_vm1, %v104_v53  ;;  %v5879_v7 = vsel %vm524_vm4, %v538_v61, %v5874_v5 }
  0x1f   :  { %217 = vmatprep.mubr.bf16.mxu0 %v7689_v2 }
  0x26   :  { %4377 = vmatmul.mubr.msk.bf16.gmra.mrb[8].mxu0 %vm142_vm1, %v112_v6 }
  0x27   :  { %227 = vmatprep.mubr.bf16.mxu0 %v7689_v2 }
  0x2e   :  { %4378 = vmatmul.mubr.msk.bf16.gmra.mrb[12].mxu0 %vm142_vm1, %v120_v9 }
  0x2f   :  { %237 = vmatprep.mubr.bf16.mxu0 %v7689_v2 }
  0x36   :  { %4379 = vmatmul.mubr.msk.bf16.gmra.mrb[16].mxu0 %vm142_vm1, %v123_v15 }
  0x37   :  { %312 = vmatprep.mubr.bf16.mxu0 %v7689_v2 }
  0x3e   :  { %4385 = vmatmul.mubr.msk.bf16.vlgmr.msra.gmra.mrb[0].mxu0 %vm142_vm1, %v5796_v10 }
  0x3f   :  { %421 = vmatpush1.bf16.msra.mxu0 %v5529_v17  ;;  %322 = vmatprep.mubr.bf16.mxu0 %v7689_v2 }
  0x40   :  { %4398 = vmatprep.subr.msk.bf16.mxu0 %vm158_vm0, %v5532_v21 }
  0x43   :  { %423 = vmatpush1.bf16.msra.mxu0 %v415_v23 }
  0x44   :  { %583 = vmatprep.subr.bf16.mxu0 %v5537_v22 }
  0x46   :  { %4386 = vmatmul.mubr.msk.bf16.gmra.mrb[4].mxu0 %vm142_vm1, %v5798_v11 }
  0x47   :  { %332 = vmatprep.mubr.bf16.mxu0 %v7689_v2 }
  0x4e   :  { %4387 = vmatmul.mubr.msk.bf16.gmra.mrb[8].mxu0 %vm142_vm1, %v5812_v18 }
  0x4f   :  { %342 = vmatprep.mubr.bf16.mxu0 %v7689_v2 }
  0x56   :  { %4388 = vmatmul.mubr.msk.bf16.gmra.mrb[12].mxu0 %vm142_vm1, %v5837_v37 }
  0x57   :  { %352 = vmatprep.mubr.bf16.mxu0 %v7689_v2 }
  0x58   :  { %23 = vsyncpa [#allocation3], 0  ;;  %v5535_v10 = vld [vmem:[%s7718_s29 + $0x60] ss:$8 sps:$4 sm:$0xff]   ;;  %v5543_v26 = vld [vmem:[%s7718_s29 + $0x84] ss:$8 sps:$4 sm:$0xff]  }
  0x59   :  { %v5538_v11 = vld [vmem:[%s7718_s29 + $0x74] ss:$8 sps:$4 sm:$0x3f]   ;;  %v5540_v24 = vld [vmem:[%s7718_s29 + $0x70] ss:$8 sps:$4 sm:$0x3f]  }
  0x5a   :  { %v578_v25 = vsel %vm158_vm0, %v5540_v24, 0  ;;  %v377_v27 = vrot.slane %v5837_v37, 1  ;;  %v379_v29 = vrot.slane %v5844_v44, 1  ;;  %v5541_v31 = vld [vmem:[%s7718_s29 + $0x80] ss:$8 sps:$4 sm:$0xff]   ;;  %v693_v35 = vrot.slane %v5837_v37, 2 }
  0x5b   :  { %v5544_v32 = vld [vmem:[%s7718_s29 + $0x94] ss:$8 sps:$4 sm:$0x3f]   ;;  %v5546_v33 = vld [vmem:[%s7718_s29 + $0x90] ss:$8 sps:$4 sm:$0x3f]  }
  0x5c   :  { %v378_v28 = vsel %vm371_vm3, %v375_v47, %v377_v27  ;;  %v380_v30 = vsel %vm371_vm3, %v377_v27, %v379_v29  ;;  %v731_v34 = vsel %vm158_vm0, %v5546_v33, 0  ;;  %v694_v36 = vsel %vm158_vm0, %v691_v16, %v693_v35  ;;  %v998_v18 = vld [vmem:[%s7674_s7] sm:$0xff]  ;;  %v999_v37 = vld [vmem:[%s7674_s7 + $0x8] sm:$0xff]  ;;  %v1000_v42 = vld [vmem:[%s7674_s7 + $0x10] sm:$0xff]  ;;  %s5669_s22 = smov 127  }
  0x5d   :  { %v695_v38 = vrot.slane %v5844_v44, 2  ;;  %v6006_v40 = vpack.c.bf16 %v999_v37, %v998_v18  ;;  %v7691_v41 = vmov 0.0|0.0   ;;  %v1001_v43 = vld [vmem:[%s7674_s7 + $0x18] sm:$0xff]  ;;  %v1002_v45 = vld [vmem:[%s7674_s7 + $0x20] sm:$0xff]  ;;  %v1004_v48 = vld [vmem:[%s7674_s7 + $0x30] sm:$0xff] }
  0x5e   :  { %4389 = vmatmul.mubr.msk.bf16.gmra.mrb[16].mxu0 %vm142_vm1, %v5844_v44  ;;  %5111 = vmatprep.subr.bf16.mxu1 %v7691_v41  ;;  %v6018_v44 = vpack.c.bf16 %v1001_v43, %v1000_v42  ;;  %v1005_v49 = vld [vmem:[%s7674_s7 + $0x38] sm:$0xff]  ;;  %v1007_v52 = vld [vmem:[%s7674_s7 + $0x48] sm:$0xff]  ;;  %v1008_v54 = vld [vmem:[%s7674_s7 + $0x50] sm:$0xff] }
  0x5f   :  { %452 = vmatprep.mubr.bf16.mxu0 %v7689_v2  ;;  %v696_v39 = vsel %vm158_vm0, %v693_v35, %v695_v38  ;;  %5113 = vmatpush1.bf16.msra.mxu1 %v6006_v40  ;;  %v1009_v55 = vld [vmem:[%s7674_s7 + $0x58] sm:$0xff]  ;;  %v1010_v57 = vld [vmem:[%s7674_s7 + $0x60] sm:$0xff]  ;;  %v1011_v58 = vld [vmem:[%s7674_s7 + $0x68] sm:$0xff] }
  0x60   :  { %5114 = vmatprep.subr.bf16.mxu1 %v7691_v41  ;;  %v6058_v56 = vpack.c.bf16 %v1009_v55, %v1008_v54  ;;  %v6068_v59 = vpack.c.bf16 %v1011_v58, %v1010_v57  ;;  %v1012_v60 = vld [vmem:[%s7674_s7 + $0x70] sm:$0xff]  ;;  %v1013_v61 = vld [vmem:[%s7674_s7 + $0x78] sm:$0xff]  ;;  %v1014_v62 = vld [vmem:[%s7674_s7 + $0x80] sm:$0xff] }
  0x61   :  { %v1015_v0 = vld [vmem:[%s7674_s7 + $0x88] sm:$0xff] }
  0x62   :  { %v6087_v1 = vpack.c.bf16 %v1015_v0, %v1014_v62  ;;  %v6094_v3 = vld [vmem:[%s7675_s8 + $0x8] sm:$0x3f] }
  0x63   :  { %5116 = vmatpush1.bf16.msra.mxu1 %v6018_v44 }
  0x64   :  { %5117 = vmatprep.subr.bf16.mxu1 %v7691_v41 }
  0x66   :  { %4399 = vmatmul.mubr.msk.bf16.vlgmr.msra.gmra.mrb[0].mxu0 %vm142_vm1, %v5850_v46  ;;  %v1003_v46 = vld [vmem:[%s7674_s7 + $0x28] sm:$0xff] }
  0x67   :  { %584 = vmatpush1.bf16.msra.mxu0 %v5535_v10  ;;  %462 = vmatprep.mubr.bf16.mxu0 %v7689_v2  ;;  %v6028_v47 = vpack.c.bf16 %v1003_v46, %v1002_v45 }
  0x68   :  { %4412 = vmatprep.subr.msk.bf16.mxu0 %vm158_vm0, %v5538_v11 }
  0x69   :  { %5119 = vmatpush1.bf16.msra.mxu1 %v6028_v47 }
  0x6a   :  { %5120 = vmatprep.subr.bf16.mxu1 %v7691_v41 }
  0x6b   :  { %586 = vmatpush1.bf16.msra.mxu0 %v578_v25 }
  0x6c   :  { %736 = vmatprep.subr.bf16.mxu0 %v5543_v26 }
  0x6e   :  { %4400 = vmatmul.mubr.msk.bf16.gmra.mrb[4].mxu0 %vm142_vm1, %v5858_v50  ;;  %v6038_v50 = vpack.c.bf16 %v1005_v49, %v1004_v48 }
  0x6f   :  { %472 = vmatprep.mubr.bf16.mxu0 %v7689_v2 }
  0x70   :  { %5122 = vmatpush1.bf16.msra.mxu1 %v6038_v50 }
  0x71   :  { %5123 = vmatprep.subr.bf16.mxu1 %v7691_v41 }
  0x76   :  { %4401 = vmatmul.mubr.msk.bf16.gmra.mrb[8].mxu0 %vm142_vm1, %v378_v28 }
  0x77   :  { %482 = vmatprep.mubr.bf16.mxu0 %v7689_v2 }
  0x7e   :  { %4402 = vmatmul.mubr.msk.bf16.gmra.mrb[12].mxu0 %vm142_vm1, %v380_v30 }
  0x7f   :  { %492 = vmatprep.mubr.bf16.mxu0 %v7689_v2 }
  0x86   :  { %4403 = vmatmul.mubr.msk.bf16.gmra.mrb[16].mxu0 %vm142_vm1, %v379_v29 }
  0x87   :  { %615 = vmatprep.mubr.bf16.mxu0 %v7689_v2 }
  0x8e   :  { %4413 = vmatmul.mubr.msk.bf16.vlgmr.msra.gmra.mrb[0].mxu0 %vm142_vm1, %v5861_v51  ;;  %v1006_v51 = vld [vmem:[%s7674_s7 + $0x40] sm:$0xff] }
  0x8f   :  { %737 = vmatpush1.bf16.msra.mxu0 %v5541_v31  ;;  %625 = vmatprep.mubr.bf16.mxu0 %v7689_v2  ;;  %v6048_v53 = vpack.c.bf16 %v1007_v52, %v1006_v51 }
  0x90   :  { %4426 = vmatprep.subr.msk.bf16.mxu0 %vm158_vm0, %v5544_v32 }
  0x91   :  { %5125 = vmatpush1.bf16.msra.mxu1 %v6048_v53 }
  0x92   :  { %5126 = vmatprep.subr.bf16.mxu1 %v7691_v41 }
  0x93   :  { %739 = vmatpush1.bf16.msra.mxu0 %v731_v34 }
  0x94   :  { %5165 = vmatprep.subr.bf16.mxu0 %v7691_v41 }
  0x95   :  { %5128 = vmatpush1.bf16.msra.mxu1 %v6058_v56 }
  0x96   :  { %4414 = vmatmul.mubr.msk.bf16.gmra.mrb[4].mxu0 %vm142_vm1, %v5869_v63  ;;  %5129 = vmatprep.subr.bf16.mxu1 %v7691_v41  ;;  %v6081_v63 = vpack.c.bf16 %v1013_v61, %v1012_v60 }
  0x97   :  { %635 = vmatprep.mubr.bf16.mxu0 %v7689_v2 }
  0x99   :  { %5131 = vmatpush1.bf16.msra.mxu1 %v6068_v59 }
  0x9a   :  { %5132 = vmatprep.subr.bf16.mxu1 %v7691_v41 }
  0x9d   :  { %5134 = vmatpush1.bf16.msra.mxu1 %v6081_v63 }
  0x9e   :  { %4415 = vmatmul.mubr.msk.bf16.gmra.mrb[8].mxu0 %vm142_vm1, %v5872_v4  ;;  %5135 = vmatprep.subr.bf16.mxu1 %v7691_v41  ;;  %v835_v4 = vlaneseq }
  0x9f   :  { %645 = vmatprep.mubr.bf16.mxu0 %v7689_v2 }
  0xa1   :  { %5137 = vmatpush1.bf16.msra.mxu1 %v6087_v1 }
  0xa2   :  { %4433 = vmatprep.subr.msk.mxu1 %vm158_vm0, %v6094_v3 }
  0xa6   :  { %4416 = vmatmul.mubr.msk.bf16.gmra.mrb[12].mxu0 %vm142_vm1, %v5879_v7 }
  0xa7   :  { %655 = vmatprep.mubr.bf16.mxu0 %v7689_v2 }
  0xae   :  { %4417 = vmatmul.mubr.msk.bf16.gmra.mrb[16].mxu0 %vm142_vm1, %v5874_v5  ;;  %v6098_v5 = vshrl.u32 %v835_v4, 7 }
  0xaf   :  { %768 = vmatprep.mubr.bf16.mxu0 %v7689_v2 }
  0xb0   :  { %v6101_v6 = vadd.s32 8, %v6098_v5  ;;  %v6104_v7 = vmul.u32.u64.low 3817748708, %v6098_v5  ;;  %v6105_v8 = vmul.u32.u64.high 3817748708, %v6098_v5, %v6104_v7  ;;  %v6112_v13 = vadd.s32 16, %v6098_v5 }
  0xb1   :  { %v6128_v22 = vadd.s32 32, %v6098_v5  ;;  %v6131_v10 = vadd.s32 40, %v6098_v5  ;;  %v6146_v33 = vadd.s32 48, %v6098_v5  ;;  %v6149_v35 = vadd.s32 56, %v6098_v5 }
  0xb2   :  { %v6108_v9 = vmul.u32.u64.low 3817748708, %v6101_v6  ;;  %v6109_v12 = vmul.u32.u64.high 3817748708, %v6101_v6, %v6108_v9  ;;  %v6118_v15 = vmul.u32.u64.low 3817748708, %v6112_v13  ;;  %v6119_v16 = vmul.u32.u64.high 3817748708, %v6112_v13, %v6118_v15 }
  0xb3   :  { %v851_v17 = vshrl.u32 %v6105_v8, 5  ;;  %v6134_v24 = vmul.u32.u64.low 3817748708, %v6128_v22  ;;  %v6135_v25 = vmul.u32.u64.high 3817748708, %v6128_v22, %v6134_v24  ;;  %7720 = vst [vmem:[#allocation5_spill] sm:$0xff] %v6146_v33  ;;  %7721 = vst [vmem:[#allocation6_spill] sm:$0xff] %v6149_v35  ;;  %v6168_v54 = vadd.s32 64, %v6098_v5 }
  0xb4   :  { %v862_v21 = vshrl.u32 %v6109_v12, 5  ;;  %v873_v26 = vshrl.u32 %v6119_v16, 5  ;;  %v6141_v29 = vmul.u32.u64.low 3817748708, %v6131_v10  ;;  %v6142_v30 = vmul.u32.u64.high 3817748708, %v6131_v10, %v6141_v29 }
  0xb5   :  { %v852_v23 = vmul.u32 36, %v851_v17  ;;  %v6154_v37 = vmul.u32.u64.low 3817748708, %v6146_v33  ;;  %v6155_v42 = vmul.u32.u64.high 3817748708, %v6146_v33, %v6154_v37 }
  0xb6   :  { %4427 = vmatmul.mubr.msk.bf16.vlgmr.msra.gmra.mrb[0].mxu0 %vm142_vm1, %v5889_v14  ;;  %v6115_v14 = vadd.s32 24, %v6098_v5  ;;  %v863_v11 = vmul.u32 36, %v862_v21  ;;  %v874_v32 = vmul.u32 36, %v873_v26  ;;  %v906_v45 = vshrl.u32 %v6142_v30, 5 }
  0xb7   :  { %778 = vmatprep.mubr.bf16.mxu0 %v7689_v2  ;;  %v853_v27 = vsub.s32 %v6098_v5, %v852_v23  ;;  %v6160_v46 = vmul.u32.u64.low 3817748708, %v6149_v35  ;;  %v6161_v48 = vmul.u32.u64.high 3817748708, %v6149_v35, %v6160_v46  ;;  %v917_v0 = vshrl.u32 %v6155_v42, 5 }
  0xb8   :  { %v864_v31 = vsub.s32 %v6101_v6, %v863_v11  ;;  %v875_v18 = vsub.s32 %v6112_v13, %v874_v32  ;;  %v907_v55 = vmul.u32 36, %v906_v45 }
  0xb9   :  { %vm944_vm5 = vcmp.ne.s32.totalorder %v853_v27, 0  ;;  %vm953_vm6 = vcmp.lt.s32.totalorder %v853_v27, 0  ;;  %v6179_v4 = vmul.u32.u64.low 3817748708, %v6168_v54  ;;  %v6180_v7 = vmul.u32.u64.high 3817748708, %v6168_v54, %v6179_v4 }
  0xba   :  { %vm945_vm7 = vcmp.ne.s32.totalorder %v864_v31, 0  ;;  %vm954_vm8 = vcmp.lt.s32.totalorder %v864_v31, 0  ;;  %vm962_vm9 = vmand %vm953_vm6, %vm944_vm5  ;;  %vm946_vm11 = vcmp.ne.s32.totalorder %v875_v18, 0  ;;  %vm955_vm12 = vcmp.lt.s32.totalorder %v875_v18, 0 }
  0xbb   :  { %vm963_vm10 = vmand %vm954_vm8, %vm945_vm7  ;;  %v973_v57 = vadd.s32 36, %v875_v18  ;;  %vm1052_vm5 = vcmask 130048   ;;  %v908_v12 = vsub.s32 %v6131_v10, %v907_v55  ;;  %v918_v26 = vmul.u32 36, %v917_v0 }
  0xbc   :  { %vm964_vm2 = vmand %vm955_vm12, %vm946_vm11 }
  0xbe   :  { %4428 = vmatmul.mubr.msk.bf16.gmra.mrb[4].mxu0 %vm142_vm1, %v692_v20  ;;  %v6123_v19 = vmul.u32.u64.low 3817748708, %v6115_v14  ;;  %v6124_v20 = vmul.u32.u64.high 3817748708, %v6115_v14, %v6123_v19 }
  0xbf   :  { %788 = vmatprep.mubr.bf16.mxu0 %v7689_v2  ;;  %v6196_v19 = vsel %vm964_vm2, %v973_v57, %v875_v18 }
  0xc0   :  { %v884_v28 = vshrl.u32 %v6124_v20, 5  ;;  %v928_v20 = vshrl.u32 %v6161_v48, 5  ;;  %vm991_vm8 = vcmp.lt.s32.totalorder %v6196_v19, 24 }
  0xc2   :  { %v885_v34 = vmul.u32 36, %v884_v28  ;;  %v929_v29 = vmul.u32 36, %v928_v20 }
  0xc4   :  { %v886_v43 = vsub.s32 %v6115_v14, %v885_v34  ;;  %v930_v48 = vsub.s32 %v6149_v35, %v929_v29 }
  0xc6   :  { %4429 = vmatmul.mubr.msk.bf16.gmra.mrb[8].mxu0 %vm142_vm1, %v694_v36  ;;  %v971_v36 = vadd.s32 36, %v853_v27  ;;  %vm947_vm13 = vcmp.ne.s32.totalorder %v886_v43, 0  ;;  %vm956_vm14 = vcmp.lt.s32.totalorder %v886_v43, 0  ;;  %v974_v60 = vadd.s32 36, %v886_v43 }
  0xc7   :  { %798 = vmatprep.mubr.bf16.mxu0 %v7689_v2  ;;  %vm965_vm4 = vmand %vm956_vm14, %vm947_vm13 }
  0xc8   :  { %v6163_v49 = vsel %vm962_vm9, %v971_v36, %v853_v27  ;;  %v6202_v11 = vsel %vm965_vm4, %v974_v60, %v886_v43  ;;  %vm949_vm9 = vcmp.ne.s32.totalorder %v908_v12, 0  ;;  %v919_v36 = vsub.s32 %v6146_v33, %v918_v26 }
  0xc9   :  { %vm989_vm15 = vcmp.lt.s32.totalorder %v6163_v49, 24  ;;  %vm992_vm11 = vcmp.lt.s32.totalorder %v6202_v11, 24 }
  0xca   :  { %vm950_vm14 = vcmp.ne.s32.totalorder %v919_v36, 0  ;;  %vm959_vm2 = vcmp.lt.s32.totalorder %v919_v36, 0 }
  0xce   :  { %4430 = vmatmul.mubr.msk.bf16.gmra.mrb[12].mxu0 %vm142_vm1, %v696_v39  ;;  %v972_v39 = vadd.s32 36, %v864_v31 }
  0xcf   :  { %808 = vmatprep.mubr.bf16.mxu0 %v7689_v2 }
  0xd0   :  { %v6165_v52 = vsel %vm963_vm10, %v972_v39, %v864_v31  ;;  %vm958_vm10 = vcmp.lt.s32.totalorder %v908_v12, 0  ;;  %v976_v31 = vadd.s32 36, %v908_v12 }
  0xd1   :  { %vm967_vm13 = vmand %vm958_vm10, %vm949_vm9 }
  0xd2   :  { %v6234_v60 = vsel %vm967_vm13, %v976_v31, %v908_v12  ;;  %vm968_vm10 = vmand %vm959_vm2, %vm950_vm14 }
  0xd3   :  { %7723 = vst [vmem:[#allocation8_spill] sm:$0xff] %v6234_v60  ;;  %vm994_vm9 = vcmp.lt.s32.totalorder %v6234_v60, 24 }
  0xd6   :  { %4431 = vmatmul.mubr.msk.bf16.gmra.mrb[16].mxu0 %vm142_vm1, %v695_v38  ;;  %v895_v38 = vshrl.u32 %v6135_v25, 5  ;;  %vm990_vm1 = vcmp.lt.s32.totalorder %v6165_v52, 24 }
  0xd8   :  { %v896_v51 = vmul.u32 36, %v895_v38  ;;  %v939_v38 = vshrl.u32 %v6180_v7, 5 }
  0xda   :  { %v897_v61 = vsub.s32 %v6128_v22, %v896_v51  ;;  %v940_v4 = vmul.u32 36, %v939_v38 }
  0xdc   :  { %vm948_vm6 = vcmp.ne.s32.totalorder %v897_v61, 0  ;;  %vm957_vm7 = vcmp.lt.s32.totalorder %v897_v61, 0  ;;  %v975_v28 = vadd.s32 36, %v897_v61  ;;  %v941_v20 = vsub.s32 %v6168_v54, %v940_v4 }
  0xdd   :  { %vm966_vm12 = vmand %vm957_vm7, %vm948_vm6  ;;  %vm951_vm6 = vcmp.ne.s32.totalorder %v930_v48, 0  ;;  %vm960_vm7 = vcmp.lt.s32.totalorder %v930_v48, 0 }
  0xde   :  { %v6228_v46 = vsel %vm966_vm12, %v975_v28, %v897_v61  ;;  %v977_v61 = vadd.s32 36, %v919_v36  ;;  %vm969_vm12 = vmand %vm960_vm7, %vm951_vm6  ;;  %vm952_vm13 = vcmp.ne.s32.totalorder %v941_v20, 0  ;;  %vm961_vm14 = vcmp.lt.s32.totalorder %v941_v20, 0 }
  0xdf   :  { %7722 = vst [vmem:[#allocation7_spill] sm:$0xff] %v6228_v46  ;;  %vm993_vm4 = vcmp.lt.s32.totalorder %v6228_v46, 24  ;;  %vm970_vm7 = vmand %vm961_vm14, %vm952_vm13  ;;  %vm1068_vm13 = vcmask 125952   ;;  %vm1152_vm14 = vcmask 48128  }
  0xe0   :  { %v6258_v28 = vsel %vm968_vm10, %v977_v61, %v919_v36 }
  0xe1   :  { %7724 = vst [vmem:[#allocation9_spill] sm:$0xff] %v6258_v28  ;;  %vm995_vm2 = vcmp.lt.s32.totalorder %v6258_v28, 24 }
 0x189   :  { %v6171_v58 = vpop.f32.mrb[0].mxu0 }
 0x18a   :  { %v6175_v62 = vpop.f32.mrb[1].mxu0  ;;  %v1018_v15 = vsel %vm989_vm15, %v6171_v58, 0.0 }
 0x18b   :  { %v1019_v8 = vsel %vm989_vm15, %v6175_v62, 0.0  ;;  %v6185_v9 = vpop.f32.mrb[2].mxu0 }
 0x18c   :  { %v1020_v16 = vsel %vm990_vm1, %v6185_v9, 0.0  ;;  %v6194_v17 = vpop.f32.mrb[3].mxu0  ;;  %v1053_v24 = vsel %vm1052_vm5, %v1019_v8, 0.0 }
 0x18d   :  { %v1036_v21 = vadd.f32 %v1020_v16, %v1018_v15  ;;  %v1021_v23 = vsel %vm990_vm1, %v6194_v17, 0.0  ;;  %v978_v16 = vadd.s32 36, %v930_v48 }
 0x18e   :  { %v1054_v25 = vsel %vm1052_vm5, %v1021_v23, 0.0 }
 0x18f   :  { %v1055_v27 = vadd.f32 %v1054_v25, %v1053_v24  ;;  %v6264_v38 = vsel %vm969_vm12, %v978_v16, %v930_v48  ;;  %vm7713_vm12 = vcmask 1043456  }
 0x190   :  { %7725 = vst [vmem:[#allocation10_spill] sm:$0xff] %v6264_v38  ;;  %vm996_vm6 = vcmp.lt.s32.totalorder %v6264_v38, 24 }
 0x191   :  { %v6207_v30 = vpop.f32.mrb[4].mxu0 }
 0x192   :  { %v1022_v32 = vsel %vm991_vm8, %v6207_v30, 0.0  ;;  %v6213_v34 = vpop.f32.mrb[5].mxu0 }
 0x193   :  { %v1037_v39 = vadd.f32 %v1036_v21, %v1022_v32  ;;  %v1023_v18 = vsel %vm991_vm8, %v6213_v34, 0.0  ;;  %v6220_v37 = vpop.f32.mrb[6].mxu0 }
 0x194   :  { %v1056_v42 = vsel %vm1052_vm5, %v1023_v18, 0.0  ;;  %v1024_v43 = vsel %vm992_vm11, %v6220_v37, 0.0  ;;  %v6226_v45 = vpop.f32.mrb[7].mxu0  ;;  %v979_v18 = vadd.s32 36, %v941_v20 }
 0x195   :  { %v1057_v51 = vadd.f32 %v1056_v42, %v1055_v27  ;;  %v1038_v55 = vadd.f32 %v1037_v39, %v1024_v43  ;;  %v1025_v57 = vsel %vm992_vm11, %v6226_v45, 0.0 }
 0x196   :  { %v1058_v0 = vsel %vm1052_vm5, %v1025_v57, 0.0 }
 0x197   :  { %v1059_v7 = vadd.f32 %v1058_v0, %v1057_v51 }
 0x199   :  { %v6238_v8 = vpop.f32.mrb[8].mxu0 }
 0x19a   :  { %v1026_v12 = vsel %vm993_vm4, %v6238_v8, 0.0  ;;  %v6244_v15 = vpop.f32.mrb[9].mxu0 }
 0x19b   :  { %v1039_v21 = vadd.f32 %v1038_v55, %v1026_v12  ;;  %v1027_v23 = vsel %vm993_vm4, %v6244_v15, 0.0  ;;  %v6250_v24 = vpop.f32.mrb[10].mxu0 }
 0x19c   :  { %v1060_v25 = vsel %vm1052_vm5, %v1027_v23, 0.0  ;;  %v1028_v26 = vsel %vm994_vm9, %v6250_v24, 0.0  ;;  %v6256_v27 = vpop.f32.mrb[11].mxu0 }
 0x19d   :  { %v1061_v29 = vadd.f32 %v1060_v25, %v1059_v7  ;;  %v1040_v54 = vadd.f32 %v1039_v21, %v1028_v26  ;;  %v1029_v31 = vsel %vm994_vm9, %v6256_v27, 0.0  ;;  %v988_v7 = vsel %vm970_vm7, %v979_v18, %v941_v20 }
 0x19e   :  { %v1062_v32 = vsel %vm1052_vm5, %v1029_v31, 0.0  ;;  %vm6290_vm10 = vcmp.lt.s32.totalorder %v988_v7, 24 }
 0x19f   :  { %v1063_v39 = vadd.f32 %v1062_v32, %v1061_v29 }
 0x1a1   :  { %v6267_v42 = vpop.f32.mrb[12].mxu0 }
 0x1a2   :  { %v1030_v36 = vsel %vm995_vm2, %v6267_v42, 0.0  ;;  %v6273_v43 = vpop.f32.mrb[13].mxu0 }
 0x1a3   :  { %v1041_v51 = vadd.f32 %v1040_v54, %v1030_v36  ;;  %v1031_v48 = vsel %vm995_vm2, %v6273_v43, 0.0  ;;  %v6278_v55 = vpop.f32.mrb[14].mxu0 }
 0x1a4   :  { %v1064_v57 = vsel %vm1052_vm5, %v1031_v48, 0.0  ;;  %v1032_v0 = vsel %vm996_vm6, %v6278_v55, 0.0  ;;  %v6284_v4 = vpop.f32.mrb[15].mxu0 }
 0x1a5   :  { %v1065_v61 = vadd.f32 %v1064_v57, %v1063_v39  ;;  %v1042_v12 = vadd.f32 %v1041_v51, %v1032_v0  ;;  %v1033_v16 = vsel %vm996_vm6, %v6284_v4, 0.0 }
 0x1a6   :  { %v1066_v21 = vsel %vm1052_vm5, %v1033_v16, 0.0 }
 0x1a7   :  { %v1067_v23 = vadd.f32 %v1066_v21, %v1065_v61 }
 0x1a9   :  { %v6294_v26 = vpop.f32.mrb[16].mxu0 }
 0x1aa   :  { %v1034_v20 = vsel %vm6290_vm10, %v6294_v26, 0.0  ;;  %v6299_v29 = vpop.f32.mrb[17].mxu0 }
 0x1ab   :  { %v1044_v54 = vsel %vm7713_vm12, %v1034_v20, 0.0  ;;  %v1035_v31 = vsel %vm6290_vm10, %v6299_v29, 0.0  ;;  %v814_v32 = vpop.f32.mrb[18].mxu0 }
 0x1ac   :  { %v1045_v39 = vadd.f32 %v1044_v54, %v1042_v12  ;;  %v1069_v18 = vsel %vm1068_vm13, %v1035_v31, 0.0  ;;  %v815_v36 = vpop.f32.mrb[19].mxu0  ;;  %v6310_v12 = vld [vmem:[%s7675_s8] sm:$0x3f]  ;;  %v7728_v54 = vmov 0.0|0.0  }
 0x1ad   :  { %v1070_v51 = vadd.f32 %v1069_v18, %v1067_v23  ;;  %v7695_v23 = vmov 0.0  }
 0x1ae   :  { %v1046_v48 = vrot.slane %v1045_v39, 4 }
 0x1af   :  { %v1071_v57 = vrot.slane %v1070_v51, 4 }
 0x1b0   :  { %v1047_v0 = vadd.f32 %v1046_v48, %v1045_v39 }
 0x1b1   :  { %v1072_v7 = vadd.f32 %v1071_v57, %v1070_v51 }
 0x1b2   :  { %v1048_v61 = vrot.slane %v1047_v0, 2 }
 0x1b3   :  { %v1073_v16 = vrot.slane %v1072_v7, 2 }
 0x1b4   :  { %v1049_v21 = vadd.f32 %v1048_v61, %v1047_v0 }
 0x1b5   :  { %v1074_v2 = vadd.f32 %v1073_v16, %v1072_v7 }
 0x1b6   :  { %v1050_v41 = vrot.slane %v1049_v21, 1 }
 0x1b7   :  { %v1075_v20 = vrot.slane %v1074_v2, 1 }
 0x1b8   :  { %v1051_v33 = vadd.f32 %v1050_v41, %v1049_v21 }
 0x1b9   :  { %v1076_v35 = vadd.f32 %v1075_v20, %v1074_v2 }
 0x1bb   :  { %4432 = vmatprep.mubr.msk.f32.mxu1 %vm1052_vm5, %v1076_v35 }
 0x1bc   :  { %1145 = vmatmul.mubr.f32.vlgmr.msra.gmra.mrb[0].mxu1 %v1051_v33 }
 0x1bd   :  { %4434 = vmatpush1.msk.msra.mxu1 %vm158_vm0, %v6310_v12  ;;  %1226 = vmatprep.mubr.f32.mxu1 %v7695_v23 }
 0x1be   :  { %5138 = vmatprep.subr.bf16.mxu1 %v7728_v54 }
 0x28f   :  { %v1146_v31 = vpop.f32.mrb[0].mxu1 }
 0x290   :  { %v1151_v2 = vmul.f32 0.00086805556, %v1146_v31  ;;  %v1148_v41 = vpop.f32.mrb[1].mxu1 }
 0x292   :  { %4435 = vmatmul.mubr.msk.f32.vlgmr.msra.gmra.mrb[2].mxu1 %vm1152_vm14, %v1151_v2 }
 0x293   :  { %5140 = vmatpush1.bf16.msra.mxu1 %v6006_v40  ;;  %v6337_v40 = vsub.s32 0, %v6098_v5 }
 0x294   :  { %5141 = vmatprep.subr.bf16.mxu1 %v7728_v54 }
 0x295   :  { %7729 = vst [vmem:[#allocation11_spill] sm:$0xff] %v6337_v40 }
 0x297   :  { %5143 = vmatpush1.bf16.msra.mxu1 %v6018_v44 }
 0x298   :  { %5144 = vmatprep.subr.bf16.mxu1 %v7728_v54 }
 0x29b   :  { %5146 = vmatpush1.bf16.msra.mxu1 %v6028_v47 }
 0x29c   :  { %5147 = vmatprep.subr.bf16.mxu1 %v7728_v54 }
 0x29f   :  { %5149 = vmatpush1.bf16.msra.mxu1 %v6038_v50 }
 0x2a0   :  { %5150 = vmatprep.subr.bf16.mxu1 %v7728_v54 }
 0x2a3   :  { %5152 = vmatpush1.bf16.msra.mxu1 %v6048_v53 }
 0x2a4   :  { %5153 = vmatprep.subr.bf16.mxu1 %v7728_v54 }
 0x2a7   :  { %5155 = vmatpush1.bf16.msra.mxu1 %v6058_v56 }
 0x2a8   :  { %5156 = vmatprep.subr.bf16.mxu1 %v7728_v54 }
 0x2ab   :  { %5158 = vmatpush1.bf16.msra.mxu1 %v6068_v59 }
 0x2ac   :  { %5159 = vmatprep.subr.bf16.mxu1 %v7728_v54 }
 0x2af   :  { %5161 = vmatpush1.bf16.msra.mxu1 %v6081_v63 }
 0x2b0   :  { %5162 = vmatprep.subr.bf16.mxu1 %v7728_v54 }
 0x2b3   :  { %5164 = vmatpush1.bf16.msra.mxu1 %v6087_v1 }
 0x2b4   :  { %4437 = vmatprep.subr.msk.mxu1 %vm158_vm0, %v6094_v3 }
 0x365   :  { %v1228_v44 = vpop.f32.mrb[2].mxu1 }
 0x366   :  { %v1236_v47 = vrot.slane %v1228_v44, %v6337_v40  ;;  %v1230_v50 = vpop.f32.mrb[3].mxu1 }
 0x367   :  { %v1240_v53 = vrot.slane %v1230_v50, %v6337_v40 }
 0x368   :  { %v6342_v56 = vsub.f32 %v6171_v58, %v1236_v47  ;;  %v6345_v59 = vsub.f32 %v6185_v9, %v1236_v47  ;;  %v6348_v63 = vsub.f32 %v6207_v30, %v1236_v47  ;;  %v6351_v1 = vsub.f32 %v6220_v37, %v1236_v47 }
 0x369   :  { %v6354_v33 = vsub.f32 %v6175_v62, %v1240_v53  ;;  %v6357_v35 = vsub.f32 %v6194_v17, %v1240_v53  ;;  %v6360_v32 = vsub.f32 %v6213_v34, %v1240_v53  ;;  %v6363_v58 = vsub.f32 %v6226_v45, %v1240_v53 }
 0x36a   :  { %v6366_v9 = vsub.f32 %v6244_v15, %v1240_v53  ;;  %v6369_v30 = vsub.f32 %v6256_v27, %v1240_v53  ;;  %v6372_v37 = vsub.f32 %v6273_v43, %v1240_v53  ;;  %v6375_v62 = vsub.f32 %v6284_v4, %v1240_v53 }
 0x36b   :  { %v6378_v17 = vsub.f32 %v6299_v29, %v1240_v53  ;;  %v1260_v34 = vmul.f32 %v6354_v33, %v6354_v33  ;;  %v1262_v45 = vmul.f32 %v6357_v35, %v6357_v35  ;;  %v1264_v15 = vmul.f32 %v6360_v32, %v6360_v32 }
 0x36c   :  { %v1266_v27 = vmul.f32 %v6363_v58, %v6363_v58  ;;  %v1268_v43 = vmul.f32 %v6366_v9, %v6366_v9  ;;  %v1270_v36 = vmul.f32 %v6369_v30, %v6369_v30  ;;  %v1272_v48 = vmul.f32 %v6372_v37, %v6372_v37 }
 0x36d   :  { %v1278_v4 = vsel %vm989_vm15, %v1260_v34, 0.0  ;;  %v1280_v29 = vsel %vm990_vm1, %v1262_v45, 0.0  ;;  %v1282_v39 = vsel %vm991_vm8, %v1264_v15, 0.0  ;;  %v6408_v16 = vsub.f32 %v6238_v8, %v1236_v47 }
 0x36e   :  { %v1310_v18 = vsel %vm1052_vm5, %v1278_v4, 0.0  ;;  %v1311_v51 = vsel %vm1052_vm5, %v1280_v29, 0.0  ;;  %v1284_v57 = vsel %vm992_vm11, %v1266_v27, 0.0  ;;  %v1286_v0 = vsel %vm993_vm4, %v1268_v43, 0.0 }
 0x36f   :  { %v1312_v7 = vadd.f32 %v1311_v51, %v1310_v18  ;;  %v1313_v61 = vsel %vm1052_vm5, %v1282_v39, 0.0  ;;  %v6411_v21 = vsub.f32 %v6250_v24, %v1236_v47  ;;  %v6414_v20 = vsub.f32 %v6267_v42, %v1236_v47 }
 0x370   :  { %v6417_v2 = vsub.f32 %v6278_v55, %v1236_v47  ;;  %v6420_v41 = vsub.f32 %v6294_v26, %v1236_v47  ;;  %v1259_v44 = vmul.f32 %v6342_v56, %v6342_v56  ;;  %v1315_v50 = vsel %vm1052_vm5, %v1284_v57, 0.0 }
 0x371   :  { %v1314_v31 = vadd.f32 %v1313_v61, %v1312_v7  ;;  %v1261_v8 = vmul.f32 %v6345_v59, %v6345_v59  ;;  %v1274_v24 = vmul.f32 %v6375_v62, %v6375_v62  ;;  %v1288_v42 = vsel %vm994_vm9, %v1270_v36, 0.0 }
 0x372   :  { %v1263_v55 = vmul.f32 %v6348_v63, %v6348_v63  ;;  %v1317_v26 = vsel %vm1052_vm5, %v1286_v0, 0.0  ;;  %v1277_v47 = vsel %vm989_vm15, %v1259_v44, 0.0  ;;  %v1276_v45 = vmul.f32 %v6378_v17, %v6378_v17 }
 0x373   :  { %v1316_v53 = vadd.f32 %v1315_v50, %v1314_v31  ;;  %v1279_v34 = vsel %vm990_vm1, %v1261_v8, 0.0  ;;  %v1290_v15 = vsel %vm995_vm2, %v1272_v48, 0.0  ;;  %v1265_v43 = vmul.f32 %v6351_v1, %v6351_v1 }
 0x374   :  { %v1319_v4 = vsel %vm1052_vm5, %v1288_v42, 0.0  ;;  %v1295_v29 = vadd.f32 %v1279_v34, %v1277_v47  ;;  %v1292_v39 = vsel %vm996_vm6, %v1274_v24, 0.0  ;;  %v1267_v36 = vmul.f32 %v6408_v16, %v6408_v16 }
 0x375   :  { %v1318_v27 = vadd.f32 %v1317_v26, %v1316_v53  ;;  %v1281_v51 = vsel %vm991_vm8, %v1263_v55, 0.0  ;;  %v1321_v57 = vsel %vm1052_vm5, %v1290_v15, 0.0  ;;  %v1294_v0 = vsel %vm6290_vm10, %v1276_v45, 0.0 }
 0x376   :  { %v1296_v48 = vadd.f32 %v1295_v29, %v1281_v51  ;;  %v1269_v61 = vmul.f32 %v6411_v21, %v6411_v21  ;;  %v1283_v31 = vsel %vm992_vm11, %v1265_v43, 0.0  ;;  %v1323_v44 = vsel %vm1052_vm5, %v1292_v39, 0.0 }
 0x377   :  { %v1320_v18 = vadd.f32 %v1319_v4, %v1318_v27  ;;  %v1271_v24 = vmul.f32 %v6414_v20, %v6414_v20  ;;  %v1285_v42 = vsel %vm993_vm4, %v1267_v36, 0.0  ;;  %v1325_v53 = vsel %vm1068_vm13, %v1294_v0, 0.0 }
 0x378   :  { %v1297_v50 = vadd.f32 %v1296_v48, %v1283_v31  ;;  %v1275_v55 = vmul.f32 %v6420_v41, %v6420_v41  ;;  %v1273_v34 = vmul.f32 %v6417_v2, %v6417_v2  ;;  %v1287_v45 = vsel %vm994_vm9, %v1269_v61, 0.0 }
 0x379   :  { %v1322_v7 = vadd.f32 %v1321_v57, %v1320_v18  ;;  %v1289_v43 = vsel %vm995_vm2, %v1271_v24, 0.0  ;;  %vm1956_vm15 = vcmask 1047552   ;;  %vm7714_vm1 = vcmask 1039360  }
 0x37a   :  { %v1298_v26 = vadd.f32 %v1297_v50, %v1285_v42  ;;  %v1293_v4 = vsel %vm6290_vm10, %v1275_v55, 0.0  ;;  %v1291_v18 = vsel %vm996_vm6, %v1273_v34, 0.0  ;;  %vm1943_vm8 = vcmask 121856  }
 0x37b   :  { %v1324_v8 = vadd.f32 %v1323_v44, %v1322_v7  ;;  %v1302_v57 = vsel %vm7713_vm12, %v1293_v4, 0.0  ;;  %vm2361_vm11 = vcmask 1044480   ;;  %vm2693_vm4 = vcmp.lt.s32.totalorder %v6163_v49, 16 }
 0x37c   :  { %v1299_v15 = vadd.f32 %v1298_v26, %v1287_v45  ;;  %vm2694_vm2 = vcmp.lt.s32.totalorder %v6165_v52, 16  ;;  %vm2695_vm13 = vcmp.lt.s32.totalorder %v6196_v19, 16 }
 0x37d   :  { %v1326_v47 = vadd.f32 %v1325_v53, %v1324_v8 }
 0x37e   :  { %v1300_v29 = vadd.f32 %v1299_v15, %v1289_v43  ;;  %v7730_v15 = vmov 0  }
 0x37f   :  { %v1327_v27 = vrot.slane %v1326_v47, 4 }
 0x380   :  { %v1301_v36 = vadd.f32 %v1300_v29, %v1291_v18 }
 0x381   :  { %v1328_v39 = vadd.f32 %v1327_v27, %v1326_v47  ;;  %v1407_v47 = vld [vmem:[%s7670_s3] sm:$0x1]  ;;  %s7731_s3 = sld [smem:[#allocation14_spill]] }
 0x382   :  { %v1303_v48 = vadd.f32 %v1302_v57, %v1301_v36 }
 0x383   :  { %v1329_v51 = vrot.slane %v1328_v39, 2 }
 0x384   :  { %v1304_v7 = vrot.slane %v1303_v48, 4 }
 0x385   :  { %v1330_v0 = vadd.f32 %v1329_v51, %v1328_v39 }
 0x386   :  { %v1305_v31 = vadd.f32 %v1304_v7, %v1303_v48 }
 0x387   :  { %v1331_v61 = vrot.slane %v1330_v0, 1  ;;  %v5547_v27 = vld [vmem:[%s7731_s3 + $0x48] sm:$0xff]   ;;  %v5548_v43 = vld [vmem:[%s7731_s3 + $0x50] sm:$0xff]   ;;  %v5550_v4 = vld [vmem:[%s7731_s3 + $0x60] sm:$0xff]  }
 0x388   :  { %v1306_v50 = vrot.slane %v1305_v31, 2 }
 0x389   :  { %v1332_v44 = vadd.f32 %v1331_v61, %v1330_v0 }
 0x38a   :  { %v1307_v25 = vadd.f32 %v1306_v50, %v1305_v31 }
 0x38b   :  { %4436 = vmatprep.mubr.msk.f32.mxu1 %vm1052_vm5, %v1332_v44 }
 0x38c   :  { %v1308_v8 = vrot.slane %v1307_v25, 1 }
 0x38e   :  { %v1309_v24 = vadd.f32 %v1308_v8, %v1307_v25 }
 0x390   :  { %1401 = vmatmul.mubr.f32.vlgmr.msra.gmra.mrb[4].mxu1 %v1309_v24 }
 0x391   :  { %4438 = vmatpush1.msk.msra.mxu1 %vm158_vm0, %v6310_v12  ;;  %1478 = vmatprep.mubr.f32.mxu1 %v7695_v23 }
 0x392   :  { %4440 = vmatprep.subr.msk.mxu1 %vm158_vm0, %v6094_v3  ;;  %v1511_v3 = vld [vmem:[%s7671_s4] sm:$0x1] }
 0x463   :  { %v1402_v42 = vpop.f32.mrb[4].mxu1 }
 0x464   :  { %v1406_v53 = vmul.f32 0.00086805556, %v1402_v42  ;;  %v1404_v55 = vpop.f32.mrb[5].mxu1 }
 0x466   :  { %v1408_v26 = vadd.f32 1e-05, %v1406_v53 }
 0x468   :  { %5638 = vrsqrt.f32 %v1408_v26 }
 0x472   :  { %v5639_v34 = vpop.eup %5638 }
 0x473   :  { %v1410_v45 = vmul.f32 %v5639_v34, %v1407_v47 }
 0x475   :  { %4439 = vmatmul.mubr.msk.f32.vlgmr.msra.gmra.mrb[6].mxu1 %vm1152_vm14, %v1410_v45 }
 0x476   :  { %4441 = vmatpush1.msk.msra.mxu1 %vm158_vm0, %v6310_v12  ;;  %1579 = vmatprep.mubr.f32.mxu1 %v7695_v23  ;;  %v5549_v12 = vld [vmem:[%s7731_s3 + $0x58] sm:$0xff]  }
 0x477   :  { %1962 = vmatprep.subr.bf16.mxu1 %v7730_v15 }
 0x479   :  { %4442 = vmatmul.mubr.msk.f32.vlgmr.msra.gmra.mrb[8].mxu1 %vm1152_vm14, %v1511_v3 }
 0x47a   :  { %1963 = vmatpush1.bf16.msra.mxu1 %v5547_v27 }
 0x47b   :  { %1964 = vmatprep.subr.bf16.mxu1 %v7730_v15 }
 0x47e   :  { %1965 = vmatpush1.bf16.msra.mxu1 %v5548_v43 }
 0x47f   :  { %1966 = vmatprep.subr.bf16.mxu1 %v7730_v15 }
 0x482   :  { %1967 = vmatpush1.bf16.msra.mxu1 %v5549_v12 }
 0x483   :  { %1968 = vmatprep.subr.bf16.mxu1 %v7730_v15 }
 0x486   :  { %1969 = vmatpush1.bf16.msra.mxu1 %v5550_v4 }
 0x487   :  { %1970 = vmatprep.subr.bf16.mxu1 %v7730_v15 }
 0x548   :  { %v1480_v29 = vpop.f32.mrb[6].mxu1 }
 0x549   :  { %v1488_v39 = vrot.slane %v1480_v29, %v6337_v40  ;;  %v1482_v18 = vpop.f32.mrb[7].mxu1 }
 0x54a   :  { %v1492_v36 = vrot.slane %v1482_v18, %v6337_v40 }
 0x54b   :  { %v1497_v51 = vmul.f32 %v1488_v39, %v6348_v63  ;;  %v1493_v57 = vmul.f32 %v1488_v39, %v6342_v56  ;;  %v1499_v61 = vmul.f32 %v1488_v39, %v6351_v1  ;;  %v1495_v31 = vmul.f32 %v1488_v39, %v6345_v59  ;;  %v5551_v59 = vld [vmem:[%s7731_s3 + $0x68] sm:$0xff]  }
 0x54c   :  { %v1581_v48 = vpop.f32.mrb[8].mxu1  ;;  %v1498_v0 = vmul.f32 %v1492_v36, %v6360_v32  ;;  %v1494_v7 = vmul.f32 %v1492_v36, %v6354_v33  ;;  %v1500_v25 = vmul.f32 %v1492_v36, %v6363_v58  ;;  %v1496_v8 = vmul.f32 %v1492_v36, %v6357_v35  ;;  %1971 = vmatpush1.bf16.msra.mxu1 %v5551_v59 }
 0x54d   :  { %v1589_v44 = vrot.slane %v1581_v48, %v6337_v40  ;;  %v1583_v50 = vpop.f32.mrb[9].mxu1  ;;  %v1503_v63 = vmul.f32 %v1488_v39, %v6411_v21  ;;  %v1504_v24 = vmul.f32 %v1492_v36, %v6369_v30  ;;  %v1501_v32 = vmul.f32 %v1488_v39, %v6408_v16  ;;  %1972 = vmatprep.subr.bf16.mxu1 %v7730_v15 }
 0x54e   :  { %v1593_v56 = vrot.slane %v1583_v50, %v6337_v40  ;;  %v1502_v33 = vmul.f32 %v1492_v36, %v6366_v9  ;;  %v1507_v26 = vmul.f32 %v1488_v39, %v6417_v2  ;;  %v1508_v47 = vmul.f32 %v1492_v36, %v6375_v62 }
 0x54f   :  { %v6530_v1 = vadd.f32 %v1589_v44, %v1497_v51  ;;  %v6532_v42 = vadd.f32 %v1589_v44, %v1493_v57  ;;  %v6534_v58 = vadd.f32 %v1589_v44, %v1499_v61  ;;  %v6536_v35 = vadd.f32 %v1589_v44, %v1495_v31 }
 0x550   :  { %v6538_v21 = vadd.f32 %v1593_v56, %v1498_v0  ;;  %v6540_v53 = vadd.f32 %v1593_v56, %v1494_v7  ;;  %v6542_v30 = vadd.f32 %v1593_v56, %v1500_v25  ;;  %v6544_v16 = vadd.f32 %v1593_v56, %v1496_v8 }
 0x551   :  { %v1616_v9 = vmax.f32 %v6530_v1, 0.0  ;;  %v1612_v55 = vmax.f32 %v6532_v42, 0.0  ;;  %v1618_v3 = vmax.f32 %v6534_v58, 0.0  ;;  %v1614_v27 = vmax.f32 %v6536_v35, 0.0 }
 0x552   :  { %v1617_v34 = vmax.f32 %v6538_v21, 0.0  ;;  %v1613_v45 = vmax.f32 %v6540_v53, 0.0  ;;  %v6555_v43 = vadd.f32 %v1589_v44, %v1503_v63  ;;  %v6557_v12 = vadd.f32 %v1593_v56, %v1504_v24 }
 0x553   :  { %v6559_v4 = vadd.f32 %v1589_v44, %v1501_v32  ;;  %v6561_v29 = vadd.f32 %v1593_v56, %v1502_v33  ;;  %v1619_v18 = vmax.f32 %v6542_v30, 0.0  ;;  %v1615_v51 = vmax.f32 %v6544_v16, 0.0 }
 0x554   :  { %v5467_v62 = vpack.i.bf16 %v1617_v34, %v1616_v9  ;;  %v5457_v2 = vpack.i.bf16 %v1613_v45, %v1612_v55  ;;  %v1622_v57 = vmax.f32 %v6555_v43, 0.0  ;;  %v1623_v48 = vmax.f32 %v6557_v12, 0.0 }
 0x555   :  { %v6577_v0 = vadd.f32 %v1589_v44, %v1507_v26  ;;  %v6579_v7 = vadd.f32 %v1593_v56, %v1508_v47  ;;  %v1505_v61 = vmul.f32 %v1488_v39, %v6414_v20  ;;  %v7703_v31 = vmax.f32 %v6559_v4, 0.0  ;;  %v5553_v47 = vld [vmem:[%s7731_s3 + $0x78] sm:$0xff]  }
 0x556   :  { %5468 = vrot.lane.b32.xlu1 %v5467_v62, %s5669_s22  ;;  %5458 = vrot.lane.b32.xlu0 %v5457_v2, %s5669_s22  ;;  %v1621_v50 = vmax.f32 %v6561_v29, 0.0  ;;  %v1506_v25 = vmul.f32 %v1492_v36, %v6372_v37  ;;  %v1509_v8 = vmul.f32 %v1488_v39, %v6420_v41  ;;  %v5472_v63 = vpack.i.bf16 %v1619_v18, %v1618_v3  ;;  %v5552_v37 = vld [vmem:[%s7731_s3 + $0x70] sm:$0xff]  }
 0x557   :  { %v5462_v24 = vpack.i.bf16 %v1615_v51, %v1614_v27  ;;  %v6594_v32 = vadd.f32 %v1589_v44, %v1505_v61  ;;  %v1510_v20 = vmul.f32 %v1492_v36, %v6378_v17  ;;  %v5482_v59 = vpack.i.bf16 %v1623_v48, %v1622_v57  ;;  %1973 = vmatpush1.bf16.msra.mxu1 %v5552_v37 }
 0x558   :  { %v6600_v33 = vadd.f32 %v1593_v56, %v1506_v25  ;;  %v6602_v41 = vadd.f32 %v1589_v44, %v1509_v8  ;;  %v5477_v17 = vpack.i.bf16 %v1621_v50, %v7703_v31  ;;  %v7701_v36 = vmax.f32 %v6577_v0, 0.0  ;;  %1974 = vmatprep.subr.bf16.mxu1 %v7730_v15  ;;  %v5554_v8 = vld [vmem:[%s7731_s3 + $0x80] sm:$0xff]  }
 0x559   :  { %v6606_v39 = vadd.f32 %v1593_v56, %v1510_v20  ;;  %v7702_v44 = vmax.f32 %v6579_v7, 0.0  ;;  %v7698_v26 = vmax.f32 %v6594_v32, 0.0  ;;  %v5670_v20 = vmov 65535  }
 0x55a   :  { %5473 = vrot.lane.b32.xlu1 %v5472_v63, %s5669_s22  ;;  %5463 = vrot.lane.b32.xlu0 %v5462_v24, %s5669_s22  ;;  %v7700_v56 = vmax.f32 %v6600_v33, 0.0  ;;  %v7697_v61 = vmax.f32 %v6602_v41, 0.0  ;;  %v5555_v24 = vld [vmem:[%s7731_s3 + $0x88] sm:$0xff]   ;;  %v1957_v37 = vsel %vm371_vm3, 4294967295, %v5670_v20  ;;  %v7733_v29 = vmax.f32 %v6579_v7, 0.0 }
 0x55b   :  { %v5492_v62 = vpack.i.bf16 %v7702_v44, %v7701_v36  ;;  %v7699_v25 = vmax.f32 %v6606_v39, 0.0  ;;  %1975 = vmatpush1.bf16.msra.mxu1 %v5553_v47 }
 0x55c   :  { %v5487_v2 = vpack.i.bf16 %v7700_v56, %v7698_v26  ;;  %1976 = vmatprep.subr.bf16.mxu1 %v7730_v15 }
 0x55d   :  { %v5497_v63 = vpack.i.bf16 %v7699_v25, %v7697_v61 }
 0x55e   :  { %5483 = vrot.lane.b32.xlu1 %v5482_v59, %s5669_s22  ;;  %5478 = vrot.lane.b32.xlu0 %v5477_v17, %s5669_s22  ;;  %v6651_v59 = vsel %vm1956_vm15, %v1957_v37, 0  ;;  %vm2696_vm15 = vcmp.lt.s32.totalorder %v6202_v11, 16  ;;  %v2740_v11 = vand.u32 1, %v6131_v10  ;;  %v7758_v10 = vld [vmem:[#allocation5_spill] sm:$0xff] }
 0x55f   :  { %1977 = vmatpush1.bf16.msra.mxu1 %v5554_v8  ;;  %v1960_v17 = vand.u32 %v5555_v24, %v6651_v59 }
 0x560   :  { %1978 = vmatprep.subr.bf16.mxu1 %v7730_v15 }
 0x562   :  { %5493 = vrot.lane.b32.xlu1 %v5492_v62, %s5669_s22  ;;  %5488 = vrot.lane.b32.xlu0 %v5487_v2, %s5669_s22 }
 0x563   :  { %1979 = vmatpush1.bf16.msra.mxu1 %v1960_v17 }
 0x564   :  { %2095 = vmatprep.subr.bf16.mxu1 %v7730_v15 }
 0x566   :  { %5498 = vrot.lane.b32.xlu0 %v5497_v63, %s5669_s22 }
 0x5c8   :  { %v5469_v47 = vpop.permute.xlu1 %5468  ;;  %v5459_v62 = vpop.permute.xlu0 %5458 }
 0x5c9   :  { %v5471_v2 = vunpack.i.h.bf16 %v5469_v47  ;;  %v5470_v8 = vunpack.i.l.bf16 %v5469_v47  ;;  %v5461_v23 = vunpack.i.h.bf16 %v5459_v62  ;;  %v5460_v61 = vunpack.i.l.bf16 %v5459_v62 }
 0x5cb   :  { %v1717_v20 = vmax.f32 %v1617_v34, %v5471_v2  ;;  %v1687_v37 = vsel %vm7714_vm1, %v5470_v8, %v5471_v2  ;;  %v6661_v63 = vmax.f32 %v1613_v45, %v5461_v23  ;;  %v1685_v24 = vsel %vm7714_vm1, %v5460_v61, %v5461_v23 }
 0x5cc   :  { %v1716_v17 = vmax.f32 %v1616_v9, %v1687_v37  ;;  %v5474_v26 = vpop.permute.xlu1 %5473  ;;  %v5464_v25 = vpop.permute.xlu0 %5463  ;;  %v1712_v62 = vmax.f32 %v1612_v55, %v1685_v24 }
 0x5cd   :  { %v5476_v56 = vunpack.i.h.bf16 %v5474_v26  ;;  %v5475_v47 = vunpack.i.l.bf16 %v5474_v26  ;;  %v5466_v21 = vunpack.i.h.bf16 %v5464_v25  ;;  %v5465_v34 = vunpack.i.l.bf16 %v5464_v25 }
 0x5ce   :  { %v1757_v36 = vrot.slane %v1717_v20, 1  ;;  %v1752_v2 = vrot.slane %v6661_v63, 1  ;;  %v1755_v45 = vrot.slane %v1716_v17, 1 }
 0x5cf   :  { %v1719_v53 = vmax.f32 %v1619_v18, %v5476_v56  ;;  %v1688_v23 = vsel %vm7714_vm1, %v5475_v47, %v5476_v56  ;;  %v1715_v9 = vmax.f32 %v1615_v51, %v5466_v21  ;;  %v1686_v42 = vsel %vm7714_vm1, %v5465_v34, %v5466_v21 }
 0x5d0   :  { %v1718_v1 = vmax.f32 %v1618_v3, %v1688_v23  ;;  %v5484_v55 = vpop.permute.xlu1 %5483  ;;  %v5479_v26 = vpop.permute.xlu0 %5478  ;;  %v1714_v25 = vmax.f32 %v1614_v27, %v1686_v42  ;;  %v1749_v18 = vrot.slane %v1712_v62, 1 }
 0x5d1   :  { %v1761_v61 = vrot.slane %v1719_v53, 1  ;;  %v5486_v8 = vunpack.i.h.bf16 %v5484_v55  ;;  %v5485_v30 = vunpack.i.l.bf16 %v5484_v55  ;;  %v1753_v56 = vrot.slane %v1715_v9, 1 }
 0x5d2   :  { %v1759_v37 = vrot.slane %v1718_v1, 1  ;;  %v5481_v24 = vunpack.i.h.bf16 %v5479_v26  ;;  %v1750_v3 = vrot.slane %v1714_v25, 1  ;;  %v5480_v51 = vunpack.i.l.bf16 %v5479_v26 }
 0x5d3   :  { %v1762_v58 = vsel %vm371_vm3, %v1757_v36, %v1761_v61  ;;  %v1723_v16 = vmax.f32 %v1623_v48, %v5486_v8  ;;  %v1758_v21 = vsel %vm371_vm3, %v1753_v56, %v1757_v36  ;;  %v1754_v35 = vsel %vm371_vm3, %v1752_v2, %v1753_v56 }
 0x5d4   :  { %v1760_v47 = vsel %vm371_vm3, %v1755_v45, %v1759_v37  ;;  %v1690_v27 = vsel %vm7714_vm1, %v5485_v30, %v5486_v8  ;;  %v5494_v34 = vpop.permute.xlu1 %5493  ;;  %v5489_v23 = vpop.permute.xlu0 %5488  ;;  %v6688_v55 = vmax.f32 %v1715_v9, %v1758_v21  ;;  %v1751_v44 = vsel %vm371_vm3, %v1749_v18, %v1750_v3 }
 0x5d5   :  { %v6686_v42 = vmax.f32 %v1716_v17, %v1760_v47  ;;  %v1756_v12 = vsel %vm371_vm3, %v1750_v3, %v1755_v45  ;;  %v1801_v48 = vmax.f32 %v1712_v62, %v1751_v44  ;;  %v1802_v26 = vmax.f32 %v6661_v63, %v1754_v35 }
 0x5d6   :  { %v6693_v31 = vmax.f32 %v1714_v25, %v1756_v12  ;;  %v1769_v36 = vrot.slane %v1723_v16, 1  ;;  %v1722_v2 = vmax.f32 %v1622_v57, %v1690_v27  ;;  %v1721_v8 = vmax.f32 %v1621_v50, %v5481_v24 }
 0x5d7   :  { %v1689_v17 = vsel %vm7714_vm1, %v5480_v51, %v5481_v24  ;;  %v5496_v9 = vunpack.i.h.bf16 %v5494_v34  ;;  %v6700_v30 = vmax.f32 %v1717_v20, %v1762_v58  ;;  %v7732_v63 = vmax.f32 %v6559_v4, 0.0 }
 0x5d8   :  { %v6703_v18 = vpack.c.bf16 %v6693_v31, %v1801_v48  ;;  %v5499_v45 = vpop.permute.xlu0 %5498  ;;  %v1767_v43 = vrot.slane %v1722_v2, 1  ;;  %v1765_v57 = vrot.slane %v1721_v8, 1  ;;  %v5495_v25 = vunpack.i.l.bf16 %v5494_v34 }
 0x5d9   :  { %v1720_v62 = vmax.f32 %v7732_v63, %v1689_v17  ;;  %v1727_v50 = vmax.f32 %v7733_v29, %v5496_v9  ;;  %v5491_v24 = vunpack.i.h.bf16 %v5489_v23  ;;  %v5490_v20 = vunpack.i.l.bf16 %v5489_v23 }
 0x5da   :  { %v5501_v58 = vunpack.i.h.bf16 %v5499_v45  ;;  %v6712_v3 = vpack.c.bf16 %v6688_v55, %v1802_v26  ;;  %v1766_v51 = vsel %vm371_vm3, %v1761_v61, %v1765_v57  ;;  %v1770_v47 = vsel %vm371_vm3, %v1765_v57, %v1769_v36 }
 0x5db   :  { %v1763_v56 = vrot.slane %v1720_v62, 1  ;;  %v1692_v4 = vsel %vm7714_vm1, %v5495_v25, %v5496_v9  ;;  %v6717_v21 = vmax.f32 %v1719_v53, %v1766_v51  ;;  %v6719_v35 = vmax.f32 %v1721_v8, %v1770_v47 }
 0x5dc   :  { %v1777_v27 = vrot.slane %v1727_v50, 1  ;;  %v7734_v12 = vmax.f32 %v6577_v0, 0.0  ;;  %v7735_v61 = vmax.f32 %v6600_v33, 0.0  ;;  %v1691_v53 = vsel %vm7714_vm1, %v5490_v20, %v5491_v24 }
 0x5dd   :  { %v1764_v7 = vsel %vm371_vm3, %v1759_v37, %v1763_v56  ;;  %v1768_v34 = vsel %vm371_vm3, %v1763_v56, %v1767_v43  ;;  %v6731_v17 = vpack.c.bf16 %v6717_v21, %v6700_v30  ;;  %v7736_v8 = vmax.f32 %v6606_v39, 0.0 }
 0x5de   :  { %v6723_v23 = vmax.f32 %v1718_v1, %v1764_v7  ;;  %v1726_v48 = vmax.f32 %v7734_v12, %v1692_v4  ;;  %v1725_v26 = vmax.f32 %v7735_v61, %v5491_v24  ;;  %v5500_v9 = vunpack.i.l.bf16 %v5499_v45 }
 0x5df   :  { %v1729_v37 = vmax.f32 %v7736_v8, %v5501_v58  ;;  %v7737_v1 = vmax.f32 %v6594_v32, 0.0  ;;  %v1875_v0 = vrot.slane %v6712_v3, 1  ;;  %v1876_v56 = vrot.slane %v6731_v17, 1 }
 0x5e0   :  { %v1775_v63 = vrot.slane %v1726_v48, 1  ;;  %v1773_v57 = vrot.slane %v1725_v26, 1  ;;  %v1693_v33 = vsel %vm7714_vm1, %v5500_v9, %v5501_v58  ;;  %v6743_v51 = vpack.c.bf16 %v6723_v23, %v6686_v42 }
 0x5e1   :  { %v1724_v29 = vmax.f32 %v7737_v1, %v1691_v53  ;;  %v1781_v25 = vrot.slane %v1729_v37, 1  ;;  %v7738_v20 = vmax.f32 %v6602_v41, 0.0  ;;  %v6763_v8 = vmax.f32 %v1720_v62, %v1768_v34  ;;  %v5556_v34 = vld [vmem:[%s7731_s3] sm:$0xff]  }
 0x5e2   :  { %v1774_v39 = vsel %vm371_vm3, %v1769_v36, %v1773_v57  ;;  %v1778_v45 = vsel %vm371_vm3, %v1773_v57, %v1777_v27  ;;  %v2182_v1 = vrot.slane %v6712_v3, 2  ;;  %v2362_v44 = vrot.slane %v6703_v18, 3 }
 0x5e3   :  { %v1771_v24 = vrot.slane %v1724_v29, 1  ;;  %v6749_v32 = vmax.f32 %v7738_v20, %v1693_v33  ;;  %v6751_v47 = vmax.f32 %v1723_v16, %v1774_v39  ;;  %v6753_v4 = vmax.f32 %v1725_v26, %v1778_v45 }
 0x5e4   :  { %v1782_v58 = vsel %vm371_vm3, %v1777_v27, %v1781_v25  ;;  %v6756_v7 = vmax.f32 %v1729_v37, %v1781_v25  ;;  %v1872_v37 = vrot.slane %v6703_v18, 1  ;;  %v2179_v33 = vrot.slane %v6703_v18, 2 }
 0x5e5   :  { %v1772_v12 = vsel %vm371_vm3, %v1767_v43, %v1771_v24  ;;  %v1776_v61 = vsel %vm371_vm3, %v1771_v24, %v1775_v63  ;;  %v6760_v36 = vmax.f32 %v1727_v50, %v1782_v58  ;;  %v1779_v53 = vrot.slane %v6749_v32, 1 }
 0x5e6   :  { %v6765_v41 = vmax.f32 %v1722_v2, %v1772_v12  ;;  %v6767_v16 = vmax.f32 %v1724_v29, %v1776_v61  ;;  %v6771_v26 = vpack.c.bf16 %v6751_v47, %v6719_v35  ;;  %v1877_v50 = vsel %vm371_vm3, %v1875_v0, %v1876_v56 }
 0x5e7   :  { %v1780_v27 = vsel %vm371_vm3, %v1775_v63, %v1779_v53  ;;  %v6776_v43 = vpack.c.bf16 %v6760_v36, %v6753_v4  ;;  %4470 = vmatprep.mubr.msk.bf16.mxu1 %vm1943_vm8, %v1877_v50  ;;  %v1873_v2 = vrot.slane %v6743_v51, 1  ;;  %v2180_v24 = vrot.slane %v6743_v51, 2 }
 0x5e8   :  { %v6780_v62 = vmax.f32 %v1726_v48, %v1780_v27  ;;  %v1880_v9 = vrot.slane %v6771_v26, 1  ;;  %v6790_v63 = vpack.c.bf16 %v6765_v41, %v6763_v8  ;;  %v2183_v48 = vrot.slane %v6731_v17, 2 }
 0x5e9   :  { %v7705_v57 = vrot.slane %v6776_v43, 1  ;;  %v1874_v29 = vsel %vm371_vm3, %v1872_v37, %v1873_v2  ;;  %v2187_v20 = vrot.slane %v6771_v26, 2  ;;  %v2339_v58 = vpack.c.bf16 %v6756_v7, %v6756_v7 }
 0x5ea   :  { %v1881_v0 = vsel %vm371_vm3, %v1876_v56, %v1880_v9  ;;  %v6799_v25 = vpack.c.bf16 %v6780_v62, %v6767_v16  ;;  %1995 = vmatmul.mubr.bf16.vlgmr.msra.gmra.mrb[12].mxu1 %v1874_v29  ;;  %v1878_v39 = vrot.slane %v6790_v63, 1  ;;  %v6804_v45 = vsel %vm158_vm0, %v2182_v1, %v2183_v48  ;;  %v5557_v56 = vld [vmem:[%s7731_s3 + $0x8] sm:$0xff]  }
 0x5eb   :  { %2096 = vmatpush1.bf16.msra.mxu1 %v5556_v34  ;;  %4471 = vmatprep.mubr.msk.bf16.mxu1 %vm1943_vm8, %v1881_v0  ;;  %v2185_v12 = vrot.slane %v6790_v63, 2  ;;  %v7704_v61 = vrot.slane %v6776_v43, 2  ;;  %v1885_v27 = vsel %vm371_vm3, %v1880_v9, %v7705_v57  ;;  %v6821_v50 = vsel %vm158_vm0, %v2179_v33, %v2180_v24 }
 0x5ec   :  { %2097 = vmatprep.subr.bf16.mxu1 %v7730_v15  ;;  %v6824_v37 = vsel %vm158_vm0, %v2183_v48, %v2187_v20  ;;  %v7708_v34 = vrot.slane %v6799_v25, 2  ;;  %v2365_v0 = vrot.slane %v6712_v3, 3  ;;  %v2366_v9 = vrot.slane %v6731_v17, 3 }
 0x5ed   :  { %v6828_v1 = vsel %vm158_vm0, %v2180_v24, %v2185_v12  ;;  %v6833_v29 = vsel %vm158_vm0, %v2187_v20, %v7704_v61  ;;  %v1879_v33 = vsel %vm371_vm3, %v1873_v2, %v1878_v39  ;;  %v2363_v24 = vrot.slane %v6743_v51, 3  ;;  %v5558_v20 = vld [vmem:[%s7731_s3 + $0x10] sm:$0xff]  }
 0x5ee   :  { %v6841_v48 = vsel %vm158_vm0, %v2185_v12, %v7708_v34  ;;  %v6849_v61 = vsel %vm2361_vm11, %v2365_v0, %v2366_v9  ;;  %v2370_v57 = vrot.slane %v6771_v26, 3  ;;  %v2368_v2 = vrot.slane %v6790_v63, 3 }
 0x5ef   :  { %2098 = vmatpush1.bf16.msra.mxu1 %v5557_v56  ;;  %v2374_v40 = vrot.slane %v6776_v43, 3  ;;  %v6856_v12 = vsel %vm2361_vm11, %v2362_v44, %v2363_v24  ;;  %v2372_v56 = vrot.slane %v6799_v25, 3  ;;  %v2378_v34 = vrot.slane %v2339_v58, 3 }
 0x5f0   :  { %2099 = vmatprep.subr.bf16.mxu1 %v7730_v15  ;;  %v6860_v38 = vmax.f32 %v6749_v32, %v1779_v53  ;;  %v6863_v0 = vsel %vm2361_vm11, %v2366_v9, %v2370_v57  ;;  %v6866_v28 = vsel %vm2361_vm11, %v2363_v24, %v2368_v2  ;;  %v2526_v46 = vpack.c.bf16 %v6700_v30, %v6688_v55 }
 0x5f1   :  { %v6869_v60 = vsel %vm2361_vm11, %v2370_v57, %v2374_v40  ;;  %v6874_v44 = vsel %vm2361_vm11, %v2368_v2, %v2372_v56  ;;  %v6877_v58 = vsel %vm2361_vm11, %v2374_v40, %v2378_v34  ;;  %v2528_v53 = vpack.c.bf16 %v6719_v35, %v6717_v21  ;;  %v5559_v57 = vld [vmem:[%s7731_s3 + $0x18] sm:$0xff]   ;;  %v5560_v40 = vld [vmem:[%s7731_s3 + $0x20] sm:$0xff]   ;;  %v2815_v21 = vld [vmem:[%s7676_s9 + $0x10] sm:$0xff] }
 0x5f2   :  { %2003 = vmatmul.mubr.bf16.gmra.mrb[16].mxu1 %v1879_v33  ;;  %v2338_v32 = vpack.c.bf16 %v6860_v38, %v6860_v38  ;;  %v2527_v9 = vpack.c.bf16 %v6763_v8, %v6723_v23  ;;  %v2529_v34 = vpack.c.bf16 %v6767_v16, %v6765_v41  ;;  %v7739_v24 = vrot.slane %v6776_v43, 1  ;;  %v2817_v23 = vld [vmem:[%s7676_s9 + $0x20] sm:$0xff]  ;;  %v2822_v16 = vld [vmem:[%s7676_s9 + $0x48] sm:$0xff] }
 0x5f3   :  { %2100 = vmatpush1.bf16.msra.mxu1 %v5558_v20  ;;  %4472 = vmatprep.mubr.msk.bf16.mxu1 %vm1943_vm8, %v1885_v27  ;;  %v2531_v27 = vpack.c.bf16 %v6860_v38, %v6780_v62  ;;  %v1882_v20 = vrot.slane %v6799_v25, 1  ;;  %v7744_v55 = vpack.c.bf16 %v6753_v4, %v6751_v47  ;;  %v2816_v38 = vld [vmem:[%s7676_s9 + $0x18] sm:$0xff]  ;;  %v2818_v47 = vld [vmem:[%s7676_s9 + $0x28] sm:$0xff]  ;;  %v2821_v41 = vld [vmem:[%s7676_s9 + $0x40] sm:$0xff]  ;;  %vm2845_vm1 = vcmask 1042432  }
 0x5f4   :  { %2101 = vmatprep.subr.bf16.mxu1 %v7730_v15  ;;  %v2376_v33 = vrot.slane %v2338_v32, 3  ;;  %v7121_v35 = vpack.c.bf16 %v2816_v38, %v2815_v21  ;;  %v7130_v4 = vpack.c.bf16 %v2818_v47, %v2817_v23  ;;  %v7151_v62 = vpack.c.bf16 %v2822_v16, %v2821_v41  ;;  %v7762_v38 = vld [vmem:[#allocation9_spill] sm:$0xff]  ;;  %v7763_v47 = vld [vmem:[#allocation10_spill] sm:$0xff] }
 0x5f5   :  { %v1883_v32 = vsel %vm371_vm3, %v1878_v39, %v1882_v20  ;;  %v5563_v39 = vld [vmem:[%s7731_s3 + $0x38] sm:$0xff]   ;;  %vm5671_vm3 = vmmov 0  }
 0x5f6   :  { %v6900_v2 = vsel %vm2361_vm11, %v2372_v56, %v2376_v33  ;;  %v5561_v56 = vld [vmem:[%s7731_s3 + $0x28] sm:$0xff]  }
 0x5f7   :  { %2102 = vmatpush1.bf16.msra.mxu1 %v5559_v57  ;;  %v5562_v57 = vld [vmem:[%s7731_s3 + $0x30] sm:$0xff]  }
 0x5f8   :  { %2103 = vmatprep.subr.bf16.mxu1 %v7730_v15 }
 0x5fa   :  { %2011 = vmatmul.mubr.bf16.gmra.mrb[20].mxu1 %v1883_v32  ;;  %v5573_v32 = vld [vmem:[%s7731_s3 + $0xd0] sm:$0xff]  }
 0x5fb   :  { %2104 = vmatpush1.bf16.msra.mxu1 %v5560_v40  ;;  %4473 = vmatprep.mubr.msk.bf16.mxu1 %vm1943_vm8, %v7739_v24  ;;  %v5564_v40 = vld [vmem:[%s7731_s3 + $0x40] sm:$0xff]   ;;  %v5566_v24 = vld [vmem:[%s7731_s3 + $0x98] sm:$0xff]  }
 0x5fc   :  { %2105 = vmatprep.subr.bf16.mxu1 %v7730_v15  ;;  %v2093_v33 = vand.u32 %v5564_v40, %v6651_v59  ;;  %v5580_v40 = vld [vmem:[%s7731_s3 + $0x108] sm:$0xff]  }
 0x5ff   :  { %2106 = vmatpush1.bf16.msra.mxu1 %v5561_v56  ;;  %v2263_v56 = vand.u32 %v5573_v32, %v6651_v59  ;;  %v2705_v32 = vand.u32 1, %v6098_v5 }
 0x600   :  { %2107 = vmatprep.subr.bf16.mxu1 %v7730_v15 }
 0x601   :  { %vm2797_vm9 = vcmp.eq.s32.totalorder %v2705_v32, 0 }
 0x602   :  { %2019 = vmatmul.mubr.bf16.gmra.mrb[24].mxu1 %v1882_v20  ;;  %v5567_v20 = vld [vmem:[%s7731_s3 + $0xa0] sm:$0xff]   ;;  %vm7193_vm7 = vmand %vm2693_vm4, %vm2797_vm9 }
 0x603   :  { %2108 = vmatpush1.bf16.msra.mxu1 %v5562_v57  ;;  %4483 = vmatprep.mubr.msk.bf16.mxu1 %vm1943_vm8, %v6712_v3  ;;  %v5565_v3 = vld [vmem:[%s7731_s3 + $0x90] sm:$0xff]   ;;  %v5575_v57 = vld [vmem:[%s7731_s3 + $0xe0] sm:$0xff]  }
 0x604   :  { %2109 = vmatprep.subr.bf16.mxu1 %v7730_v15 }
 0x607   :  { %2110 = vmatpush1.bf16.msra.mxu1 %v5563_v39  ;;  %v5576_v39 = vld [vmem:[%s7731_s3 + $0xe8] sm:$0xff]  }
 0x608   :  { %2111 = vmatprep.subr.bf16.mxu1 %v7730_v15 }
 0x60b   :  { %2112 = vmatpush1.bf16.msra.mxu1 %v2093_v33  ;;  %v5582_v33 = vld [vmem:[%s7731_s3 + $0x118] sm:$0xff]  }
 0x60c   :  { %2265 = vmatprep.subr.bf16.mxu1 %v7730_v15 }
 0x60e   :  { %2128 = vmatmul.mubr.bf16.vlgmr.msra.gmra.mrb[12].mxu1 %v6703_v18  ;;  %v5568_v18 = vld [vmem:[%s7731_s3 + $0xa8] sm:$0xff]  }
 0x60f   :  { %4484 = vmatprep.mubr.msk.bf16.mxu1 %vm1943_vm8, %v6731_v17  ;;  %2266 = vmatpush1.bf16.msra.mxu1 %v5565_v3  ;;  %v5569_v17 = vld [vmem:[%s7731_s3 + $0xb0] sm:$0xff]   ;;  %v2450_v3 = vand.u32 %v5582_v33, %v6651_v59 }
 0x610   :  { %2267 = vmatprep.subr.bf16.mxu1 %v7730_v15 }
 0x613   :  { %2268 = vmatpush1.bf16.msra.mxu1 %v5566_v24  ;;  %v5585_v24 = vld [vmem:[%s7731_s3 + $0x130] sm:$0xff]  }
 0x614   :  { %2269 = vmatprep.subr.bf16.mxu1 %v7730_v15 }
 0x616   :  { %2136 = vmatmul.mubr.bf16.gmra.mrb[16].mxu1 %v6743_v51  ;;  %v5570_v51 = vld [vmem:[%s7731_s3 + $0xb8] sm:$0xff]  }
 0x617   :  { %4485 = vmatprep.mubr.msk.bf16.mxu1 %vm1943_vm8, %v6771_v26  ;;  %2270 = vmatpush1.bf16.msra.mxu1 %v5567_v20  ;;  %v5571_v26 = vld [vmem:[%s7731_s3 + $0xc0] sm:$0xff]  }
 0x618   :  { %2271 = vmatprep.subr.bf16.mxu1 %v7730_v15 }
 0x61b   :  { %2272 = vmatpush1.bf16.msra.mxu1 %v5568_v18  ;;  %v2826_v18 = vld [vmem:[%s7676_s9 + $0x68] sm:$0xff] }
 0x61c   :  { %2273 = vmatprep.subr.bf16.mxu1 %v7730_v15 }
 0x61e   :  { %2144 = vmatmul.mubr.bf16.gmra.mrb[20].mxu1 %v6790_v63  ;;  %v5572_v63 = vld [vmem:[%s7731_s3 + $0xc8] sm:$0xff]  }
 0x61f   :  { %4486 = vmatprep.mubr.msk.bf16.mxu1 %vm1943_vm8, %v6776_v43  ;;  %2274 = vmatpush1.bf16.msra.mxu1 %v5569_v17 }
 0x620   :  { %2275 = vmatprep.subr.bf16.mxu1 %v7730_v15 }
 0x623   :  { %2276 = vmatpush1.bf16.msra.mxu1 %v5570_v51  ;;  %v2827_v51 = vld [vmem:[%s7676_s9 + $0x70] sm:$0xff] }
 0x624   :  { %2277 = vmatprep.subr.bf16.mxu1 %v7730_v15 }
 0x626   :  { %2152 = vmatmul.mubr.bf16.gmra.mrb[24].mxu1 %v6799_v25 }
 0x627   :  { %2278 = vmatpush1.bf16.msra.mxu1 %v5571_v26  ;;  %4514 = vmatprep.mubr.msk.bf16.mxu1 %vm1943_vm8, %v6804_v45  ;;  %v5574_v45 = vld [vmem:[%s7731_s3 + $0xd8] sm:$0xff]  }
 0x628   :  { %2279 = vmatprep.subr.bf16.mxu1 %v7730_v15  ;;  %v2828_v26 = vld [vmem:[%s7676_s9 + $0x78] sm:$0xff] }
 0x62b   :  { %2280 = vmatpush1.bf16.msra.mxu1 %v5572_v63  ;;  %v7184_v63 = vpack.c.bf16 %v2828_v26, %v2827_v51 }
 0x62c   :  { %2281 = vmatprep.subr.bf16.mxu1 %v7730_v15 }
 0x62f   :  { %2282 = vmatpush1.bf16.msra.mxu1 %v2263_v56  ;;  %v2712_v56 = vand.u32 1, %v6101_v6  ;;  %v2726_v6 = vand.u32 1, %v6115_v14 }
 0x630   :  { %2452 = vmatprep.subr.bf16.mxu1 %v7730_v15 }
 0x631   :  { %vm2798_vm6 = vcmp.eq.s32.totalorder %v2712_v56, 0 }
 0x632   :  { %2298 = vmatmul.mubr.bf16.vlgmr.msra.gmra.mrb[12].mxu1 %v6821_v50  ;;  %v5577_v50 = vld [vmem:[%s7731_s3 + $0xf0] sm:$0xff]   ;;  %vm7200_vm10 = vmand %vm2694_vm2, %vm2798_vm6 }
 0x633   :  { %4515 = vmatprep.mubr.msk.bf16.mxu1 %vm1943_vm8, %v6824_v37  ;;  %2453 = vmatpush1.bf16.msra.mxu1 %v5574_v45  ;;  %v5578_v37 = vld [vmem:[%s7731_s3 + $0xf8] sm:$0xff]  }
 0x634   :  { %2454 = vmatprep.subr.bf16.mxu1 %v7730_v15 }
 0x637   :  { %2455 = vmatpush1.bf16.msra.mxu1 %v5575_v57  ;;  %v2719_v57 = vand.u32 1, %v6112_v13 }
 0x638   :  { %2456 = vmatprep.subr.bf16.mxu1 %v7730_v15 }
 0x639   :  { %vm2799_vm14 = vcmp.eq.s32.totalorder %v2719_v57, 0 }
 0x63a   :  { %2306 = vmatmul.mubr.bf16.gmra.mrb[16].mxu1 %v6828_v1  ;;  %v7740_v1 = vrot.slane %v6776_v43, 2  ;;  %v5581_v43 = vld [vmem:[%s7731_s3 + $0x110] sm:$0xff]   ;;  %vm7215_vm11 = vmand %vm2695_vm13, %vm2799_vm14  ;;  %vm2802_vm13 = vcmp.eq.s32.totalorder %v2740_v11, 0 }
 0x63b   :  { %4516 = vmatprep.mubr.msk.bf16.mxu1 %vm1943_vm8, %v6833_v29  ;;  %2457 = vmatpush1.bf16.msra.mxu1 %v5576_v39  ;;  %v5579_v29 = vld [vmem:[%s7731_s3 + $0x100] sm:$0xff]  }
 0x63c   :  { %2458 = vmatprep.subr.bf16.mxu1 %v7730_v15 }
 0x63f   :  { %2459 = vmatpush1.bf16.msra.mxu1 %v5577_v50 }
 0x640   :  { %2460 = vmatprep.subr.bf16.mxu1 %v7730_v15 }
 0x642   :  { %2314 = vmatmul.mubr.bf16.gmra.mrb[20].mxu1 %v6841_v48  ;;  %v7741_v48 = vrot.slane %v6799_v25, 2  ;;  %v5583_v25 = vld [vmem:[%s7731_s3 + $0x120] sm:$0xff]  }
 0x643   :  { %4517 = vmatprep.mubr.msk.bf16.mxu1 %vm1943_vm8, %v7740_v1  ;;  %2461 = vmatpush1.bf16.msra.mxu1 %v5578_v37 }
 0x644   :  { %2462 = vmatprep.subr.bf16.mxu1 %v7730_v15 }
 0x647   :  { %2463 = vmatpush1.bf16.msra.mxu1 %v5579_v29  ;;  %v2733_v29 = vand.u32 1, %v6128_v22 }
 0x648   :  { %2464 = vmatprep.subr.bf16.mxu1 %v7730_v15 }
 0x649   :  { %vm2801_vm2 = vcmp.eq.s32.totalorder %v2733_v29, 0 }
 0x64a   :  { %2322 = vmatmul.mubr.bf16.gmra.mrb[24].mxu1 %v7741_v48 }
 0x64b   :  { %2465 = vmatpush1.bf16.msra.mxu1 %v5580_v40  ;;  %4545 = vmatprep.mubr.msk.bf16.mxu1 %vm1943_vm8, %v6849_v61  ;;  %v5584_v61 = vld [vmem:[%s7731_s3 + $0x128] sm:$0xff]  }
 0x64c   :  { %2466 = vmatprep.subr.bf16.mxu1 %v7730_v15 }
 0x64f   :  { %2467 = vmatpush1.bf16.msra.mxu1 %v5581_v43 }
 0x650   :  { %2468 = vmatprep.subr.bf16.mxu1 %v7730_v15 }
 0x653   :  { %2469 = vmatpush1.bf16.msra.mxu1 %v2450_v3 }
 0x654   :  { %2620 = vmatprep.subr.bf16.mxu1 %v7730_v15 }
 0x656   :  { %2485 = vmatmul.mubr.bf16.vlgmr.msra.gmra.mrb[12].mxu1 %v6856_v12  ;;  %v5586_v12 = vld [vmem:[%s7731_s3 + $0x138] sm:$0xff]  }
 0x657   :  { %4546 = vmatprep.mubr.msk.bf16.mxu1 %vm1943_vm8, %v6863_v0  ;;  %2621 = vmatpush1.bf16.msra.mxu1 %v5583_v25  ;;  %v5587_v0 = vld [vmem:[%s7731_s3 + $0x140] sm:$0xff]  }
 0x658   :  { %2622 = vmatprep.subr.bf16.mxu1 %v7730_v15 }
 0x65b   :  { %2623 = vmatpush1.bf16.msra.mxu1 %v5584_v61  ;;  %v7754_v61 = vld [vmem:[#allocation7_spill] sm:$0xff] }
 0x65c   :  { %2624 = vmatprep.subr.bf16.mxu1 %v7730_v15  ;;  %vm2697_vm9 = vcmp.lt.s32.totalorder %v7754_v61, 16 }
 0x65d   :  { %vm7237_vm14 = vmand %vm2697_vm9, %vm2801_vm2  ;;  %vm2700_vm2 = vcmp.lt.s32.totalorder %v7763_v47, 16 }
 0x65e   :  { %2493 = vmatmul.mubr.bf16.gmra.mrb[16].mxu1 %v6866_v28  ;;  %v5589_v28 = vld [vmem:[%s7731_s3 + $0x150] sm:$0xff]  }
 0x65f   :  { %4547 = vmatprep.mubr.msk.bf16.mxu1 %vm1943_vm8, %v6869_v60  ;;  %2625 = vmatpush1.bf16.msra.mxu1 %v5585_v24  ;;  %v5588_v60 = vld [vmem:[%s7731_s3 + $0x148] sm:$0xff]  }
 0x660   :  { %2626 = vmatprep.subr.bf16.mxu1 %v7730_v15 }
 0x663   :  { %2627 = vmatpush1.bf16.msra.mxu1 %v5586_v12  ;;  %v7755_v12 = vld [vmem:[#allocation8_spill] sm:$0xff] }
 0x664   :  { %2628 = vmatprep.subr.bf16.mxu1 %v7730_v15  ;;  %vm2698_vm6 = vcmp.lt.s32.totalorder %v7755_v12, 16 }
 0x666   :  { %2501 = vmatmul.mubr.bf16.gmra.mrb[20].mxu1 %v6874_v44  ;;  %v5590_v44 = vld [vmem:[%s7731_s3 + $0x158] sm:$0xff]  }
 0x667   :  { %4548 = vmatprep.mubr.msk.bf16.mxu1 %vm1943_vm8, %v6877_v58  ;;  %2629 = vmatpush1.bf16.msra.mxu1 %v5587_v0  ;;  %v5591_v58 = vld [vmem:[%s7731_s3 + $0x160] sm:$0xff]  }
 0x668   :  { %2630 = vmatprep.subr.bf16.mxu1 %v7730_v15  ;;  %v2618_v20 = vand.u32 %v5591_v58, %v6651_v59 }
 0x66b   :  { %2631 = vmatpush1.bf16.msra.mxu1 %v5588_v60  ;;  %v2747_v60 = vand.u32 1, %v7758_v10 }
 0x66c   :  { %2632 = vmatprep.subr.bf16.mxu1 %v7730_v15 }
 0x66d   :  { %vm2803_vm9 = vcmp.eq.s32.totalorder %v2747_v60, 0 }
 0x66e   :  { %2509 = vmatmul.mubr.bf16.gmra.mrb[24].mxu1 %v6900_v2  ;;  %v7742_v2 = vmov 0.0  }
 0x66f   :  { %2633 = vmatpush1.bf16.msra.mxu1 %v5589_v28  ;;  %4576 = vmatprep.mubr.msk.bf16.mxu1 %vm1943_vm8, %v2526_v46  ;;  %v7743_v46 = vpack.c.bf16 %v6686_v42, %v6693_v31  ;;  %v2813_v31 = vld [vmem:[%s7676_s9] sm:$0xff]  ;;  %v2814_v42 = vld [vmem:[%s7676_s9 + $0x8] sm:$0xff] }
 0x670   :  { %2634 = vmatprep.subr.bf16.mxu1 %v7730_v15  ;;  %v7111_v30 = vpack.c.bf16 %v2814_v42, %v2813_v31  ;;  %4860 = vmatprep.mubr.msk.f32.mxu0 %vm5671_vm3, %v7742_v2 }
 0x672   :  { %5167 = vmatpush3.bf16.msra.mxu0 %v7111_v30 }
 0x673   :  { %2635 = vmatpush1.bf16.msra.mxu1 %v5590_v44  ;;  %5168 = vmatprep.subr.bf16.mxu0 %v7728_v54 }
 0x674   :  { %2636 = vmatprep.subr.bf16.mxu1 %v7730_v15  ;;  %v7745_v15 = vpack.c.bf16 %v6756_v7, %v6760_v36  ;;  %v2819_v7 = vld [vmem:[%s7676_s9 + $0x30] sm:$0xff]  ;;  %v2820_v36 = vld [vmem:[%s7676_s9 + $0x38] sm:$0xff] }
 0x675   :  { %v7141_v8 = vpack.c.bf16 %v2820_v36, %v2819_v7 }
 0x676   :  { %5170 = vmatpush3.bf16.msra.mxu0 %v7121_v35 }
 0x677   :  { %2637 = vmatpush1.bf16.msra.mxu1 %v2618_v20  ;;  %5171 = vmatprep.subr.bf16.mxu0 %v7728_v54 }
 0x678   :  { %4938 = vmatprep.subr.bf16.mxu1 %v7742_v2 }
 0x67a   :  { %2653 = vmatmul.mubr.bf16.vlgmr.msra.gmra.mrb[12].mxu1 %v7743_v46  ;;  %5173 = vmatpush3.bf16.msra.mxu0 %v7130_v4  ;;  %v7761_v46 = vld [vmem:[#allocation6_spill] sm:$0xff] }
 0x67b   :  { %4577 = vmatprep.mubr.msk.bf16.mxu1 %vm1943_vm8, %v2528_v53  ;;  %5174 = vmatprep.subr.bf16.mxu0 %v7728_v54  ;;  %v2823_v53 = vld [vmem:[%s7676_s9 + $0x50] sm:$0xff] }
 0x67e   :  { %5176 = vmatpush3.bf16.msra.mxu0 %v7141_v8 }
 0x67f   :  { %5177 = vmatprep.subr.bf16.mxu0 %v7728_v54 }
 0x682   :  { %2661 = vmatmul.mubr.bf16.gmra.mrb[16].mxu1 %v2527_v9  ;;  %5179 = vmatpush3.bf16.msra.mxu0 %v7151_v62  ;;  %v2824_v9 = vld [vmem:[%s7676_s9 + $0x58] sm:$0xff] }
 0x683   :  { %4578 = vmatprep.mubr.msk.bf16.mxu1 %vm1943_vm8, %v7744_v55  ;;  %5180 = vmatprep.subr.bf16.mxu0 %v7728_v54  ;;  %v2754_v55 = vand.u32 1, %v7761_v46 }
 0x68a   :  { %2669 = vmatmul.mubr.bf16.gmra.mrb[20].mxu1 %v2529_v34  ;;  %v2825_v34 = vld [vmem:[%s7676_s9 + $0x60] sm:$0xff] }
 0x68b   :  { %4579 = vmatprep.mubr.msk.bf16.mxu1 %vm1943_vm8, %v7745_v15  ;;  %v7174_v17 = vpack.c.bf16 %v2826_v18, %v2825_v34  ;;  %vm2800_vm8 = vcmp.eq.s32.totalorder %v2726_v6, 0 }
 0x68c   :  { %vm7222_vm4 = vmand %vm2696_vm15, %vm2800_vm8  ;;  %vm2699_vm8 = vcmp.lt.s32.totalorder %v7762_v38, 16 }
 0x68d   :  { %vm7244_vm15 = vmand %vm2698_vm6, %vm2802_vm13  ;;  %vm2804_vm6 = vcmp.eq.s32.totalorder %v2754_v55, 0 }
 0x68e   :  { %vm7256_vm13 = vmand %vm2699_vm8, %vm2803_vm9  ;;  %vm4302_vm8 = vcmask 687104   ;;  %vm4350_vm9 = vcmask 74752  }
 0x68f   :  { %vm7260_vm12 = vmand %vm2700_vm2, %vm2804_vm6 }
 0x692   :  { %2677 = vmatmul.mubr.bf16.gmra.mrb[24].mxu1 %v2531_v27  ;;  %v7164_v27 = vpack.c.bf16 %v2824_v9, %v2823_v53 }
 0x693   :  { %4954 = vmatprep.mubr.msk.bf16.mxu1 %vm5671_vm3, %v7742_v2 }
 0x694   :  { %5182 = vmatpush3.bf16.msra.mxu0 %v7164_v27 }
 0x695   :  { %5183 = vmatprep.subr.bf16.mxu0 %v7728_v54 }
 0x698   :  { %5185 = vmatpush3.bf16.msra.mxu0 %v7174_v17 }
 0x699   :  { %5186 = vmatprep.subr.bf16.mxu0 %v7728_v54 }
 0x69c   :  { %5188 = vmatpush3.bf16.msra.mxu0 %v7184_v63 }
 0x69d   :  { %5189 = vmatprep.subr.bf16.mxu0 %v7728_v54 }
 0x74d   :  { %v7198_v39 = vpop.f32.mrb[12].mxu1 }
 0x74e   :  { %v2656_v5 = vpop.f32.mrb[13].mxu1  ;;  %v2831_v52 = vsel %vm7193_vm7, %v7198_v39, 0.0 }
 0x74f   :  { %v7205_v49 = vpop.f32.mrb[14].mxu1 }
 0x750   :  { %v2832_v37 = vsel %vm7200_vm10, %v7205_v49, 0.0  ;;  %v2659_v13 = vpop.f32.mrb[15].mxu1 }
 0x751   :  { %v2839_v1 = vadd.f32 %v2832_v37, %v2831_v52  ;;  %v2829_v13 = vld [vmem:[%s7677_s10] sm:$0xff] }
 0x755   :  { %v7220_v40 = vpop.f32.mrb[16].mxu1 }
 0x756   :  { %v2833_v19 = vsel %vm7215_vm11, %v7220_v40, 0.0  ;;  %v2664_v43 = vpop.f32.mrb[17].mxu1 }
 0x757   :  { %v2840_v33 = vadd.f32 %v2839_v1, %v2833_v19  ;;  %v7230_v3 = vpop.f32.mrb[18].mxu1  ;;  %v2830_v1 = vld [vmem:[%s7677_s10 + $0x8] sm:$0xff] }
 0x758   :  { %v2834_v22 = vsel %vm7222_vm4, %v7230_v3, 0.0  ;;  %v2667_v25 = vpop.f32.mrb[19].mxu1  ;;  %v7277_v29 = vpack.c.bf16 %v2830_v1, %v2829_v13 }
 0x759   :  { %v2841_v24 = vadd.f32 %v2840_v33, %v2834_v22 }
 0x75d   :  { %v7242_v28 = vpop.f32.mrb[20].mxu1 }
 0x75e   :  { %v2835_v58 = vsel %vm7237_vm14, %v7242_v28, 0.0  ;;  %v2672_v20 = vpop.f32.mrb[21].mxu1 }
 0x75f   :  { %v2842_v15 = vadd.f32 %v2841_v24, %v2835_v58  ;;  %v2673_v31 = vpop.f32.mrb[22].mxu1 }
 0x760   :  { %v2836_v42 = vsel %vm7244_vm15, %v2673_v31, 0.0  ;;  %v2675_v21 = vpop.f32.mrb[23].mxu1 }
 0x761   :  { %v2843_v23 = vadd.f32 %v2842_v15, %v2836_v42 }
 0x765   :  { %v2678_v36 = vpop.f32.mrb[24].mxu1 }
 0x766   :  { %v2837_v16 = vsel %vm7256_vm13, %v2678_v36, 0.0  ;;  %v2680_v53 = vpop.f32.mrb[25].mxu1 }
 0x767   :  { %v2844_v9 = vadd.f32 %v2843_v23, %v2837_v16  ;;  %v2681_v34 = vpop.f32.mrb[26].mxu1 }
 0x768   :  { %v2838_v18 = vsel %vm7260_vm12, %v2681_v34, 0.0  ;;  %v2683_v51 = vpop.f32.mrb[27].mxu1 }
 0x769   :  { %v2846_v26 = vsel %vm2845_vm1, %v2838_v18, 0.0  ;;  %v3112_v51 = vld [vmem:[%s7672_s5] sm:$0x1] }
 0x76a   :  { %v2847_v32 = vadd.f32 %v2846_v26, %v2844_v9 }
 0x76c   :  { %v2848_v56 = vrot.slane %v2847_v32, 4 }
 0x76e   :  { %v2849_v57 = vadd.f32 %v2848_v56, %v2847_v32  ;;  %v3201_v56 = vld [vmem:[%s7673_s6] sm:$0x1] }
 0x770   :  { %v2850_v5 = vrot.slane %v2849_v57, 2 }
 0x772   :  { %v2851_v6 = vadd.f32 %v2850_v5, %v2849_v57 }
 0x774   :  { %v2852_v52 = vrot.slane %v2851_v6, 1 }
 0x776   :  { %v2853_v37 = vadd.f32 %v2852_v52, %v2851_v6 }
 0x778   :  { %4861 = vmatmul.mubr.f32.vlgmr.msra.gmra.mrb[20].mxu0 %v2853_v37 }
 0x779   :  { %4867 = vmatprep.mubr.msk.f32.mxu0 %vm5671_vm3, %v7742_v2  ;;  %5191 = vmatpush3.bf16.msra.mxu0 %v7277_v29 }
 0x77a   :  { %5192 = vmatprep.subr.bf16.mxu0 %v7728_v54 }
 0x84b   :  { %v2920_v19 = vpop.f32.mrb[20].mxu0 }
 0x84c   :  { %v2925_v43 = vmul.f32 0.0078125, %v2920_v19  ;;  %v4862_v11 = vpop.f32.mrb[21].mxu0 }
 0x84e   :  { %4868 = vmatmul.mubr.msk.f32.vlgmr.msra.gmra.mrb[22].mxu0 %vm1052_vm5, %v2925_v43 }
 0x84f   :  { %5194 = vmatpush3.bf16.msra.mxu0 %v7111_v30  ;;  %4902 = vmatprep.mubr.msk.f32.mxu0 %vm5671_vm3, %v7742_v2 }
 0x850   :  { %5195 = vmatprep.subr.bf16.mxu0 %v7728_v54 }
 0x853   :  { %5197 = vmatpush3.bf16.msra.mxu0 %v7121_v35  ;;  %v7768_v35 = vld [vmem:[#allocation11_spill] sm:$0xff] }
 0x854   :  { %5198 = vmatprep.subr.bf16.mxu0 %v7728_v54 }
 0x857   :  { %5200 = vmatpush3.bf16.msra.mxu0 %v7130_v4 }
 0x858   :  { %5201 = vmatprep.subr.bf16.mxu0 %v7728_v54 }
 0x85b   :  { %5203 = vmatpush3.bf16.msra.mxu0 %v7141_v8 }
 0x85c   :  { %5204 = vmatprep.subr.bf16.mxu0 %v7728_v54 }
 0x85f   :  { %5206 = vmatpush3.bf16.msra.mxu0 %v7151_v62 }
 0x860   :  { %5207 = vmatprep.subr.bf16.mxu0 %v7728_v54 }
 0x863   :  { %5209 = vmatpush3.bf16.msra.mxu0 %v7164_v27 }
 0x864   :  { %5210 = vmatprep.subr.bf16.mxu0 %v7728_v54 }
 0x867   :  { %5212 = vmatpush3.bf16.msra.mxu0 %v7174_v17 }
 0x868   :  { %5213 = vmatprep.subr.bf16.mxu0 %v7728_v54 }
 0x86b   :  { %5215 = vmatpush3.bf16.msra.mxu0 %v7184_v63 }
 0x86c   :  { %5216 = vmatprep.subr.bf16.mxu0 %v7728_v54 }
 0x921   :  { %v2995_v30 = vpop.f32.mrb[22].mxu0 }
 0x922   :  { %v3002_v4 = vrot.slane %v2995_v30, %v7768_v35  ;;  %v4869_v8 = vpop.f32.mrb[23].mxu0 }
 0x924   :  { %v7302_v62 = vsub.f32 %v7198_v39, %v3002_v4  ;;  %v7305_v33 = vsub.f32 %v7205_v49, %v3002_v4  ;;  %v3005_v27 = vsub.f32 %v7220_v40, %v3002_v4  ;;  %v7309_v17 = vsub.f32 %v7230_v3, %v3002_v4 }
 0x925   :  { %v7312_v22 = vsub.f32 %v7242_v28, %v3002_v4  ;;  %v3008_v63 = vsub.f32 %v2673_v31, %v3002_v4  ;;  %v3009_v25 = vsub.f32 %v2678_v36, %v3002_v4  ;;  %v7314_v61 = vsub.f32 %v2681_v34, %v3002_v4 }
 0x926   :  { %v3011_v24 = vmul.f32 %v7302_v62, %v7302_v62  ;;  %v3012_v39 = vmul.f32 %v7305_v33, %v7305_v33  ;;  %v3013_v49 = vmul.f32 %v3005_v27, %v3005_v27  ;;  %v3014_v12 = vmul.f32 %v7309_v17, %v7309_v17 }
 0x927   :  { %v3015_v60 = vmul.f32 %v7312_v22, %v7312_v22  ;;  %v3016_v20 = vmul.f32 %v3008_v63, %v3008_v63  ;;  %v3018_v45 = vmul.f32 %v7314_v61, %v7314_v61  ;;  %v3017_v55 = vmul.f32 %v3009_v25, %v3009_v25 }
 0x928   :  { %v3019_v40 = vsel %vm7193_vm7, %v3011_v24, 0.0  ;;  %v3020_v3 = vsel %vm7200_vm10, %v3012_v39, 0.0  ;;  %v3021_v28 = vsel %vm7215_vm11, %v3013_v49, 0.0  ;;  %v3022_v46 = vsel %vm7222_vm4, %v3014_v12, 0.0 }
 0x929   :  { %v3027_v10 = vadd.f32 %v3020_v3, %v3019_v40  ;;  %v3023_v15 = vsel %vm7237_vm14, %v3015_v60, 0.0  ;;  %v3024_v42 = vsel %vm7244_vm15, %v3016_v20, 0.0  ;;  %v3026_v14 = vsel %vm7260_vm12, %v3018_v45, 0.0  ;;  %v5592_v20 = vld [vmem:[%s7678_s11] sm:$0xff]   ;;  %v5594_v45 = vld [vmem:[%s7678_s11 + $0x10] sm:$0xff]  }
 0x92a   :  { %v3025_v48 = vsel %vm7256_vm13, %v3017_v55, 0.0  ;;  %v3033_v23 = vsel %vm2845_vm1, %v3026_v14, 0.0  ;;  %4939 = vmatpush3.bf16.msra.mxu1 %v5592_v20  ;;  %v5596_v55 = vld [vmem:[%s7678_s11 + $0x20] sm:$0xff]   ;;  %vm5672_vm12 = vmmov 1   ;;  %v5626_v20 = vld [vmem:[%s7681_s14 + $0x10] sm:$0xff]   ;;  %vm7771_vm7 = vcmask 1039360  }
 0x92b   :  { %v3028_v58 = vadd.f32 %v3027_v10, %v3021_v28  ;;  %4940 = vmatprep.subr.bf16.mxu1 %v7742_v2  ;;  %vm7772_vm10 = vmmov %vm7771_vm7  ;;  %vm7775_vm14 = vcmask 1043456   ;;  %vm4202_vm15 = vcmask 982016  }
 0x92c   :  { %vm7773_vm11 = vmmov %vm7771_vm7 }
 0x92d   :  { %v3029_v50 = vadd.f32 %v3028_v58, %v3022_v46  ;;  %v5593_v46 = vld [vmem:[%s7678_s11 + $0x8] sm:$0xff]   ;;  %vm7774_vm4 = vmmov %vm7771_vm7 }
 0x92e   :  { %4941 = vmatpush3.bf16.msra.mxu1 %v5593_v46  ;;  %v5627_v46 = vld [vmem:[%s7681_s14 + $0x18] sm:$0xff]  }
 0x92f   :  { %v3030_v31 = vadd.f32 %v3029_v50, %v3023_v15  ;;  %4942 = vmatprep.subr.bf16.mxu1 %v7742_v2  ;;  %v5595_v50 = vld [vmem:[%s7678_s11 + $0x18] sm:$0xff]   ;;  %v5597_v15 = vld [vmem:[%s7678_s11 + $0x28] sm:$0xff]  }
 0x931   :  { %v3031_v21 = vadd.f32 %v3030_v31, %v3024_v42  ;;  %v5598_v31 = vld [vmem:[%s7678_s11 + $0x30] sm:$0xff]   ;;  %v5599_v42 = vld [vmem:[%s7678_s11 + $0x38] sm:$0xff]  }
 0x932   :  { %4943 = vmatpush3.bf16.msra.mxu1 %v5594_v45  ;;  %v3529_v14 = vand.u32 %v5599_v42, %v6651_v59  ;;  %v5628_v45 = vld [vmem:[%s7681_s14 + $0x20] sm:$0xff]  }
 0x933   :  { %v3032_v38 = vadd.f32 %v3031_v21, %v3025_v48  ;;  %4944 = vmatprep.subr.bf16.mxu1 %v7742_v2 }
 0x935   :  { %v3034_v47 = vadd.f32 %v3033_v23, %v3032_v38 }
 0x936   :  { %4945 = vmatpush3.bf16.msra.mxu1 %v5595_v50  ;;  %v5629_v50 = vld [vmem:[%s7681_s14 + $0x28] sm:$0xff]  }
 0x937   :  { %v3035_v36 = vrot.slane %v3034_v47, 4  ;;  %4946 = vmatprep.subr.bf16.mxu1 %v7742_v2 }
 0x939   :  { %v3036_v16 = vadd.f32 %v3035_v36, %v3034_v47 }
 0x93a   :  { %4947 = vmatpush3.bf16.msra.mxu1 %v5596_v55 }
 0x93b   :  { %v3037_v53 = vrot.slane %v3036_v16, 2  ;;  %4948 = vmatprep.subr.bf16.mxu1 %v7742_v2 }
 0x93d   :  { %v3038_v0 = vadd.f32 %v3037_v53, %v3036_v16 }
 0x93e   :  { %4949 = vmatpush3.bf16.msra.mxu1 %v5597_v15  ;;  %v5600_v15 = vld [vmem:[%s7678_s11 + $0x40] sm:$0xff]  }
 0x93f   :  { %v3039_v9 = vrot.slane %v3038_v0, 1  ;;  %4950 = vmatprep.subr.bf16.mxu1 %v7742_v2 }
 0x941   :  { %v3040_v34 = vadd.f32 %v3039_v9, %v3038_v0 }
 0x942   :  { %4951 = vmatpush3.bf16.msra.mxu1 %v5598_v31 }
 0x943   :  { %4903 = vmatmul.mubr.f32.vlgmr.msra.gmra.mrb[24].mxu0 %v3040_v34  ;;  %4952 = vmatprep.subr.bf16.mxu1 %v7742_v2 }
 0x944   :  { %5218 = vmatpush3.bf16.msra.mxu0 %v7277_v29  ;;  %4909 = vmatprep.mubr.msk.f32.mxu0 %vm5671_vm3, %v7742_v2 }
 0x945   :  { %5219 = vmatprep.subr.bf16.mxu0 %v7728_v54 }
 0x946   :  { %4953 = vmatpush3.bf16.msra.mxu1 %v3529_v14  ;;  %v5601_v14 = vld [vmem:[%s7678_s11 + $0x48] sm:$0xff]  }
 0x947   :  { %4977 = vmatprep.subr.bf16.mxu1 %v7742_v2 }
 0xa16   :  { %v3107_v44 = vpop.f32.mrb[24].mxu0 }
 0xa17   :  { %v3111_v7 = vmul.f32 0.0078125, %v3107_v44  ;;  %v4904_v41 = vpop.f32.mrb[25].mxu0 }
 0xa19   :  { %v3113_v18 = vadd.f32 1e-05, %v3111_v7 }
 0xa1b   :  { %5640 = vrsqrt.f32 %v3113_v18 }
 0xa25   :  { %v5641_v26 = vpop.eup %5640 }
 0xa26   :  { %v3115_v32 = vmul.f32 %v5641_v26, %v3112_v51 }
 0xa28   :  { %4910 = vmatmul.mubr.msk.f32.vlgmr.msra.gmra.mrb[26].mxu0 %vm1052_vm5, %v3115_v32 }
 0xa29   :  { %5221 = vmatpush3.bf16.msra.mxu0 %v7277_v29  ;;  %4916 = vmatprep.mubr.msk.f32.mxu0 %vm5671_vm3, %v7742_v2 }
 0xa2a   :  { %5222 = vmatprep.subr.bf16.mxu0 %v7728_v54 }
 0xa2c   :  { %4917 = vmatmul.mubr.msk.f32.vlgmr.msra.gmra.mrb[28].mxu0 %vm1052_vm5, %v3201_v56  ;;  %vm3387_vm5 = vcmask 1040384  }
 0xa2d   :  { %4935 = vmatprep.mubr.msk.f32.mxu0 %vm5671_vm3, %v7742_v2  ;;  %vm7431_vm1 = vmpackc.low %vm3387_vm5, %vm5672_vm12 }
 0xafb   :  { %v3185_v57 = vpop.f32.mrb[26].mxu0 }
 0xafc   :  { %v3192_v5 = vrot.slane %v3185_v57, %v7768_v35  ;;  %v4911_v6 = vpop.f32.mrb[27].mxu0 }
 0xafe   :  { %v3195_v37 = vmul.f32 %v3192_v5, %v3005_v27  ;;  %v3193_v29 = vmul.f32 %v3192_v5, %v7302_v62  ;;  %v3194_v19 = vmul.f32 %v3192_v5, %v7305_v33  ;;  %v3198_v43 = vmul.f32 %v3192_v5, %v3008_v63 }
 0xaff   :  { %v3271_v52 = vpop.f32.mrb[28].mxu0  ;;  %v3199_v11 = vmul.f32 %v3192_v5, %v3009_v25  ;;  %v3196_v30 = vmul.f32 %v3192_v5, %v7309_v17  ;;  %v3197_v4 = vmul.f32 %v3192_v5, %v7312_v22  ;;  %v3200_v8 = vmul.f32 %v3192_v5, %v7314_v61 }
 0xb00   :  { %v3278_v13 = vrot.slane %v3271_v52, %v7768_v35  ;;  %v4918_v1 = vpop.f32.mrb[29].mxu0 }
 0xb02   :  { %v3281_v24 = vadd.f32 %v3278_v13, %v3195_v37  ;;  %v3279_v39 = vadd.f32 %v3278_v13, %v3193_v29  ;;  %v3280_v49 = vadd.f32 %v3278_v13, %v3194_v19  ;;  %v7368_v40 = vadd.f32 %v3278_v13, %v3198_v43 }
 0xb03   :  { %v7370_v27 = vadd.f32 %v3278_v13, %v3199_v11  ;;  %v7372_v35 = vadd.f32 %v3278_v13, %v3196_v30  ;;  %v7374_v62 = vadd.f32 %v3278_v13, %v3197_v4  ;;  %v7376_v33 = vadd.f32 %v3278_v13, %v3200_v8 }
 0xb04   :  { %v3289_v63 = vmax.f32 %v3281_v24, 0.0  ;;  %v3287_v25 = vmax.f32 %v3279_v39, 0.0  ;;  %v3288_v17 = vmax.f32 %v3280_v49, 0.0  ;;  %v3292_v22 = vmax.f32 %v7368_v40, 0.0 }
 0xb05   :  { %v3293_v61 = vmax.f32 %v7370_v27, 0.0  ;;  %v3290_v12 = vmax.f32 %v7372_v35, 0.0  ;;  %v3291_v10 = vmax.f32 %v7374_v62, 0.0  ;;  %v3294_v58 = vmax.f32 %v7376_v33, 0.0 }
 0xb06   :  { %3307 = vrot.lane.b32.xlu0 %v3289_v63, %s5669_s22  ;;  %v5502_v3 = vpack.i.bf16 %v3288_v17, %v3287_v25 }
 0xb07   :  { %v5512_v60 = vpack.i.bf16 %v3293_v61, %v3292_v22  ;;  %v5507_v28 = vpack.i.bf16 %v3291_v10, %v3290_v12 }
 0xb08   :  { %5503 = vrot.lane.b32.xlu1 %v5502_v3, %s5669_s22 }
 0xb0a   :  { %5513 = vrot.lane.b32.xlu0 %v5512_v60, %s5669_s22  ;;  %v4623_v60 = vld [vmem:[%s7679_s12 + $0x4] sm:$0x3] }
 0xb0c   :  { %5508 = vrot.lane.b32.xlu1 %v5507_v28, %s5669_s22  ;;  %v4651_v28 = vld [vmem:[%s7679_s12 + $0x6] sm:$0x3] }
 0xb10   :  { %3317 = vrot.lane.b32.xlu1 %v3294_v58, %s5669_s22  ;;  %s5673_s22 = smov [#allocation2]  }
 0xb11   :  { %s4358_s2 = sshll.u32 %s5673_s22, 4  ;;  %s4359_s2 = int_to_ptr.vmem [resolvable:$true] %s4358_s2 }
 0xb12   :  { %p5647_p1 = scmp.lt.s32.totalorder %s4359_s2, %s4359_s2 }
 0xb78   :  { %v3308_v21 = vpop.permute.xlu0 %3307 }
 0xb79   :  { %v3329_v38 = vmax.f32 %v3289_v63, %v3308_v21  ;;  %v5602_v21 = vld [vmem:[%s7678_s11 + $0x50] sm:$0xff]  }
 0xb7a   :  { %v5504_v48 = vpop.permute.xlu1 %5503 }
 0xb7b   :  { %v5506_v23 = vunpack.i.h.bf16 %v5504_v48  ;;  %v5505_v47 = vunpack.i.l.bf16 %v5504_v48  ;;  %v3346_v44 = vrot.slane %v3329_v38, 2  ;;  %v5603_v48 = vld [vmem:[%s7678_s11 + $0x58] sm:$0xff]  }
 0xb7c   :  { %v5514_v36 = vpop.permute.xlu0 %5513 }
 0xb7d   :  { %v3328_v16 = vmax.f32 %v3288_v17, %v5506_v23  ;;  %v3327_v53 = vmax.f32 %v3287_v25, %v5505_v47  ;;  %v5516_v0 = vunpack.i.h.bf16 %v5514_v36  ;;  %v5515_v9 = vunpack.i.l.bf16 %v5514_v36  ;;  %v5605_v36 = vld [vmem:[%s7678_s11 + $0x68] sm:$0xff]  }
 0xb7e   :  { %v5509_v34 = vpop.permute.xlu1 %5508 }
 0xb7f   :  { %v3344_v7 = vrot.slane %v3328_v16, 2  ;;  %v3343_v41 = vrot.slane %v3327_v53, 2  ;;  %v5511_v18 = vunpack.i.h.bf16 %v5509_v34  ;;  %v5510_v51 = vunpack.i.l.bf16 %v5509_v34  ;;  %v5608_v34 = vld [vmem:[%s7678_s11 + $0x80] sm:$0xff]  }
 0xb80   :  { %v3333_v56 = vmax.f32 %v3293_v61, %v5516_v0  ;;  %v3332_v57 = vmax.f32 %v3292_v22, %v5515_v9  ;;  %v5633_v61 = vld [vmem:[%s7683_s16 + $0x8] sm:$0xff]  }
 0xb81   :  { %v3347_v26 = vsel %vm158_vm0, %v3344_v7, %v3346_v44  ;;  %v3345_v32 = vsel %vm158_vm0, %v3343_v41, %v3344_v7  ;;  %v3331_v52 = vmax.f32 %v3291_v10, %v5511_v18  ;;  %v3330_v37 = vmax.f32 %v3290_v12, %v5510_v51  ;;  %v3382_v12 = vld [vmem:[%s7679_s12] sm:$0x3]  ;;  %v4595_v10 = vld [vmem:[%s7679_s12 + $0x2] sm:$0x3]  ;;  %v5609_v41 = vld [vmem:[%s7678_s11 + $0x88] sm:$0xff]  }
 0xb82   :  { %v3367_v5 = vmax.f32 %v3328_v16, %v3347_v26  ;;  %v3366_v6 = vmax.f32 %v3327_v53, %v3345_v32  ;;  %v3318_v13 = vpop.permute.xlu1 %3317  ;;  %v3354_v11 = vrot.slane %v3333_v56, 2  ;;  %v3352_v30 = vrot.slane %v3332_v57, 2  ;;  %v5606_v16 = vld [vmem:[%s7678_s11 + $0x70] sm:$0xff]   ;;  %v5607_v53 = vld [vmem:[%s7678_s11 + $0x78] sm:$0xff]   ;;  %v5612_v26 = vld [vmem:[%s7678_s11 + $0xa0] sm:$0xff]  }
 0xb83   :  { %v3334_v1 = vmax.f32 %v3294_v58, %v3318_v13  ;;  %v3350_v29 = vrot.slane %v3331_v52, 2  ;;  %v3348_v19 = vrot.slane %v3330_v37, 2  ;;  %v5624_v58 = vld [vmem:[%s7681_s14] sm:$0xff]   ;;  %v3716_v0 = vand.u32 %v5607_v53, %v6651_v59  ;;  %v5610_v18 = vld [vmem:[%s7678_s11 + $0x90] sm:$0xff]   ;;  %v5611_v51 = vld [vmem:[%s7678_s11 + $0x98] sm:$0xff]  }
 0xb84   :  { %v5223_v43 = vpack.c.bf16 %v3367_v5, %v3366_v6  ;;  %v3355_v27 = vsel %vm158_vm0, %v3352_v30, %v3354_v11  ;;  %v5614_v5 = vld [vmem:[%s7678_s11 + $0xb0] sm:$0xff]   ;;  %v5615_v6 = vld [vmem:[%s7678_s11 + $0xb8] sm:$0xff]   ;;  %v5616_v13 = vld [vmem:[%s7678_s11 + $0xc0] sm:$0xff]  }
 0xb85   :  { %v3349_v4 = vsel %vm158_vm0, %v3346_v44, %v3348_v19  ;;  %v3351_v8 = vsel %vm158_vm0, %v3348_v19, %v3350_v29  ;;  %v3353_v24 = vsel %vm158_vm0, %v3350_v29, %v3352_v30  ;;  %v3356_v49 = vrot.slane %v3334_v1, 2  ;;  %v5618_v29 = vld [vmem:[%s7678_s11 + $0xd0] sm:$0xff]   ;;  %v5619_v19 = vld [vmem:[%s7678_s11 + $0xd8] sm:$0xff]  }
 0xb86   :  { %5224 = vmatpush3.bf16.msra.mxu0 %v5223_v43  ;;  %v3369_v39 = vmax.f32 %v3330_v37, %v3351_v8  ;;  %v3368_v40 = vmax.f32 %v3329_v38, %v3349_v4  ;;  %v3370_v35 = vmax.f32 %v3331_v52, %v3353_v24  ;;  %v3371_v63 = vmax.f32 %v3332_v57, %v3355_v27  ;;  %v5604_v38 = vld [vmem:[%s7678_s11 + $0x60] sm:$0xff]   ;;  %v5613_v57 = vld [vmem:[%s7678_s11 + $0xa8] sm:$0xff]   ;;  %v5622_v30 = vld [vmem:[%s7678_s11 + $0xf0] sm:$0xff]  }
 0xb87   :  { %5225 = vmatprep.subr.bf16.mxu0 %v7728_v54  ;;  %v3357_v33 = vsel %vm158_vm0, %v3354_v11, %v3356_v49  ;;  %v3373_v17 = vmax.f32 %v3334_v1, %v3356_v49  ;;  %vm3383_vm0 = vcmask 465920   ;;  %v3903_v52 = vand.u32 %v5615_v6, %v6651_v59  ;;  %v5617_v1 = vld [vmem:[%s7678_s11 + $0xc8] sm:$0xff]   ;;  %v5623_v4 = vld [vmem:[%s7678_s11 + $0xf8] sm:$0xff]  }
 0xb88   :  { %v5226_v62 = vpack.c.bf16 %v3369_v39, %v3368_v40  ;;  %v3372_v25 = vmax.f32 %v3333_v56, %v3357_v33  ;;  %v5229_v22 = vpack.c.bf16 %v3371_v63, %v3370_v35  ;;  %v5621_v11 = vld [vmem:[%s7678_s11 + $0xe8] sm:$0xff]   ;;  %v4090_v8 = vand.u32 %v5623_v4, %v6651_v59  ;;  %v5630_v39 = vld [vmem:[%s7681_s14 + $0x30] sm:$0xff]   ;;  %v5631_v49 = vld [vmem:[%s7681_s14 + $0x38] ss:$0 sps:$4 sm:$0xff]  }
 0xb89   :  { %v4207_v40 = vsel %vm7775_vm14, %v5631_v49, 0  ;;  %v4583_v59 = vld [vmem:[%s7680_s13] ss:$0 sm:$0xff] }
 0xb8a   :  { %5227 = vmatpush3.bf16.msra.mxu0 %v5226_v62  ;;  %v5232_v3 = vpack.c.bf16 %v3373_v17, %v3372_v25  ;;  %v5632_v17 = vld [vmem:[%s7683_s16] sm:$0xff]  }
 0xb8b   :  { %5228 = vmatprep.subr.bf16.mxu0 %v7728_v54 }
 0xb8e   :  { %5230 = vmatpush3.bf16.msra.mxu0 %v5229_v22 }
 0xb8f   :  { %5231 = vmatprep.subr.bf16.mxu0 %v7728_v54 }
 0xb92   :  { %5234 = vmatpush3.bf16.msk.msra.mxu0 %vm7431_vm1, %v5232_v3 }
 0xb93   :  { %5235 = vmatprep.subr.bf16.mxu0 %v7728_v54 }
 0xb95   :  { %4936 = vmatmul.mubr.msk.f32.vlgmr.msra.gmra.mrb[30].mxu0 %vm3383_vm0, %v3382_v12  ;;  %v5635_v12 = vld [vmem:[%s7683_s16 + $0x18] sm:$0xff]  }
 0xb96   :  { %5237 = vmatpush3.bf16.msra.mxu0 %v5223_v43  ;;  %4974 = vmatprep.mubr.msk.f32.mxu0 %vm5671_vm3, %v7742_v2 }
 0xb97   :  { %5238 = vmatprep.subr.bf16.mxu0 %v7728_v54 }
 0xb9a   :  { %5240 = vmatpush3.bf16.msra.mxu0 %v5226_v62 }
 0xb9b   :  { %5241 = vmatprep.subr.bf16.mxu0 %v7728_v54 }
 0xb9e   :  { %5243 = vmatpush3.bf16.msra.mxu0 %v5229_v22 }
 0xb9f   :  { %5244 = vmatprep.subr.bf16.mxu0 %v7728_v54 }
 0xba2   :  { %5247 = vmatpush3.bf16.msk.msra.mxu0 %vm7431_vm1, %v5232_v3 }
 0xba3   :  { %5248 = vmatprep.subr.bf16.mxu0 %v7728_v54 }
 0xba5   :  { %4975 = vmatmul.mubr.msk.f32.vlgmr.msra.gmra.mrb[32].mxu0 %vm3383_vm0, %v4595_v10  ;;  %v5636_v10 = vld [vmem:[%s7683_s16 + $0x20] sm:$0xff]  }
 0xba6   :  { %5250 = vmatpush3.bf16.msra.mxu0 %v5223_v43  ;;  %5013 = vmatprep.mubr.msk.f32.mxu0 %vm5671_vm3, %v7742_v2 }
 0xba7   :  { %5251 = vmatprep.subr.bf16.mxu0 %v7728_v54 }
 0xbaa   :  { %5253 = vmatpush3.bf16.msra.mxu0 %v5226_v62 }
 0xbab   :  { %5254 = vmatprep.subr.bf16.mxu0 %v7728_v54 }
 0xbae   :  { %5256 = vmatpush3.bf16.msra.mxu0 %v5229_v22 }
 0xbaf   :  { %5257 = vmatprep.subr.bf16.mxu0 %v7728_v54 }
 0xbb2   :  { %5260 = vmatpush3.bf16.msk.msra.mxu0 %vm7431_vm1, %v5232_v3 }
 0xbb3   :  { %5261 = vmatprep.subr.bf16.mxu0 %v7728_v54 }
 0xbb5   :  { %5014 = vmatmul.mubr.msk.f32.vlgmr.msra.gmra.mrb[34].mxu0 %vm3383_vm0, %v4623_v60  ;;  %v5637_v60 = vld [vmem:[%s7683_s16 + $0x28] ss:$0 sps:$4 sm:$0x33]  }
 0xbb6   :  { %5263 = vmatpush3.bf16.msra.mxu0 %v5223_v43  ;;  %5052 = vmatprep.mubr.msk.f32.mxu0 %vm5671_vm3, %v7742_v2  ;;  %v5620_v43 = vld [vmem:[%s7678_s11 + $0xe0] sm:$0xff]  }
 0xbb7   :  { %5264 = vmatprep.subr.bf16.mxu0 %v7728_v54 }
 0xbba   :  { %5266 = vmatpush3.bf16.msra.mxu0 %v5226_v62 }
 0xbbb   :  { %5267 = vmatprep.subr.bf16.mxu0 %v7728_v54 }
 0xbbe   :  { %5269 = vmatpush3.bf16.msra.mxu0 %v5229_v22 }
 0xbbf   :  { %5270 = vmatprep.subr.bf16.mxu0 %v7728_v54  ;;  %v5625_v54 = vld [vmem:[%s7681_s14 + $0x8] sm:$0xff]  }
 0xbc2   :  { %5273 = vmatpush3.bf16.msk.msra.mxu0 %vm7431_vm1, %v5232_v3  ;;  %v5634_v3 = vld [vmem:[%s7683_s16 + $0x10] sm:$0xff]  }
 0xbc3   :  { %5075 = vmatprep.subr.bf16.mxu0 %v7742_v2 }
 0xbc5   :  { %5053 = vmatmul.mubr.msk.f32.vlgmr.msra.gmra.mrb[36].mxu0 %vm3383_vm0, %v4651_v28 }
 0xbc6   :  { %5091 = vmatprep.mubr.msk.bf16.mxu0 %vm5671_vm3, %v7742_v2  ;;  %5076 = vmatpush3.bf16.msra.mxu0 %v5624_v58  ;;  %v4679_v58 = vld [vmem:[%s7682_s15] ss:$0 sm:$0xff]  ;;  %s5642_s15 = scalar_lea.vmem %s4359_s2, 32 }
 0xbc7   :  { %5077 = vmatprep.subr.bf16.mxu0 %v7742_v2  ;;  %p5643_p0 = scmp.ne.s32.totalorder %s4359_s2, %s5642_s15  ;;  %p5648_p2 = scmp.lt.s32.totalorder %s5642_s15, %s5642_s15 }
 0xbc9   :  { %p5649_p3 = por %p5648_p2, %p5647_p1 }
 0xbca   :  { %5078 = vmatpush3.bf16.msra.mxu0 %v5625_v54 }
 0xbcb   :  { %5079 = vmatprep.subr.bf16.mxu0 %v7742_v2  ;;  %p5650_p4 = pnand %p5649_p3, %p5643_p0 }
 0xbce   :  { %5080 = vmatpush3.bf16.msra.mxu0 %v5626_v20 }
 0xbcf   :  { %5081 = vmatprep.subr.bf16.mxu0 %v7742_v2 }
 0xbd2   :  { %5082 = vmatpush3.bf16.msra.mxu0 %v5627_v46 }
 0xbd3   :  { %5083 = vmatprep.subr.bf16.mxu0 %v7742_v2 }
 0xbd6   :  { %5084 = vmatpush3.bf16.msra.mxu0 %v5628_v45 }
 0xbd7   :  { %5085 = vmatprep.subr.bf16.mxu0 %v7742_v2 }
 0xbda   :  { %5086 = vmatpush3.bf16.msra.mxu0 %v5629_v50 }
 0xbdb   :  { %5087 = vmatprep.subr.bf16.mxu0 %v7742_v2 }
 0xbde   :  { %5088 = vmatpush3.bf16.msra.mxu0 %v5630_v39 }
 0xbdf   :  { %5089 = vmatprep.subr.bf16.mxu0 %v7742_v2 }
 0xbe2   :  { %5090 = vmatpush3.bf16.msra.mxu0 %v4207_v40 }
 0xbe3   :  { %5095 = vmatprep.subr.bf16.mxu0 %v7742_v2 }
 0xc68   :  { %v3457_v55 = vpop.f32.mrb[30].mxu0 }
 0xc69   :  { %v3461_v31 = vpack.c.bf16 %v3457_v55, %v3457_v55  ;;  %v4937_v42 = vpop.f32.mrb[31].mxu0 }
 0xc6b   :  { %4955 = vmatmul.mubr.msk.bf16.vlgmr.msra.gmra.mrb[28].mxu1 %vm7771_vm7, %v3461_v31  ;;  %v4689_v31 = vld [vmem:[%s7684_s17] ss:$0 sm:$0xff] }
 0xc6c   :  { %4978 = vmatpush3.bf16.msra.mxu1 %v5600_v15  ;;  %4993 = vmatprep.mubr.msk.bf16.mxu1 %vm5671_vm3, %v7742_v2 }
 0xc6d   :  { %4979 = vmatprep.subr.bf16.mxu1 %v7742_v2 }
 0xc70   :  { %4980 = vmatpush3.bf16.msra.mxu1 %v5601_v14 }
 0xc71   :  { %4981 = vmatprep.subr.bf16.mxu1 %v7742_v2 }
 0xc74   :  { %4982 = vmatpush3.bf16.msra.mxu1 %v5602_v21 }
 0xc75   :  { %4983 = vmatprep.subr.bf16.mxu1 %v7742_v2 }
 0xc78   :  { %4984 = vmatpush3.bf16.msra.mxu1 %v5603_v48  ;;  %v3643_v23 = vpop.f32.mrb[32].mxu0 }
 0xc79   :  { %4985 = vmatprep.subr.bf16.mxu1 %v7742_v2  ;;  %v4976_v47 = vpop.f32.mrb[33].mxu0  ;;  %v3647_v9 = vpack.c.bf16 %v3643_v23, %v3643_v23 }
 0xc7c   :  { %4986 = vmatpush3.bf16.msra.mxu1 %v5604_v38 }
 0xc7d   :  { %4987 = vmatprep.subr.bf16.mxu1 %v7742_v2 }
 0xc80   :  { %4988 = vmatpush3.bf16.msra.mxu1 %v5605_v36 }
 0xc81   :  { %4989 = vmatprep.subr.bf16.mxu1 %v7742_v2 }
 0xc84   :  { %4990 = vmatpush3.bf16.msra.mxu1 %v5606_v16 }
 0xc85   :  { %4991 = vmatprep.subr.bf16.mxu1 %v7742_v2 }
 0xc88   :  { %4992 = vmatpush3.bf16.msra.mxu1 %v3716_v0  ;;  %v3830_v44 = vpop.f32.mrb[34].mxu0 }
 0xc89   :  { %5016 = vmatprep.subr.bf16.mxu1 %v7742_v2  ;;  %v5015_v7 = vpop.f32.mrb[35].mxu0  ;;  %v3834_v37 = vpack.c.bf16 %v3830_v44, %v3830_v44 }
 0xc8b   :  { %4994 = vmatmul.mubr.msk.bf16.vlgmr.msra.gmra.mrb[28].mxu1 %vm7772_vm10, %v3647_v9 }
 0xc8c   :  { %5017 = vmatpush3.bf16.msra.mxu1 %v5608_v34  ;;  %5032 = vmatprep.mubr.msk.bf16.mxu1 %vm5671_vm3, %v7742_v2 }
 0xc8d   :  { %5018 = vmatprep.subr.bf16.mxu1 %v7742_v2 }
 0xc90   :  { %5019 = vmatpush3.bf16.msra.mxu1 %v5609_v41 }
 0xc91   :  { %5020 = vmatprep.subr.bf16.mxu1 %v7742_v2 }
 0xc94   :  { %5021 = vmatpush3.bf16.msra.mxu1 %v5610_v18 }
 0xc95   :  { %5022 = vmatprep.subr.bf16.mxu1 %v7742_v2 }
 0xc98   :  { %5023 = vmatpush3.bf16.msra.mxu1 %v5611_v51  ;;  %v4017_v32 = vpop.f32.mrb[36].mxu0 }
 0xc99   :  { %5024 = vmatprep.subr.bf16.mxu1 %v7742_v2  ;;  %v5054_v56 = vpop.f32.mrb[37].mxu0  ;;  %v4021_v24 = vpack.c.bf16 %v4017_v32, %v4017_v32 }
 0xc9c   :  { %5025 = vmatpush3.bf16.msra.mxu1 %v5612_v26 }
 0xc9d   :  { %5026 = vmatprep.subr.bf16.mxu1 %v7742_v2 }
 0xca0   :  { %5027 = vmatpush3.bf16.msra.mxu1 %v5613_v57 }
 0xca1   :  { %5028 = vmatprep.subr.bf16.mxu1 %v7742_v2 }
 0xca4   :  { %5029 = vmatpush3.bf16.msra.mxu1 %v5614_v5 }
 0xca5   :  { %5030 = vmatprep.subr.bf16.mxu1 %v7742_v2 }
 0xca8   :  { %5031 = vmatpush3.bf16.msra.mxu1 %v3903_v52 }
 0xca9   :  { %5055 = vmatprep.subr.bf16.mxu1 %v7742_v2 }
 0xcab   :  { %5033 = vmatmul.mubr.msk.bf16.vlgmr.msra.gmra.mrb[28].mxu1 %vm7773_vm11, %v3834_v37 }
 0xcac   :  { %5056 = vmatpush3.bf16.msra.mxu1 %v5616_v13  ;;  %5071 = vmatprep.mubr.msk.bf16.mxu1 %vm5671_vm3, %v7742_v2 }
 0xcad   :  { %5057 = vmatprep.subr.bf16.mxu1 %v7742_v2 }
 0xcb0   :  { %5058 = vmatpush3.bf16.msra.mxu1 %v5617_v1 }
 0xcb1   :  { %5059 = vmatprep.subr.bf16.mxu1 %v7742_v2 }
 0xcb4   :  { %5060 = vmatpush3.bf16.msra.mxu1 %v5618_v29 }
 0xcb5   :  { %5061 = vmatprep.subr.bf16.mxu1 %v7742_v2 }
 0xcb8   :  { %5062 = vmatpush3.bf16.msra.mxu1 %v5619_v19 }
 0xcb9   :  { %5063 = vmatprep.subr.bf16.mxu1 %v7742_v2 }
 0xcbc   :  { %5064 = vmatpush3.bf16.msra.mxu1 %v5620_v43 }
 0xcbd   :  { %5065 = vmatprep.subr.bf16.mxu1 %v7742_v2 }
 0xcc0   :  { %5066 = vmatpush3.bf16.msra.mxu1 %v5621_v11 }
 0xcc1   :  { %5067 = vmatprep.subr.bf16.mxu1 %v7742_v2 }
 0xcc4   :  { %5068 = vmatpush3.bf16.msra.mxu1 %v5622_v30 }
 0xcc5   :  { %5069 = vmatprep.subr.bf16.mxu1 %v7742_v2 }
 0xcc8   :  { %5070 = vmatpush3.bf16.msra.mxu1 %v4090_v8 }
 0xccb   :  { %5072 = vmatmul.mubr.msk.bf16.vlgmr.msra.gmra.mrb[28].mxu1 %vm7774_vm4, %v4021_v24 }
 0xd9e   :  { %v4126_v27 = vpop.f32.mrb[28].mxu1 }
 0xd9f   :  { %v5274_v35 = vadd.f32 %v4583_v59, %v4126_v27  ;;  %v5073_v62 = vpop.f32.mrb[29].mxu1 }
 0xda0   :  { %v4129_v33 = vpop.f32.mrb[30].mxu1 }
 0xda1   :  { %v4133_v63 = vmax.f32 %v5274_v35, 0.0  ;;  %v5074_v25 = vpop.f32.mrb[31].mxu1 }
 0xda3   :  { %v4134_v22 = vpack.c.bf16 %v4133_v63, %v4133_v63 }
 0xda5   :  { %5092 = vmatmul.mubr.msk.bf16.vlgmr.msra.gmra.mrb[40].mxu0 %vm4202_vm15, %v4134_v22 }
 0xda6   :  { %5096 = vmatpush3.bf16.msra.mxu0 %v5632_v17  ;;  %5107 = vmatprep.mubr.msk.bf16.mxu0 %vm5671_vm3, %v7742_v2  ;;  %vm4306_vm3 = vcmask 1041408  }
 0xda7   :  { %5097 = vmatprep.subr.bf16.mxu0 %v7742_v2  ;;  %v4308_v28 = vsel %vm4306_vm3, %v5637_v60, 0 }
 0xdaa   :  { %5098 = vmatpush3.bf16.msra.mxu0 %v5633_v61 }
 0xdab   :  { %5099 = vmatprep.subr.bf16.mxu0 %v7742_v2 }
 0xdae   :  { %5100 = vmatpush3.bf16.msra.mxu0 %v5634_v3 }
 0xdaf   :  { %5101 = vmatprep.subr.bf16.mxu0 %v7742_v2 }
 0xdb2   :  { %5102 = vmatpush3.bf16.msra.mxu0 %v5635_v12 }
 0xdb3   :  { %5103 = vmatprep.subr.bf16.mxu0 %v7742_v2 }
 0xdb6   :  { %5104 = vmatpush3.bf16.msra.mxu0 %v5636_v10 }
 0xdb7   :  { %5105 = vmatprep.subr.bf16.mxu0 %v7742_v2 }
 0xdba   :  { %5106 = vmatpush3.bf16.msra.mxu0 %v4308_v28 }
 0xe78   :  { %v4243_v54 = vpop.f32.mrb[40].mxu0 }
 0xe79   :  { %v4244_v20 = vadd.f32 %v4679_v58, %v4243_v54  ;;  %v5093_v46 = vpop.f32.mrb[41].mxu0 }
 0xe7a   :  { %v4246_v45 = vpop.f32.mrb[42].mxu0 }
 0xe7b   :  { %v4249_v50 = vmax.f32 %v4244_v20, 0.0  ;;  %v5094_v55 = vpop.f32.mrb[43].mxu0 }
 0xe7d   :  { %v4250_v15 = vpack.c.bf16 %v4249_v50, %v4249_v50 }
 0xe7f   :  { %5108 = vmatmul.mubr.msk.bf16.vlgmr.msra.gmra.mrb[44].mxu0 %vm4302_vm8, %v4250_v15 }
 0xf52   :  { %v4344_v2 = vpop.f32.mrb[44].mxu0 }
 0xf53   :  { %v4345_v42 = vadd.f32 %v4689_v31, %v4344_v2  ;;  %v5109_v14 = vpop.f32.mrb[45].mxu0 }
 0xf54   :  { %v4347_v21 = vpop.f32.mrb[46].mxu0 }
 0xf55   :  { %v5110_v48 = vpop.f32.mrb[47].mxu0  ;;  %4351 = vst.msk [vmem:[#allocation2] sm:$0x3] %vm4350_vm9, %v4345_v42 }
 0xf56   :  { %5653 = shalt.err (!%p5650_p4)
}
 0xf57   :  { %s5654_s17 = scalar_lea.hbm %s7685_s18, 32 }
 0xf58   :  { %p5655_p5 = scmp.ne.s32.totalorder %s7685_s18, %s5654_s17  ;;  %p5658_p6 = scmp.lt.u32.totalorder %s5654_s17, %s7685_s18 }
 0xf5a   :  { %p5660_p7 = pnand %p5658_p6, %p5655_p5 }
 0xf5c   :  { %5663 = shalt.err (!%p5660_p7)
}
 0xf5d   :  { %4361 = dma.vmem_to_hbm [thread:$0]  %s4359_s2, 32, %s7685_s18, [#allocation3]  }
 0xf5e   :  { %5664 = dma.done.wait [#allocation3], 32  }
 0xf5f   :  { %5665 = vsyncadd [#allocation3], 4294967264 }
 0xf60   :  { %4365 = vsyncpa [#allocation3], 1 }

</bundles_post_ra>
